<compile_context>
chip_gen: v5e
topology: v5e:2x2
jax: 0.10.0
libtpu: 0.0.40
codegen_flags: <defaults>
</compile_context>

<pallas_src>
import functools

import jax
import jax.numpy as jnp
from jax.experimental import pallas as pl
from jax.experimental.pallas import tpu as pltpu

EPS = 1e-5
_VMEM_LIMIT = 48 * 1024 * 1024  # fits v7x's 64 MiB physical VMEM with headroom
_WHOLE = pl.BlockSpec(memory_space=pltpu.MemorySpace.VMEM)


def _pick_row_tile(rows, requested=None, multiple=8):
    """Largest tile <= requested (default 512) that divides `rows` and is a
    multiple of `multiple`; falls back to the full row count (always legal)."""
    tile = min(requested or 512, rows)
    if tile >= rows:
        return rows
    tile = (tile // multiple) * multiple
    while tile >= multiple and rows % tile != 0:
        tile -= multiple
    return tile if tile >= multiple else rows


def _bn_train(h, gamma, beta):
    """Train-mode BN over rows; one-pass variance, folded scale/shift."""
    mean = jnp.mean(h, axis=0, keepdims=True)
    var = jnp.mean(h * h, axis=0, keepdims=True) - mean * mean
    scale = gamma * jax.lax.rsqrt(var + EPS)
    return h * scale + (beta - mean * scale)


# ----------------------------------------------------------------------------
# BN statistics pass: global column stats of (x @ W), tiled over rows.
# ----------------------------------------------------------------------------
def _bn_stats_kernel(x_ref, w_ref, g_ref, b_ref, scale_ref, shift_ref,
                     sum_sc, sq_sc, *, n_rows):
    r = pl.program_id(0)

    @pl.when(r == 0)
    def _():
        sum_sc[...] = jnp.zeros_like(sum_sc)
        sq_sc[...] = jnp.zeros_like(sq_sc)

    h = jnp.dot(x_ref[...], w_ref[...], preferred_element_type=jnp.float32)
    sum_sc[...] += jnp.sum(h, axis=0, keepdims=True)
    sq_sc[...] += jnp.sum(h * h, axis=0, keepdims=True)

    @pl.when(r == pl.num_programs(0) - 1)
    def _():
        inv_n = 1.0 / float(n_rows)
        mean = sum_sc[...] * inv_n
        var = sq_sc[...] * inv_n - mean * mean
        scale = g_ref[...] * jax.lax.rsqrt(var + EPS)
        scale_ref[...] = scale
        shift_ref[...] = b_ref[...] - mean * scale


def bn_stats(x, w, gamma, beta, *, row_tile=None):
    """Global train-mode BN stats of h = x @ W; returns folded (scale, shift)."""
    m, cin = x.shape
    cout = w.shape[1]
    tr = _pick_row_tile(m, row_tile)
    kern = functools.partial(_bn_stats_kernel, n_rows=m)
    return pl.pallas_call(
        kern,
        grid=(m // tr,),
        out_shape=(jax.ShapeDtypeStruct((1, cout), jnp.float32),
                   jax.ShapeDtypeStruct((1, cout), jnp.float32)),
        in_specs=[pl.BlockSpec((tr, cin), lambda r: (r, 0)),
                  pl.BlockSpec((cin, cout), lambda r: (0, 0)),
                  pl.BlockSpec((1, cout), lambda r: (0, 0)),
                  pl.BlockSpec((1, cout), lambda r: (0, 0))],
        out_specs=(pl.BlockSpec((1, cout), lambda r: (0, 0)),
                   pl.BlockSpec((1, cout), lambda r: (0, 0))),
        scratch_shapes=[pltpu.VMEM((1, cout), jnp.float32),
                        pltpu.VMEM((1, cout), jnp.float32)],
        compiler_params=pltpu.CompilerParams(
            dimension_semantics=("arbitrary",),
            vmem_limit_bytes=_VMEM_LIMIT),
    )(x, w, gamma.reshape(1, -1).astype(jnp.float32),
      beta.reshape(1, -1).astype(jnp.float32))


# ----------------------------------------------------------------------------
# EdgeConv: normalized message + ReLU, running max over K, fused residual.
# ----------------------------------------------------------------------------
def _edge_apply_kernel(xcat_ref, w_ref, scale_ref, shift_ref, *rest, has_res):
    if has_res:
        res_ref, out_ref, acc_ref = rest
    else:
        out_ref, acc_ref = rest
    kk = pl.program_id(1)

    h = jnp.dot(xcat_ref[...], w_ref[...], preferred_element_type=jnp.float32)
    y = jnp.maximum(h * scale_ref[...] + shift_ref[...], 0.0)

    @pl.when(kk == 0)
    def _():
        acc_ref[...] = y

    @pl.when(kk > 0)
    def _():
        acc_ref[...] = jnp.maximum(acc_ref[...], y)

    @pl.when(kk == pl.num_programs(1) - 1)
    def _():
        out = acc_ref[...]
        if has_res:
            out = out + res_ref[...].astype(jnp.float32)
        out_ref[...] = out.astype(out_ref.dtype)


def edge_conv(x, nbr_idx, w, gamma, beta, residual=None, *, row_tile=None):
    """GraphConv (static adjacency, EdgeConv): max_k ReLU(BN([x_i, x_j-x_i] @ W))
    (+ optional residual).  Streams the K neighbor axis; never materializes a
    neighbor-major transpose or the per-message activations in HBM."""
    bn, f = x.shape
    k = nbr_idx.shape[1]
    c_out = w.shape[1]
    x = x.astype(jnp.bfloat16)
    w = w.astype(jnp.bfloat16)

    # Neighbor-major message tensor built directly as (K, BN, 2F) -- no transpose.
    xj = x[nbr_idx.T]                                     # (K, BN, F) gather (glue)
    xi = jnp.broadcast_to(x[None], (k, bn, f))
    xcat = jnp.concatenate([xi, xj - xi], axis=-1)        # (K, BN, 2F) bf16

    # Pass 1: exact global BN stats over all K*BN messages (tiled reduction).
    scale, shift = bn_stats(xcat.reshape(k * bn, 2 * f), w, gamma, beta,
                            row_tile=row_tile)

    # Pass 2: normalized message + ReLU, running max over K, fused residual.
    tr = _pick_row_tile(bn, row_tile)
    args = [xcat, w, scale, shift]
    in_specs = [
        pl.BlockSpec((None, tr, 2 * f), lambda r, kk: (kk, r, 0)),
        pl.BlockSpec((2 * f, c_out), lambda r, kk: (0, 0)),
        pl.BlockSpec((1, c_out), lambda r, kk: (0, 0)),
        pl.BlockSpec((1, c_out), lambda r, kk: (0, 0)),
    ]
    if residual is not None:
        args.append(residual.astype(jnp.bfloat16))
        in_specs.append(pl.BlockSpec((tr, c_out), lambda r, kk: (r, 0)))
    kern = functools.partial(_edge_apply_kernel, has_res=residual is not None)
    return pl.pallas_call(
        kern,
        grid=(bn // tr, k),
        out_shape=jax.ShapeDtypeStruct((bn, c_out), jnp.bfloat16),
        in_specs=in_specs,
        out_specs=pl.BlockSpec((tr, c_out), lambda r, kk: (r, 0)),
        scratch_shapes=[pltpu.VMEM((tr, c_out), jnp.float32)],
        compiler_params=pltpu.CompilerParams(
            dimension_semantics=("parallel", "arbitrary"),
            vmem_limit_bytes=_VMEM_LIMIT),
    )(*args)


# ----------------------------------------------------------------------------
# Pool layer: per-point Linear+BN+ReLU with the per-stroke max fused in.
# ----------------------------------------------------------------------------
def _pool_apply_kernel(x_ref, w_ref, scale_ref, shift_ref, out_ref, *, stroke_len):
    h = jnp.dot(x_ref[...], w_ref[...], preferred_element_type=jnp.float32)
    y = jnp.maximum(h * scale_ref[...] + shift_ref[...], 0.0)
    g = y.shape[0] // stroke_len
    out_ref[...] = jnp.max(y.reshape(g, stroke_len, y.shape[1]),
                           axis=1).astype(out_ref.dtype)


def pool_max(x, w, gamma, beta, *, stroke_len, row_tile=None):
    m, cin = x.shape
    cout = w.shape[1]
    w = w.astype(jnp.bfloat16)
    scale, shift = bn_stats(x, w, gamma, beta, row_tile=row_tile)
    tr = _pick_row_tile(m, row_tile, multiple=8 * stroke_len)
    g_block = tr // stroke_len
    kern = functools.partial(_pool_apply_kernel, stroke_len=stroke_len)
    return pl.pallas_call(
        kern,
        grid=(m // tr,),
        out_shape=jax.ShapeDtypeStruct((m // stroke_len, cout), jnp.bfloat16),
        in_specs=[pl.BlockSpec((tr, cin), lambda r: (r, 0)),
                  pl.BlockSpec((cin, cout), lambda r: (0, 0)),
                  pl.BlockSpec((1, cout), lambda r: (0, 0)),
                  pl.BlockSpec((1, cout), lambda r: (0, 0))],
        out_specs=pl.BlockSpec((g_block, cout), lambda r: (r, 0)),
        compiler_params=pltpu.CompilerParams(
            dimension_semantics=("parallel",),
            vmem_limit_bytes=_VMEM_LIMIT),
    )(x, w, scale, shift)


# ----------------------------------------------------------------------------
# fuse_segment: cat([x_l, broadcast(stroke max)]) -> Linear -> BN -> ReLU,
# with the stroke broadcast fused in-kernel (no jnp.repeat through HBM).
# ----------------------------------------------------------------------------
def _fuse_kernel(xl_ref, pmax_ref, wa_ref, wb_ref, g_ref, b_ref, out_ref, *,
                 stroke_len):
    ha = jnp.dot(xl_ref[...], wa_ref[...], preferred_element_type=jnp.float32)
    sp = jnp.dot(pmax_ref[...], wb_ref[...], preferred_element_type=jnp.float32)
    s, c = sp.shape
    h = (ha.reshape(s, stroke_len, c) + sp[:, None, :]).reshape(s * stroke_len, c)
    h = jnp.maximum(_bn_train(h, g_ref[...], b_ref[...]), 0.0)
    out_ref[...] = h.astype(out_ref.dtype)


def fuse_segment(x_l, p_max, p, *, stroke_len):
    cin_l = x_l.shape[1]
    wa = p["w"][:cin_l].astype(jnp.bfloat16)
    wb = p["w"][cin_l:].astype(jnp.bfloat16)
    kern = functools.partial(_fuse_kernel, stroke_len=stroke_len)
    return pl.pallas_call(
        kern,
        out_shape=jax.ShapeDtypeStruct((x_l.shape[0], p["w"].shape[1]),
                                       jnp.bfloat16),
        in_specs=[_WHOLE] * 6,
        out_specs=_WHOLE,
        compiler_params=pltpu.CompilerParams(vmem_limit_bytes=_VMEM_LIMIT),
    )(x_l, p_max, wa, wb,
      p["gamma"].reshape(1, -1), p["beta"].reshape(1, -1))


# ----------------------------------------------------------------------------
# Batch pooling: Feat = cat(global_max, global_mean) per sketch.
# ----------------------------------------------------------------------------
def _batch_pool_kernel(x_ref, out_ref):
    x = x_ref[...].astype(jnp.float32)
    mx = jnp.max(x, axis=1)
    mn = jnp.mean(x, axis=1)
    out_ref[...] = jnp.concatenate([mx, mn], axis=1).astype(out_ref.dtype)


def batch_pool(x_grouped):
    b, _, c = x_grouped.shape
    return pl.pallas_call(
        _batch_pool_kernel,
        out_shape=jax.ShapeDtypeStruct((b, 2 * c), jnp.bfloat16),
        in_specs=[_WHOLE],
        out_specs=_WHOLE,
    )(x_grouped)


# ----------------------------------------------------------------------------
# Fused tails: segmentation classifier and creativity head.
# ----------------------------------------------------------------------------
def _segment_kernel(x_ref, w1_ref, g1_ref, b1_ref, w2_ref, g2_ref, b2_ref,
                    out_ref):
    h = jnp.dot(x_ref[...], w1_ref[...], preferred_element_type=jnp.float32)
    h = jnp.maximum(_bn_train(h, g1_ref[...], b1_ref[...]), 0.0)
    h = jnp.dot(h.astype(jnp.bfloat16), w2_ref[...],
                preferred_element_type=jnp.float32)
    h = _bn_train(h, g2_ref[...], b2_ref[...])
    m = jnp.max(h, axis=1, keepdims=True)
    h = h - m
    out_ref[...] = h - jnp.log(jnp.sum(jnp.exp(h), axis=1, keepdims=True))


def segment_head(xf, p1, p2):
    bn = xf.shape[0]
    out = p2["w"].shape[1]
    return pl.pallas_call(
        _segment_kernel,
        out_shape=jax.ShapeDtypeStruct((bn, out), jnp.float32),
        in_specs=[_WHOLE] * 7,
        out_specs=_WHOLE,
        compiler_params=pltpu.CompilerParams(vmem_limit_bytes=_VMEM_LIMIT),
    )(xf,
      p1["w"].astype(jnp.bfloat16), p1["gamma"].reshape(1, -1),
      p1["beta"].reshape(1, -1),
      p2["w"].astype(jnp.bfloat16), p2["gamma"].reshape(1, -1),
      p2["beta"].reshape(1, -1))


def _creativity_kernel(feat_ref, w1_ref, g1_ref, b1_ref, w2row_ref, bias2_ref,
                       out_ref):
    h = jnp.dot(feat_ref[...], w1_ref[...], preferred_element_type=jnp.float32)
    h = jnp.maximum(_bn_train(h, g1_ref[...], b1_ref[...]), 0.0)
    # final Conv1d(.., 1, kernel_size=1) == per-row dot with a single weight row.
    out_ref[...] = jnp.sum(h * w2row_ref[...], axis=1, keepdims=True) + bias2_ref[...]


def creativity_head(feat, p1, p2):
    b = feat.shape[0]
    return pl.pallas_call(
        _creativity_kernel,
        out_shape=jax.ShapeDtypeStruct((b, 1), jnp.float32),
        in_specs=[_WHOLE] * 6,
        out_specs=_WHOLE,
    )(feat,
      p1["w"].astype(jnp.bfloat16), p1["gamma"].reshape(1, -1),
      p1["beta"].reshape(1, -1),
      p2["w"].reshape(1, -1), p2["b"].reshape(1, 1))


# ----------------------------------------------------------------------------
# Model (training-mode forward of SketchGNN_CreativitySeg, is_Creativity=True)
# ----------------------------------------------------------------------------
def sketchgnn_forward(params, x, nbr_idx, *, points_num, stroke_len):
    bn = x.shape[0]
    b = bn // points_num
    c = params["local_head"]["w"].shape[1]

    x_bf = x.astype(jnp.bfloat16)

    # Fused local+global heads: identical message tensor, hstacked weights.
    w_head = jnp.concatenate([params["local_head"]["w"],
                              params["global_head"]["w"]], axis=1)
    g_head = jnp.concatenate([params["local_head"]["gamma"],
                              params["global_head"]["gamma"]])
    b_head = jnp.concatenate([params["local_head"]["beta"],
                              params["global_head"]["beta"]])
    h_head = edge_conv(x_bf, nbr_idx, w_head, g_head, b_head)        # (BN, 2C)
    h_l0, h_g0 = h_head[:, :c], h_head[:, c:]

    def run_branch(h0, block_ps):
        # torch: slices = cat((h, h), 2); blocks apply to last slice + residual;
        # kept slices are [:, :, 1:] == [h, block1, ..., blockN].
        slices = [h0]
        cur = h0
        for blk in block_ps:
            cur = edge_conv(cur, nbr_idx, blk["w"], blk["gamma"], blk["beta"],
                            residual=cur)
            slices.append(cur)
        return jnp.stack(slices, axis=2).reshape(bn, -1)             # (BN, C*(nb+1))

    x_l = run_branch(h_l0, params["local_blocks"])
    x_g = run_branch(h_g0, params["global_blocks"])

    # MaxPool: per-point Linear+BN+ReLU with the per-stroke max fused in.
    # TODO(synk): strokes assumed contiguous equal-length blocks (no scatter).
    p_max = pool_max(x_g, params["pool"]["w"], params["pool"]["gamma"],
                     params["pool"]["beta"], stroke_len=stroke_len)  # (S, Cpool)

    # fuse_segment: cat([x_l, broadcast(p_max)]) -> Linear+BN+ReLU (broadcast fused).
    xf = fuse_segment(x_l, p_max, params["fuse"], stroke_len=stroke_len)  # (BN, 64)

    # Feat = cat(global_max_pool, global_mean_pool) over data['batch'].
    feat = batch_pool(xf.reshape(b, points_num, -1))                 # (B, 2*mlp0)

    # classifier: MLPLinear(bn,relu) -> MLPLinear(bn) -> LogSoftmax (fused).
    logits = segment_head(xf, params["seg1"], params["seg2"])        # (BN, out) f32

    # creativity: Conv1d+BN+ReLU -> Conv1d applied to Feat (length-1 conv, fused).
    c_score = creativity_head(feat, params["cr1"], params["cr2"]).reshape(-1)

    return logits, c_score


# ----------------------------------------------------------------------------
# Deterministic parameter init (synthetic weights)
# ----------------------------------------------------------------------------
def init_params(key, *, in_feature, channels, n_blocks, pool_channels,
                mlp_segment, out_segment):
    keys = iter(jax.random.split(key, 64))

    def lin(cin, cout):
        return {
            "w": 0.1 * jax.random.normal(next(keys), (cin, cout), jnp.float32),
            "b": jnp.zeros((cout,), jnp.float32),   # unused where BN follows
            "gamma": jnp.ones((cout,), jnp.float32),
            "beta": jnp.zeros((cout,), jnp.float32),
        }

    c = channels
    return {
        "local_head": lin(2 * in_feature, c),
        "local_blocks": [lin(2 * c, c) for _ in range(n_blocks)],
        "global_head": lin(2 * in_feature, c),
        "global_blocks": [lin(2 * c, c) for _ in range(n_blocks)],
        "pool": lin(c * (n_blocks + 1), pool_channels),
        "fuse": lin(c * (n_blocks + 1) + pool_channels, mlp_segment[0]),
        "seg1": lin(mlp_segment[0], mlp_segment[1]),
        "seg2": lin(mlp_segment[-1], out_segment),
        "cr1": lin(mlp_segment[0] * 2, mlp_segment[0] * 2 // 4),
        "cr2": lin(mlp_segment[0] * 2 // 4, 1),
    }


# ----------------------------------------------------------------------------
if __name__ == "__main__":
    # Small synthetic config (opt)
    B, POINTS_NUM, IN_FEATURE = 2, 16, 4
    CHANNELS, N_BLOCKS, POOL_CHANNELS = 32, 2, 32
    MLP_SEGMENT, OUT_SEGMENT = [64, 64], 8
    K, STROKE_LEN = 4, 8
    BN = B * POINTS_NUM

    key = jax.random.PRNGKey(0)
    kx, kp = jax.random.split(key)

    # x: (BxN) x F
    x = jax.random.normal(kx, (BN, IN_FEATURE), jnp.float32)

    # Static ring adjacency within each sketch: K neighbors per node.
    offsets = jnp.array([1, 2, POINTS_NUM - 1, POINTS_NUM - 2], dtype=jnp.int32)
    local = (jnp.arange(POINTS_NUM, dtype=jnp.int32)[:, None]
             + offsets[None, :]) % POINTS_NUM
    nbr_idx = jnp.concatenate([local + s * POINTS_NUM for s in range(B)], axis=0)

    params = init_params(
        kp, in_feature=IN_FEATURE, channels=CHANNELS, n_blocks=N_BLOCKS,
        pool_channels=POOL_CHANNELS, mlp_segment=MLP_SEGMENT,
        out_segment=OUT_SEGMENT)

    fwd = jax.jit(functools.partial(
        sketchgnn_forward, points_num=POINTS_NUM, stroke_len=STROKE_LEN))

    logits, c_score = fwd(params, x, nbr_idx)
    jax.block_until_ready((logits, c_score))

    assert logits.shape == (BN, OUT_SEGMENT)
    assert c_score.shape == (B,)
    # log-softmax rows should sum to ~1 in prob space
    assert jnp.allclose(jnp.sum(jnp.exp(logits), axis=1), 1.0, atol=1e-3)

    print("KERNEL_OK")
</pallas_src>

<mosaic_0001>
module attributes {stable_mosaic.version = 11 : i64} {
  func.func @_bn_stats_kernel(%arg0: i32, %arg1: memref<128x8xbf16, #tpu.memory_space<vmem>>, %arg2: memref<8x64xbf16, #tpu.memory_space<vmem>>, %arg3: memref<1x64xf32, #tpu.memory_space<vmem>>, %arg4: memref<1x64xf32, #tpu.memory_space<vmem>>, %arg5: memref<1x64xf32, #tpu.memory_space<vmem>>, %arg6: memref<1x64xf32, #tpu.memory_space<vmem>>, %arg7: memref<1x64xf32, #tpu.memory_space<vmem>>, %arg8: memref<1x64xf32, #tpu.memory_space<vmem>>) attributes {dimension_semantics = [#tpu.dimension_semantics<arbitrary>], iteration_bounds = array<i64: 1>, scalar_prefetch = 0 : i64, scratch_operands = 2 : i64, tpu.core_type = #tpu.core_type<tc>, window_params = [{transform_indices = @transform_0, window_bounds = array<i64: 128, 8>}, {pipeline_mode = #tpu.pipeline_mode<synchronous>, transform_indices = @transform_1, window_bounds = array<i64: 8, 64>}, {pipeline_mode = #tpu.pipeline_mode<synchronous>, transform_indices = @transform_2, window_bounds = array<i64: 1, 64>}, {pipeline_mode = #tpu.pipeline_mode<synchronous>, transform_indices = @transform_3, window_bounds = array<i64: 1, 64>}, {pipeline_mode = #tpu.pipeline_mode<synchronous>, transform_indices = @transform_4, window_bounds = array<i64: 1, 64>}, {pipeline_mode = #tpu.pipeline_mode<synchronous>, transform_indices = @transform_5, window_bounds = array<i64: 1, 64>}]} {
    %c0_i32 = arith.constant 0 : i32
    %0 = arith.cmpi eq, %arg0, %c0_i32 : i32
    %1 = arith.extui %0 : i1 to i32
    %c0_i32_0 = arith.constant 0 : i32
    %2 = arith.cmpi ne, %1, %c0_i32_0 : i32
    scf.if %2 {
      %cst_16 = arith.constant 0.000000e+00 : f32
      %20 = vector.broadcast %cst_16 : f32 to vector<1x64xf32>
      %c0_17 = arith.constant 0 : index
      %c0_18 = arith.constant 0 : index
      %21 = vector.load %arg7[%c0_17, %c0_18] : memref<1x64xf32, #tpu.memory_space<vmem>>, vector<1x64xf32>
      tpu.vector_store %arg7[%c0_17, %c0_18], %20 {strides = array<i32>} : memref<1x64xf32, #tpu.memory_space<vmem>>, vector<1x64xf32>,
      %cst_19 = arith.constant 0.000000e+00 : f32
      %22 = vector.broadcast %cst_19 : f32 to vector<1x64xf32>
      %c0_20 = arith.constant 0 : index
      %c0_21 = arith.constant 0 : index
      %23 = vector.load %arg8[%c0_20, %c0_21] : memref<1x64xf32, #tpu.memory_space<vmem>>, vector<1x64xf32>
      tpu.vector_store %arg8[%c0_20, %c0_21], %22 {strides = array<i32>} : memref<1x64xf32, #tpu.memory_space<vmem>>, vector<1x64xf32>,
    } else {
    }
    %c0 = arith.constant 0 : index
    %c0_1 = arith.constant 0 : index
    %3 = vector.load %arg1[%c0, %c0_1] : memref<128x8xbf16, #tpu.memory_space<vmem>>, vector<128x8xbf16>
    %c0_2 = arith.constant 0 : index
    %c0_3 = arith.constant 0 : index
    %4 = vector.load %arg2[%c0_2, %c0_3] : memref<8x64xbf16, #tpu.memory_space<vmem>>, vector<8x64xbf16>
    %cst = arith.constant dense<0.000000e+00> : vector<128x64xf32>
    %5 = tpu.matmul %3, %4, %cst {dimension_numbers = #tpu.dot_dimension_numbers<[1], [0], [0], [1], [0, 0, 1, 1], [], []>} : vector<128x8xbf16>, vector<8x64xbf16>, vector<128x64xf32> -> vector<128x64xf32>
    %c0_4 = arith.constant 0 : index
    %c0_5 = arith.constant 0 : index
    %6 = vector.load %arg7[%c0_4, %c0_5] : memref<1x64xf32, #tpu.memory_space<vmem>>, vector<1x64xf32>
    %cst_6 = arith.constant dense<0.000000e+00> : vector<64xf32>
    %7 = vector.multi_reduction <add>, %5, %cst_6 [0] : vector<128x64xf32> to vector<64xf32>
    %8 = vector.shape_cast %7 : vector<64xf32> to vector<1x64xf32>
    %9 = arith.addf %6, %8 : vector<1x64xf32>
    %c0_7 = arith.constant 0 : index
    %c0_8 = arith.constant 0 : index
    %10 = vector.load %arg7[%c0_7, %c0_8] : memref<1x64xf32, #tpu.memory_space<vmem>>, vector<1x64xf32>
    tpu.vector_store %arg7[%c0_7, %c0_8], %9 {strides = array<i32>} : memref<1x64xf32, #tpu.memory_space<vmem>>, vector<1x64xf32>,
    %c0_9 = arith.constant 0 : index
    %c0_10 = arith.constant 0 : index
    %11 = vector.load %arg8[%c0_9, %c0_10] : memref<1x64xf32, #tpu.memory_space<vmem>>, vector<1x64xf32>
    %12 = arith.mulf %5, %5 : vector<128x64xf32>
    %cst_11 = arith.constant dense<0.000000e+00> : vector<64xf32>
    %13 = vector.multi_reduction <add>, %12, %cst_11 [0] : vector<128x64xf32> to vector<64xf32>
    %14 = vector.shape_cast %13 : vector<64xf32> to vector<1x64xf32>
    %15 = arith.addf %11, %14 : vector<1x64xf32>
    %c0_12 = arith.constant 0 : index
    %c0_13 = arith.constant 0 : index
    %16 = vector.load %arg8[%c0_12, %c0_13] : memref<1x64xf32, #tpu.memory_space<vmem>>, vector<1x64xf32>
    tpu.vector_store %arg8[%c0_12, %c0_13], %15 {strides = array<i32>} : memref<1x64xf32, #tpu.memory_space<vmem>>, vector<1x64xf32>,
    %c0_i32_14 = arith.constant 0 : i32
    %17 = arith.cmpi eq, %arg0, %c0_i32_14 : i32
    %18 = arith.extui %17 : i1 to i32
    %c0_i32_15 = arith.constant 0 : i32
    %19 = arith.cmpi ne, %18, %c0_i32_15 : i32
    scf.if %19 {
      %c0_16 = arith.constant 0 : index
      %c0_17 = arith.constant 0 : index
      %20 = vector.load %arg7[%c0_16, %c0_17] : memref<1x64xf32, #tpu.memory_space<vmem>>, vector<1x64xf32>
      %cst_18 = arith.constant 7.812500e-03 : f32
      %21 = vector.broadcast %cst_18 : f32 to vector<1x64xf32>
      %22 = arith.mulf %20, %21 : vector<1x64xf32>
      %c0_19 = arith.constant 0 : index
      %c0_20 = arith.constant 0 : index
      %23 = vector.load %arg8[%c0_19, %c0_20] : memref<1x64xf32, #tpu.memory_space<vmem>>, vector<1x64xf32>
      %cst_21 = arith.constant 7.812500e-03 : f32
      %24 = vector.broadcast %cst_21 : f32 to vector<1x64xf32>
      %25 = arith.mulf %23, %24 : vector<1x64xf32>
      %26 = arith.mulf %22, %22 : vector<1x64xf32>
      %27 = arith.subf %25, %26 : vector<1x64xf32>
      %c0_22 = arith.constant 0 : index
      %c0_23 = arith.constant 0 : index
      %28 = vector.load %arg3[%c0_22, %c0_23] : memref<1x64xf32, #tpu.memory_space<vmem>>, vector<1x64xf32>
      %cst_24 = arith.constant 9.99999974E-6 : f32
      %29 = vector.broadcast %cst_24 : f32 to vector<1x64xf32>
      %30 = arith.addf %27, %29 : vector<1x64xf32>
      %31 = math.rsqrt %30 : vector<1x64xf32>
      %32 = arith.mulf %28, %31 : vector<1x64xf32>
      %c0_25 = arith.constant 0 : index
      %c0_26 = arith.constant 0 : index
      %33 = vector.load %arg5[%c0_25, %c0_26] : memref<1x64xf32, #tpu.memory_space<vmem>>, vector<1x64xf32>
      tpu.vector_store %arg5[%c0_25, %c0_26], %32 {strides = array<i32>} : memref<1x64xf32, #tpu.memory_space<vmem>>, vector<1x64xf32>,
      %c0_27 = arith.constant 0 : index
      %c0_28 = arith.constant 0 : index
      %34 = vector.load %arg4[%c0_27, %c0_28] : memref<1x64xf32, #tpu.memory_space<vmem>>, vector<1x64xf32>
      %35 = arith.mulf %22, %32 : vector<1x64xf32>
      %36 = arith.subf %34, %35 : vector<1x64xf32>
      %c0_29 = arith.constant 0 : index
      %c0_30 = arith.constant 0 : index
      %37 = vector.load %arg6[%c0_29, %c0_30] : memref<1x64xf32, #tpu.memory_space<vmem>>, vector<1x64xf32>
      tpu.vector_store %arg6[%c0_29, %c0_30], %36 {strides = array<i32>} : memref<1x64xf32, #tpu.memory_space<vmem>>, vector<1x64xf32>,
    } else {
    }
    return
  }
  func.func @transform_0(%arg0: i32) -> (i32, i32) {
    %c0_i32 = arith.constant 0 : i32
    %c0_i32_0 = arith.constant 0 : i32
    return %arg0, %c0_i32 : i32, i32
  }
  func.func @transform_1(%arg0: i32) -> (i32, i32) {
    %c0_i32 = arith.constant 0 : i32
    %c0_i32_0 = arith.constant 0 : i32
    %c0_i32_1 = arith.constant 0 : i32
    return %c0_i32, %c0_i32_0 : i32, i32
  }
  func.func @transform_2(%arg0: i32) -> (i32, i32) {
    %c0_i32 = arith.constant 0 : i32
    %c0_i32_0 = arith.constant 0 : i32
    %c0_i32_1 = arith.constant 0 : i32
    return %c0_i32, %c0_i32_0 : i32, i32
  }
  func.func @transform_3(%arg0: i32) -> (i32, i32) {
    %c0_i32 = arith.constant 0 : i32
    %c0_i32_0 = arith.constant 0 : i32
    %c0_i32_1 = arith.constant 0 : i32
    return %c0_i32, %c0_i32_0 : i32, i32
  }
  func.func @transform_4(%arg0: i32) -> (i32, i32) {
    %c0_i32 = arith.constant 0 : i32
    %c0_i32_0 = arith.constant 0 : i32
    %c0_i32_1 = arith.constant 0 : i32
    return %c0_i32, %c0_i32_0 : i32, i32
  }
  func.func @transform_5(%arg0: i32) -> (i32, i32) {
    %c0_i32 = arith.constant 0 : i32
    %c0_i32_0 = arith.constant 0 : i32
    %c0_i32_1 = arith.constant 0 : i32
    return %c0_i32, %c0_i32_0 : i32, i32
  }
}

module attributes {stable_mosaic.version = 11 : i64} {
  func.func @_edge_apply_kernel(%arg0: i32, %arg1: i32, %arg2: memref<1x32x8xbf16, #tpu.memory_space<vmem>>, %arg3: memref<8x64xbf16, #tpu.memory_space<vmem>>, %arg4: memref<1x64xf32, #tpu.memory_space<vmem>>, %arg5: memref<1x64xf32, #tpu.memory_space<vmem>>, %arg6: memref<32x64xbf16, #tpu.memory_space<vmem>>, %arg7: memref<32x64xf32, #tpu.memory_space<vmem>>) attributes {dimension_semantics = [#tpu.dimension_semantics<parallel>, #tpu.dimension_semantics<arbitrary>], iteration_bounds = array<i64: 1, 4>, scalar_prefetch = 0 : i64, scratch_operands = 1 : i64, tpu.core_type = #tpu.core_type<tc>, window_params = [{transform_indices = @transform_0, window_bounds = array<i64: 1, 32, 8>}, {pipeline_mode = #tpu.pipeline_mode<synchronous>, transform_indices = @transform_1, window_bounds = array<i64: 8, 64>}, {pipeline_mode = #tpu.pipeline_mode<synchronous>, transform_indices = @transform_2, window_bounds = array<i64: 1, 64>}, {pipeline_mode = #tpu.pipeline_mode<synchronous>, transform_indices = @transform_3, window_bounds = array<i64: 1, 64>}, {transform_indices = @transform_4, window_bounds = array<i64: 32, 64>}]} {
    %c0 = arith.constant 0 : index
    %c0_0 = arith.constant 0 : index
    %c0_1 = arith.constant 0 : index
    %0 = vector.load %arg2[%c0, %c0_0, %c0_1] : memref<1x32x8xbf16, #tpu.memory_space<vmem>>, vector<1x32x8xbf16>
    %1 = vector.shape_cast %0 : vector<1x32x8xbf16> to vector<32x8xbf16>
    %c0_2 = arith.constant 0 : index
    %c0_3 = arith.constant 0 : index
    %2 = vector.load %arg3[%c0_2, %c0_3] : memref<8x64xbf16, #tpu.memory_space<vmem>>, vector<8x64xbf16>
    %cst = arith.constant dense<0.000000e+00> : vector<32x64xf32>
    %3 = tpu.matmul %1, %2, %cst {dimension_numbers = #tpu.dot_dimension_numbers<[1], [0], [0], [1], [0, 0, 1, 1], [], []>} : vector<32x8xbf16>, vector<8x64xbf16>, vector<32x64xf32> -> vector<32x64xf32>
    %c0_4 = arith.constant 0 : index
    %c0_5 = arith.constant 0 : index
    %4 = vector.load %arg4[%c0_4, %c0_5] : memref<1x64xf32, #tpu.memory_space<vmem>>, vector<1x64xf32>
    %5 = vector.broadcast %4 : vector<1x64xf32> to vector<32x64xf32>
    %6 = arith.mulf %3, %5 : vector<32x64xf32>
    %c0_6 = arith.constant 0 : index
    %c0_7 = arith.constant 0 : index
    %7 = vector.load %arg5[%c0_6, %c0_7] : memref<1x64xf32, #tpu.memory_space<vmem>>, vector<1x64xf32>
    %8 = vector.broadcast %7 : vector<1x64xf32> to vector<32x64xf32>
    %9 = arith.addf %6, %8 : vector<32x64xf32>
    %cst_8 = arith.constant 0.000000e+00 : f32
    %10 = vector.broadcast %cst_8 : f32 to vector<32x64xf32>
    %11 = arith.maximumf %9, %10 : vector<32x64xf32>
    %c0_i32 = arith.constant 0 : i32
    %12 = arith.cmpi eq, %arg1, %c0_i32 : i32
    %13 = arith.extui %12 : i1 to i32
    %c0_i32_9 = arith.constant 0 : i32
    %14 = arith.cmpi ne, %13, %c0_i32_9 : i32
    scf.if %14 {
      %c0_13 = arith.constant 0 : index
      %c0_14 = arith.constant 0 : index
      %21 = vector.load %arg7[%c0_13, %c0_14] : memref<32x64xf32, #tpu.memory_space<vmem>>, vector<32x64xf32>
      tpu.vector_store %arg7[%c0_13, %c0_14], %11 {strides = array<i32>} : memref<32x64xf32, #tpu.memory_space<vmem>>, vector<32x64xf32>,
    } else {
    }
    %c0_i32_10 = arith.constant 0 : i32
    %15 = arith.cmpi sgt, %arg1, %c0_i32_10 : i32
    %16 = arith.extui %15 : i1 to i32
    %c0_i32_11 = arith.constant 0 : i32
    %17 = arith.cmpi ne, %16, %c0_i32_11 : i32
    scf.if %17 {
      %c0_13 = arith.constant 0 : index
      %c0_14 = arith.constant 0 : index
      %21 = vector.load %arg7[%c0_13, %c0_14] : memref<32x64xf32, #tpu.memory_space<vmem>>, vector<32x64xf32>
      %22 = arith.maximumf %21, %11 : vector<32x64xf32>
      %c0_15 = arith.constant 0 : index
      %c0_16 = arith.constant 0 : index
      %23 = vector.load %arg7[%c0_15, %c0_16] : memref<32x64xf32, #tpu.memory_space<vmem>>, vector<32x64xf32>
      tpu.vector_store %arg7[%c0_15, %c0_16], %22 {strides = array<i32>} : memref<32x64xf32, #tpu.memory_space<vmem>>, vector<32x64xf32>,
    } else {
    }
    %c3_i32 = arith.constant 3 : i32
    %18 = arith.cmpi eq, %arg1, %c3_i32 : i32
    %19 = arith.extui %18 : i1 to i32
    %c0_i32_12 = arith.constant 0 : i32
    %20 = arith.cmpi ne, %19, %c0_i32_12 : i32
    scf.if %20 {
      %c0_13 = arith.constant 0 : index
      %c0_14 = arith.constant 0 : index
      %21 = vector.load %arg7[%c0_13, %c0_14] : memref<32x64xf32, #tpu.memory_space<vmem>>, vector<32x64xf32>
      %22 = arith.truncf %21 : vector<32x64xf32> to vector<32x64xbf16>
      %c0_15 = arith.constant 0 : index
      %c0_16 = arith.constant 0 : index
      %23 = vector.load %arg6[%c0_15, %c0_16] : memref<32x64xbf16, #tpu.memory_space<vmem>>, vector<32x64xbf16>
      tpu.vector_store %arg6[%c0_15, %c0_16], %22 {strides = array<i32>} : memref<32x64xbf16, #tpu.memory_space<vmem>>, vector<32x64xbf16>,
    } else {
    }
    return
  }
  func.func @transform_0(%arg0: i32, %arg1: i32) -> (i32, i32, i32) {
    %c0_i32 = arith.constant 0 : i32
    %c0_i32_0 = arith.constant 0 : i32
    return %arg1, %arg0, %c0_i32 : i32, i32, i32
  }
  func.func @transform_1(%arg0: i32, %arg1: i32) -> (i32, i32) {
    %c0_i32 = arith.constant 0 : i32
    %c0_i32_0 = arith.constant 0 : i32
    %c0_i32_1 = arith.constant 0 : i32
    return %c0_i32, %c0_i32_0 : i32, i32
  }
  func.func @transform_2(%arg0: i32, %arg1: i32) -> (i32, i32) {
    %c0_i32 = arith.constant 0 : i32
    %c0_i32_0 = arith.constant 0 : i32
    %c0_i32_1 = arith.constant 0 : i32
    return %c0_i32, %c0_i32_0 : i32, i32
  }
  func.func @transform_3(%arg0: i32, %arg1: i32) -> (i32, i32) {
    %c0_i32 = arith.constant 0 : i32
    %c0_i32_0 = arith.constant 0 : i32
    %c0_i32_1 = arith.constant 0 : i32
    return %c0_i32, %c0_i32_0 : i32, i32
  }
  func.func @transform_4(%arg0: i32, %arg1: i32) -> (i32, i32) {
    %c0_i32 = arith.constant 0 : i32
    %c0_i32_0 = arith.constant 0 : i32
    return %arg0, %c0_i32 : i32, i32
  }
}

module attributes {stable_mosaic.version = 11 : i64} {
  func.func @_bn_stats_kernel(%arg0: i32, %arg1: memref<128x64xbf16, #tpu.memory_space<vmem>>, %arg2: memref<64x32xbf16, #tpu.memory_space<vmem>>, %arg3: memref<1x32xf32, #tpu.memory_space<vmem>>, %arg4: memref<1x32xf32, #tpu.memory_space<vmem>>, %arg5: memref<1x32xf32, #tpu.memory_space<vmem>>, %arg6: memref<1x32xf32, #tpu.memory_space<vmem>>, %arg7: memref<1x32xf32, #tpu.memory_space<vmem>>, %arg8: memref<1x32xf32, #tpu.memory_space<vmem>>) attributes {dimension_semantics = [#tpu.dimension_semantics<arbitrary>], iteration_bounds = array<i64: 1>, scalar_prefetch = 0 : i64, scratch_operands = 2 : i64, tpu.core_type = #tpu.core_type<tc>, window_params = [{transform_indices = @transform_0, window_bounds = array<i64: 128, 64>}, {pipeline_mode = #tpu.pipeline_mode<synchronous>, transform_indices = @transform_1, window_bounds = array<i64: 64, 32>}, {pipeline_mode = #tpu.pipeline_mode<synchronous>, transform_indices = @transform_2, window_bounds = array<i64: 1, 32>}, {pipeline_mode = #tpu.pipeline_mode<synchronous>, transform_indices = @transform_3, window_bounds = array<i64: 1, 32>}, {pipeline_mode = #tpu.pipeline_mode<synchronous>, transform_indices = @transform_4, window_bounds = array<i64: 1, 32>}, {pipeline_mode = #tpu.pipeline_mode<synchronous>, transform_indices = @transform_5, window_bounds = array<i64: 1, 32>}]} {
    %c0_i32 = arith.constant 0 : i32
    %0 = arith.cmpi eq, %arg0, %c0_i32 : i32
    %1 = arith.extui %0 : i1 to i32
    %c0_i32_0 = arith.constant 0 : i32
    %2 = arith.cmpi ne, %1, %c0_i32_0 : i32
    scf.if %2 {
      %cst_16 = arith.constant 0.000000e+00 : f32
      %20 = vector.broadcast %cst_16 : f32 to vector<1x32xf32>
      %c0_17 = arith.constant 0 : index
      %c0_18 = arith.constant 0 : index
      %21 = vector.load %arg7[%c0_17, %c0_18] : memref<1x32xf32, #tpu.memory_space<vmem>>, vector<1x32xf32>
      tpu.vector_store %arg7[%c0_17, %c0_18], %20 {strides = array<i32>} : memref<1x32xf32, #tpu.memory_space<vmem>>, vector<1x32xf32>,
      %cst_19 = arith.constant 0.000000e+00 : f32
      %22 = vector.broadcast %cst_19 : f32 to vector<1x32xf32>
      %c0_20 = arith.constant 0 : index
      %c0_21 = arith.constant 0 : index
      %23 = vector.load %arg8[%c0_20, %c0_21] : memref<1x32xf32, #tpu.memory_space<vmem>>, vector<1x32xf32>
      tpu.vector_store %arg8[%c0_20, %c0_21], %22 {strides = array<i32>} : memref<1x32xf32, #tpu.memory_space<vmem>>, vector<1x32xf32>,
    } else {
    }
    %c0 = arith.constant 0 : index
    %c0_1 = arith.constant 0 : index
    %3 = vector.load %arg1[%c0, %c0_1] : memref<128x64xbf16, #tpu.memory_space<vmem>>, vector<128x64xbf16>
    %c0_2 = arith.constant 0 : index
    %c0_3 = arith.constant 0 : index
    %4 = vector.load %arg2[%c0_2, %c0_3] : memref<64x32xbf16, #tpu.memory_space<vmem>>, vector<64x32xbf16>
    %cst = arith.constant dense<0.000000e+00> : vector<128x32xf32>
    %5 = tpu.matmul %3, %4, %cst {dimension_numbers = #tpu.dot_dimension_numbers<[1], [0], [0], [1], [0, 0, 1, 1], [], []>} : vector<128x64xbf16>, vector<64x32xbf16>, vector<128x32xf32> -> vector<128x32xf32>
    %c0_4 = arith.constant 0 : index
    %c0_5 = arith.constant 0 : index
    %6 = vector.load %arg7[%c0_4, %c0_5] : memref<1x32xf32, #tpu.memory_space<vmem>>, vector<1x32xf32>
    %cst_6 = arith.constant dense<0.000000e+00> : vector<32xf32>
    %7 = vector.multi_reduction <add>, %5, %cst_6 [0] : vector<128x32xf32> to vector<32xf32>
    %8 = vector.shape_cast %7 : vector<32xf32> to vector<1x32xf32>
    %9 = arith.addf %6, %8 : vector<1x32xf32>
    %c0_7 = arith.constant 0 : index
    %c0_8 = arith.constant 0 : index
    %10 = vector.load %arg7[%c0_7, %c0_8] : memref<1x32xf32, #tpu.memory_space<vmem>>, vector<1x32xf32>
    tpu.vector_store %arg7[%c0_7, %c0_8], %9 {strides = array<i32>} : memref<1x32xf32, #tpu.memory_space<vmem>>, vector<1x32xf32>,
    %c0_9 = arith.constant 0 : index
    %c0_10 = arith.constant 0 : index
    %11 = vector.load %arg8[%c0_9, %c0_10] : memref<1x32xf32, #tpu.memory_space<vmem>>, vector<1x32xf32>
    %12 = arith.mulf %5, %5 : vector<128x32xf32>
    %cst_11 = arith.constant dense<0.000000e+00> : vector<32xf32>
    %13 = vector.multi_reduction <add>, %12, %cst_11 [0] : vector<128x32xf32> to vector<32xf32>
    %14 = vector.shape_cast %13 : vector<32xf32> to vector<1x32xf32>
    %15 = arith.addf %11, %14 : vector<1x32xf32>
    %c0_12 = arith.constant 0 : index
    %c0_13 = arith.constant 0 : index
    %16 = vector.load %arg8[%c0_12, %c0_13] : memref<1x32xf32, #tpu.memory_space<vmem>>, vector<1x32xf32>
    tpu.vector_store %arg8[%c0_12, %c0_13], %15 {strides = array<i32>} : memref<1x32xf32, #tpu.memory_space<vmem>>, vector<1x32xf32>,
    %c0_i32_14 = arith.constant 0 : i32
    %17 = arith.cmpi eq, %arg0, %c0_i32_14 : i32
    %18 = arith.extui %17 : i1 to i32
    %c0_i32_15 = arith.constant 0 : i32
    %19 = arith.cmpi ne, %18, %c0_i32_15 : i32
    scf.if %19 {
      %c0_16 = arith.constant 0 : index
      %c0_17 = arith.constant 0 : index
      %20 = vector.load %arg7[%c0_16, %c0_17] : memref<1x32xf32, #tpu.memory_space<vmem>>, vector<1x32xf32>
      %cst_18 = arith.constant 7.812500e-03 : f32
      %21 = vector.broadcast %cst_18 : f32 to vector<1x32xf32>
      %22 = arith.mulf %20, %21 : vector<1x32xf32>
      %c0_19 = arith.constant 0 : index
      %c0_20 = arith.constant 0 : index
      %23 = vector.load %arg8[%c0_19, %c0_20] : memref<1x32xf32, #tpu.memory_space<vmem>>, vector<1x32xf32>
      %cst_21 = arith.constant 7.812500e-03 : f32
      %24 = vector.broadcast %cst_21 : f32 to vector<1x32xf32>
      %25 = arith.mulf %23, %24 : vector<1x32xf32>
      %26 = arith.mulf %22, %22 : vector<1x32xf32>
      %27 = arith.subf %25, %26 : vector<1x32xf32>
      %c0_22 = arith.constant 0 : index
      %c0_23 = arith.constant 0 : index
      %28 = vector.load %arg3[%c0_22, %c0_23] : memref<1x32xf32, #tpu.memory_space<vmem>>, vector<1x32xf32>
      %cst_24 = arith.constant 9.99999974E-6 : f32
      %29 = vector.broadcast %cst_24 : f32 to vector<1x32xf32>
      %30 = arith.addf %27, %29 : vector<1x32xf32>
      %31 = math.rsqrt %30 : vector<1x32xf32>
      %32 = arith.mulf %28, %31 : vector<1x32xf32>
      %c0_25 = arith.constant 0 : index
      %c0_26 = arith.constant 0 : index
      %33 = vector.load %arg5[%c0_25, %c0_26] : memref<1x32xf32, #tpu.memory_space<vmem>>, vector<1x32xf32>
      tpu.vector_store %arg5[%c0_25, %c0_26], %32 {strides = array<i32>} : memref<1x32xf32, #tpu.memory_space<vmem>>, vector<1x32xf32>,
      %c0_27 = arith.constant 0 : index
      %c0_28 = arith.constant 0 : index
      %34 = vector.load %arg4[%c0_27, %c0_28] : memref<1x32xf32, #tpu.memory_space<vmem>>, vector<1x32xf32>
      %35 = arith.mulf %22, %32 : vector<1x32xf32>
      %36 = arith.subf %34, %35 : vector<1x32xf32>
      %c0_29 = arith.constant 0 : index
      %c0_30 = arith.constant 0 : index
      %37 = vector.load %arg6[%c0_29, %c0_30] : memref<1x32xf32, #tpu.memory_space<vmem>>, vector<1x32xf32>
      tpu.vector_store %arg6[%c0_29, %c0_30], %36 {strides = array<i32>} : memref<1x32xf32, #tpu.memory_space<vmem>>, vector<1x32xf32>,
    } else {
    }
    return
  }
  func.func @transform_0(%arg0: i32) -> (i32, i32) {
    %c0_i32 = arith.constant 0 : i32
    %c0_i32_0 = arith.constant 0 : i32
    return %arg0, %c0_i32 : i32, i32
  }
  func.func @transform_1(%arg0: i32) -> (i32, i32) {
    %c0_i32 = arith.constant 0 : i32
    %c0_i32_0 = arith.constant 0 : i32
    %c0_i32_1 = arith.constant 0 : i32
    return %c0_i32, %c0_i32_0 : i32, i32
  }
  func.func @transform_2(%arg0: i32) -> (i32, i32) {
    %c0_i32 = arith.constant 0 : i32
    %c0_i32_0 = arith.constant 0 : i32
    %c0_i32_1 = arith.constant 0 : i32
    return %c0_i32, %c0_i32_0 : i32, i32
  }
  func.func @transform_3(%arg0: i32) -> (i32, i32) {
    %c0_i32 = arith.constant 0 : i32
    %c0_i32_0 = arith.constant 0 : i32
    %c0_i32_1 = arith.constant 0 : i32
    return %c0_i32, %c0_i32_0 : i32, i32
  }
  func.func @transform_4(%arg0: i32) -> (i32, i32) {
    %c0_i32 = arith.constant 0 : i32
    %c0_i32_0 = arith.constant 0 : i32
    %c0_i32_1 = arith.constant 0 : i32
    return %c0_i32, %c0_i32_0 : i32, i32
  }
  func.func @transform_5(%arg0: i32) -> (i32, i32) {
    %c0_i32 = arith.constant 0 : i32
    %c0_i32_0 = arith.constant 0 : i32
    %c0_i32_1 = arith.constant 0 : i32
    return %c0_i32, %c0_i32_0 : i32, i32
  }
}

module attributes {stable_mosaic.version = 11 : i64} {
  func.func @_edge_apply_kernel(%arg0: i32, %arg1: i32, %arg2: memref<1x32x64xbf16, #tpu.memory_space<vmem>>, %arg3: memref<64x32xbf16, #tpu.memory_space<vmem>>, %arg4: memref<1x32xf32, #tpu.memory_space<vmem>>, %arg5: memref<1x32xf32, #tpu.memory_space<vmem>>, %arg6: memref<32x32xbf16, #tpu.memory_space<vmem>>, %arg7: memref<32x32xbf16, #tpu.memory_space<vmem>>, %arg8: memref<32x32xf32, #tpu.memory_space<vmem>>) attributes {dimension_semantics = [#tpu.dimension_semantics<parallel>, #tpu.dimension_semantics<arbitrary>], iteration_bounds = array<i64: 1, 4>, scalar_prefetch = 0 : i64, scratch_operands = 1 : i64, tpu.core_type = #tpu.core_type<tc>, window_params = [{transform_indices = @transform_0, window_bounds = array<i64: 1, 32, 64>}, {pipeline_mode = #tpu.pipeline_mode<synchronous>, transform_indices = @transform_1, window_bounds = array<i64: 64, 32>}, {pipeline_mode = #tpu.pipeline_mode<synchronous>, transform_indices = @transform_2, window_bounds = array<i64: 1, 32>}, {pipeline_mode = #tpu.pipeline_mode<synchronous>, transform_indices = @transform_3, window_bounds = array<i64: 1, 32>}, {transform_indices = @transform_4, window_bounds = array<i64: 32, 32>}, {transform_indices = @transform_5, window_bounds = array<i64: 32, 32>}]} {
    %c0 = arith.constant 0 : index
    %c0_0 = arith.constant 0 : index
    %c0_1 = arith.constant 0 : index
    %0 = vector.load %arg2[%c0, %c0_0, %c0_1] : memref<1x32x64xbf16, #tpu.memory_space<vmem>>, vector<1x32x64xbf16>
    %1 = vector.shape_cast %0 : vector<1x32x64xbf16> to vector<32x64xbf16>
    %c0_2 = arith.constant 0 : index
    %c0_3 = arith.constant 0 : index
    %2 = vector.load %arg3[%c0_2, %c0_3] : memref<64x32xbf16, #tpu.memory_space<vmem>>, vector<64x32xbf16>
    %cst = arith.constant dense<0.000000e+00> : vector<32x32xf32>
    %3 = tpu.matmul %1, %2, %cst {dimension_numbers = #tpu.dot_dimension_numbers<[1], [0], [0], [1], [0, 0, 1, 1], [], []>} : vector<32x64xbf16>, vector<64x32xbf16>, vector<32x32xf32> -> vector<32x32xf32>
    %c0_4 = arith.constant 0 : index
    %c0_5 = arith.constant 0 : index
    %4 = vector.load %arg4[%c0_4, %c0_5] : memref<1x32xf32, #tpu.memory_space<vmem>>, vector<1x32xf32>
    %5 = vector.broadcast %4 : vector<1x32xf32> to vector<32x32xf32>
    %6 = arith.mulf %3, %5 : vector<32x32xf32>
    %c0_6 = arith.constant 0 : index
    %c0_7 = arith.constant 0 : index
    %7 = vector.load %arg5[%c0_6, %c0_7] : memref<1x32xf32, #tpu.memory_space<vmem>>, vector<1x32xf32>
    %8 = vector.broadcast %7 : vector<1x32xf32> to vector<32x32xf32>
    %9 = arith.addf %6, %8 : vector<32x32xf32>
    %cst_8 = arith.constant 0.000000e+00 : f32
    %10 = vector.broadcast %cst_8 : f32 to vector<32x32xf32>
    %11 = arith.maximumf %9, %10 : vector<32x32xf32>
    %c0_i32 = arith.constant 0 : i32
    %12 = arith.cmpi eq, %arg1, %c0_i32 : i32
    %13 = arith.extui %12 : i1 to i32
    %c0_i32_9 = arith.constant 0 : i32
    %14 = arith.cmpi ne, %13, %c0_i32_9 : i32
    scf.if %14 {
      %c0_13 = arith.constant 0 : index
      %c0_14 = arith.constant 0 : index
      %21 = vector.load %arg8[%c0_13, %c0_14] : memref<32x32xf32, #tpu.memory_space<vmem>>, vector<32x32xf32>
      tpu.vector_store %arg8[%c0_13, %c0_14], %11 {strides = array<i32>} : memref<32x32xf32, #tpu.memory_space<vmem>>, vector<32x32xf32>,
    } else {
    }
    %c0_i32_10 = arith.constant 0 : i32
    %15 = arith.cmpi sgt, %arg1, %c0_i32_10 : i32
    %16 = arith.extui %15 : i1 to i32
    %c0_i32_11 = arith.constant 0 : i32
    %17 = arith.cmpi ne, %16, %c0_i32_11 : i32
    scf.if %17 {
      %c0_13 = arith.constant 0 : index
      %c0_14 = arith.constant 0 : index
      %21 = vector.load %arg8[%c0_13, %c0_14] : memref<32x32xf32, #tpu.memory_space<vmem>>, vector<32x32xf32>
      %22 = arith.maximumf %21, %11 : vector<32x32xf32>
      %c0_15 = arith.constant 0 : index
      %c0_16 = arith.constant 0 : index
      %23 = vector.load %arg8[%c0_15, %c0_16] : memref<32x32xf32, #tpu.memory_space<vmem>>, vector<32x32xf32>
      tpu.vector_store %arg8[%c0_15, %c0_16], %22 {strides = array<i32>} : memref<32x32xf32, #tpu.memory_space<vmem>>, vector<32x32xf32>,
    } else {
    }
    %c3_i32 = arith.constant 3 : i32
    %18 = arith.cmpi eq, %arg1, %c3_i32 : i32
    %19 = arith.extui %18 : i1 to i32
    %c0_i32_12 = arith.constant 0 : i32
    %20 = arith.cmpi ne, %19, %c0_i32_12 : i32
    scf.if %20 {
      %c0_13 = arith.constant 0 : index
      %c0_14 = arith.constant 0 : index
      %21 = vector.load %arg8[%c0_13, %c0_14] : memref<32x32xf32, #tpu.memory_space<vmem>>, vector<32x32xf32>
      %c0_15 = arith.constant 0 : index
      %c0_16 = arith.constant 0 : index
      %22 = vector.load %arg6[%c0_15, %c0_16] : memref<32x32xbf16, #tpu.memory_space<vmem>>, vector<32x32xbf16>
      %23 = arith.extf %22 : vector<32x32xbf16> to vector<32x32xf32>
      %24 = arith.addf %21, %23 : vector<32x32xf32>
      %25 = arith.truncf %24 : vector<32x32xf32> to vector<32x32xbf16>
      %c0_17 = arith.constant 0 : index
      %c0_18 = arith.constant 0 : index
      %26 = vector.load %arg7[%c0_17, %c0_18] : memref<32x32xbf16, #tpu.memory_space<vmem>>, vector<32x32xbf16>
      tpu.vector_store %arg7[%c0_17, %c0_18], %25 {strides = array<i32>} : memref<32x32xbf16, #tpu.memory_space<vmem>>, vector<32x32xbf16>,
    } else {
    }
    return
  }
  func.func @transform_0(%arg0: i32, %arg1: i32) -> (i32, i32, i32) {
    %c0_i32 = arith.constant 0 : i32
    %c0_i32_0 = arith.constant 0 : i32
    return %arg1, %arg0, %c0_i32 : i32, i32, i32
  }
  func.func @transform_1(%arg0: i32, %arg1: i32) -> (i32, i32) {
    %c0_i32 = arith.constant 0 : i32
    %c0_i32_0 = arith.constant 0 : i32
    %c0_i32_1 = arith.constant 0 : i32
    return %c0_i32, %c0_i32_0 : i32, i32
  }
  func.func @transform_2(%arg0: i32, %arg1: i32) -> (i32, i32) {
    %c0_i32 = arith.constant 0 : i32
    %c0_i32_0 = arith.constant 0 : i32
    %c0_i32_1 = arith.constant 0 : i32
    return %c0_i32, %c0_i32_0 : i32, i32
  }
  func.func @transform_3(%arg0: i32, %arg1: i32) -> (i32, i32) {
    %c0_i32 = arith.constant 0 : i32
    %c0_i32_0 = arith.constant 0 : i32
    %c0_i32_1 = arith.constant 0 : i32
    return %c0_i32, %c0_i32_0 : i32, i32
  }
  func.func @transform_4(%arg0: i32, %arg1: i32) -> (i32, i32) {
    %c0_i32 = arith.constant 0 : i32
    %c0_i32_0 = arith.constant 0 : i32
    return %arg0, %c0_i32 : i32, i32
  }
  func.func @transform_5(%arg0: i32, %arg1: i32) -> (i32, i32) {
    %c0_i32 = arith.constant 0 : i32
    %c0_i32_0 = arith.constant 0 : i32
    return %arg0, %c0_i32 : i32, i32
  }
}

module attributes {stable_mosaic.version = 11 : i64} {
  func.func @_bn_stats_kernel(%arg0: i32, %arg1: memref<32x96xbf16, #tpu.memory_space<vmem>>, %arg2: memref<96x32xbf16, #tpu.memory_space<vmem>>, %arg3: memref<1x32xf32, #tpu.memory_space<vmem>>, %arg4: memref<1x32xf32, #tpu.memory_space<vmem>>, %arg5: memref<1x32xf32, #tpu.memory_space<vmem>>, %arg6: memref<1x32xf32, #tpu.memory_space<vmem>>, %arg7: memref<1x32xf32, #tpu.memory_space<vmem>>, %arg8: memref<1x32xf32, #tpu.memory_space<vmem>>) attributes {dimension_semantics = [#tpu.dimension_semantics<arbitrary>], iteration_bounds = array<i64: 1>, scalar_prefetch = 0 : i64, scratch_operands = 2 : i64, tpu.core_type = #tpu.core_type<tc>, window_params = [{transform_indices = @transform_0, window_bounds = array<i64: 32, 96>}, {pipeline_mode = #tpu.pipeline_mode<synchronous>, transform_indices = @transform_1, window_bounds = array<i64: 96, 32>}, {pipeline_mode = #tpu.pipeline_mode<synchronous>, transform_indices = @transform_2, window_bounds = array<i64: 1, 32>}, {pipeline_mode = #tpu.pipeline_mode<synchronous>, transform_indices = @transform_3, window_bounds = array<i64: 1, 32>}, {pipeline_mode = #tpu.pipeline_mode<synchronous>, transform_indices = @transform_4, window_bounds = array<i64: 1, 32>}, {pipeline_mode = #tpu.pipeline_mode<synchronous>, transform_indices = @transform_5, window_bounds = array<i64: 1, 32>}]} {
    %c0_i32 = arith.constant 0 : i32
    %0 = arith.cmpi eq, %arg0, %c0_i32 : i32
    %1 = arith.extui %0 : i1 to i32
    %c0_i32_0 = arith.constant 0 : i32
    %2 = arith.cmpi ne, %1, %c0_i32_0 : i32
    scf.if %2 {
      %cst_16 = arith.constant 0.000000e+00 : f32
      %20 = vector.broadcast %cst_16 : f32 to vector<1x32xf32>
      %c0_17 = arith.constant 0 : index
      %c0_18 = arith.constant 0 : index
      %21 = vector.load %arg7[%c0_17, %c0_18] : memref<1x32xf32, #tpu.memory_space<vmem>>, vector<1x32xf32>
      tpu.vector_store %arg7[%c0_17, %c0_18], %20 {strides = array<i32>} : memref<1x32xf32, #tpu.memory_space<vmem>>, vector<1x32xf32>,
      %cst_19 = arith.constant 0.000000e+00 : f32
      %22 = vector.broadcast %cst_19 : f32 to vector<1x32xf32>
      %c0_20 = arith.constant 0 : index
      %c0_21 = arith.constant 0 : index
      %23 = vector.load %arg8[%c0_20, %c0_21] : memref<1x32xf32, #tpu.memory_space<vmem>>, vector<1x32xf32>
      tpu.vector_store %arg8[%c0_20, %c0_21], %22 {strides = array<i32>} : memref<1x32xf32, #tpu.memory_space<vmem>>, vector<1x32xf32>,
    } else {
    }
    %c0 = arith.constant 0 : index
    %c0_1 = arith.constant 0 : index
    %3 = vector.load %arg1[%c0, %c0_1] : memref<32x96xbf16, #tpu.memory_space<vmem>>, vector<32x96xbf16>
    %c0_2 = arith.constant 0 : index
    %c0_3 = arith.constant 0 : index
    %4 = vector.load %arg2[%c0_2, %c0_3] : memref<96x32xbf16, #tpu.memory_space<vmem>>, vector<96x32xbf16>
    %cst = arith.constant dense<0.000000e+00> : vector<32x32xf32>
    %5 = tpu.matmul %3, %4, %cst {dimension_numbers = #tpu.dot_dimension_numbers<[1], [0], [0], [1], [0, 0, 1, 1], [], []>} : vector<32x96xbf16>, vector<96x32xbf16>, vector<32x32xf32> -> vector<32x32xf32>
    %c0_4 = arith.constant 0 : index
    %c0_5 = arith.constant 0 : index
    %6 = vector.load %arg7[%c0_4, %c0_5] : memref<1x32xf32, #tpu.memory_space<vmem>>, vector<1x32xf32>
    %cst_6 = arith.constant dense<0.000000e+00> : vector<32xf32>
    %7 = vector.multi_reduction <add>, %5, %cst_6 [0] : vector<32x32xf32> to vector<32xf32>
    %8 = vector.shape_cast %7 : vector<32xf32> to vector<1x32xf32>
    %9 = arith.addf %6, %8 : vector<1x32xf32>
    %c0_7 = arith.constant 0 : index
    %c0_8 = arith.constant 0 : index
    %10 = vector.load %arg7[%c0_7, %c0_8] : memref<1x32xf32, #tpu.memory_space<vmem>>, vector<1x32xf32>
    tpu.vector_store %arg7[%c0_7, %c0_8], %9 {strides = array<i32>} : memref<1x32xf32, #tpu.memory_space<vmem>>, vector<1x32xf32>,
    %c0_9 = arith.constant 0 : index
    %c0_10 = arith.constant 0 : index
    %11 = vector.load %arg8[%c0_9, %c0_10] : memref<1x32xf32, #tpu.memory_space<vmem>>, vector<1x32xf32>
    %12 = arith.mulf %5, %5 : vector<32x32xf32>
    %cst_11 = arith.constant dense<0.000000e+00> : vector<32xf32>
    %13 = vector.multi_reduction <add>, %12, %cst_11 [0] : vector<32x32xf32> to vector<32xf32>
    %14 = vector.shape_cast %13 : vector<32xf32> to vector<1x32xf32>
    %15 = arith.addf %11, %14 : vector<1x32xf32>
    %c0_12 = arith.constant 0 : index
    %c0_13 = arith.constant 0 : index
    %16 = vector.load %arg8[%c0_12, %c0_13] : memref<1x32xf32, #tpu.memory_space<vmem>>, vector<1x32xf32>
    tpu.vector_store %arg8[%c0_12, %c0_13], %15 {strides = array<i32>} : memref<1x32xf32, #tpu.memory_space<vmem>>, vector<1x32xf32>,
    %c0_i32_14 = arith.constant 0 : i32
    %17 = arith.cmpi eq, %arg0, %c0_i32_14 : i32
    %18 = arith.extui %17 : i1 to i32
    %c0_i32_15 = arith.constant 0 : i32
    %19 = arith.cmpi ne, %18, %c0_i32_15 : i32
    scf.if %19 {
      %c0_16 = arith.constant 0 : index
      %c0_17 = arith.constant 0 : index
      %20 = vector.load %arg7[%c0_16, %c0_17] : memref<1x32xf32, #tpu.memory_space<vmem>>, vector<1x32xf32>
      %cst_18 = arith.constant 3.125000e-02 : f32
      %21 = vector.broadcast %cst_18 : f32 to vector<1x32xf32>
      %22 = arith.mulf %20, %21 : vector<1x32xf32>
      %c0_19 = arith.constant 0 : index
      %c0_20 = arith.constant 0 : index
      %23 = vector.load %arg8[%c0_19, %c0_20] : memref<1x32xf32, #tpu.memory_space<vmem>>, vector<1x32xf32>
      %cst_21 = arith.constant 3.125000e-02 : f32
      %24 = vector.broadcast %cst_21 : f32 to vector<1x32xf32>
      %25 = arith.mulf %23, %24 : vector<1x32xf32>
      %26 = arith.mulf %22, %22 : vector<1x32xf32>
      %27 = arith.subf %25, %26 : vector<1x32xf32>
      %c0_22 = arith.constant 0 : index
      %c0_23 = arith.constant 0 : index
      %28 = vector.load %arg3[%c0_22, %c0_23] : memref<1x32xf32, #tpu.memory_space<vmem>>, vector<1x32xf32>
      %cst_24 = arith.constant 9.99999974E-6 : f32
      %29 = vector.broadcast %cst_24 : f32 to vector<1x32xf32>
      %30 = arith.addf %27, %29 : vector<1x32xf32>
      %31 = math.rsqrt %30 : vector<1x32xf32>
      %32 = arith.mulf %28, %31 : vector<1x32xf32>
      %c0_25 = arith.constant 0 : index
      %c0_26 = arith.constant 0 : index
      %33 = vector.load %arg5[%c0_25, %c0_26] : memref<1x32xf32, #tpu.memory_space<vmem>>, vector<1x32xf32>
      tpu.vector_store %arg5[%c0_25, %c0_26], %32 {strides = array<i32>} : memref<1x32xf32, #tpu.memory_space<vmem>>, vector<1x32xf32>,
      %c0_27 = arith.constant 0 : index
      %c0_28 = arith.constant 0 : index
      %34 = vector.load %arg4[%c0_27, %c0_28] : memref<1x32xf32, #tpu.memory_space<vmem>>, vector<1x32xf32>
      %35 = arith.mulf %22, %32 : vector<1x32xf32>
      %36 = arith.subf %34, %35 : vector<1x32xf32>
      %c0_29 = arith.constant 0 : index
      %c0_30 = arith.constant 0 : index
      %37 = vector.load %arg6[%c0_29, %c0_30] : memref<1x32xf32, #tpu.memory_space<vmem>>, vector<1x32xf32>
      tpu.vector_store %arg6[%c0_29, %c0_30], %36 {strides = array<i32>} : memref<1x32xf32, #tpu.memory_space<vmem>>, vector<1x32xf32>,
    } else {
    }
    return
  }
  func.func @transform_0(%arg0: i32) -> (i32, i32) {
    %c0_i32 = arith.constant 0 : i32
    %c0_i32_0 = arith.constant 0 : i32
    return %arg0, %c0_i32 : i32, i32
  }
  func.func @transform_1(%arg0: i32) -> (i32, i32) {
    %c0_i32 = arith.constant 0 : i32
    %c0_i32_0 = arith.constant 0 : i32
    %c0_i32_1 = arith.constant 0 : i32
    return %c0_i32, %c0_i32_0 : i32, i32
  }
  func.func @transform_2(%arg0: i32) -> (i32, i32) {
    %c0_i32 = arith.constant 0 : i32
    %c0_i32_0 = arith.constant 0 : i32
    %c0_i32_1 = arith.constant 0 : i32
    return %c0_i32, %c0_i32_0 : i32, i32
  }
  func.func @transform_3(%arg0: i32) -> (i32, i32) {
    %c0_i32 = arith.constant 0 : i32
    %c0_i32_0 = arith.constant 0 : i32
    %c0_i32_1 = arith.constant 0 : i32
    return %c0_i32, %c0_i32_0 : i32, i32
  }
  func.func @transform_4(%arg0: i32) -> (i32, i32) {
    %c0_i32 = arith.constant 0 : i32
    %c0_i32_0 = arith.constant 0 : i32
    %c0_i32_1 = arith.constant 0 : i32
    return %c0_i32, %c0_i32_0 : i32, i32
  }
  func.func @transform_5(%arg0: i32) -> (i32, i32) {
    %c0_i32 = arith.constant 0 : i32
    %c0_i32_0 = arith.constant 0 : i32
    %c0_i32_1 = arith.constant 0 : i32
    return %c0_i32, %c0_i32_0 : i32, i32
  }
}

module attributes {stable_mosaic.version = 11 : i64} {
  func.func @_pool_apply_kernel(%arg0: i32, %arg1: memref<32x96xbf16, #tpu.memory_space<vmem>>, %arg2: memref<96x32xbf16, #tpu.memory_space<vmem>>, %arg3: memref<1x32xf32, #tpu.memory_space<vmem>>, %arg4: memref<1x32xf32, #tpu.memory_space<vmem>>, %arg5: memref<4x32xbf16, #tpu.memory_space<vmem>>) attributes {dimension_semantics = [#tpu.dimension_semantics<parallel>], iteration_bounds = array<i64: 1>, scalar_prefetch = 0 : i64, scratch_operands = 0 : i64, tpu.core_type = #tpu.core_type<tc>, window_params = [{transform_indices = @transform_0, window_bounds = array<i64: 32, 96>}, {pipeline_mode = #tpu.pipeline_mode<synchronous>, transform_indices = @transform_1, window_bounds = array<i64: 96, 32>}, {pipeline_mode = #tpu.pipeline_mode<synchronous>, transform_indices = @transform_2, window_bounds = array<i64: 1, 32>}, {pipeline_mode = #tpu.pipeline_mode<synchronous>, transform_indices = @transform_3, window_bounds = array<i64: 1, 32>}, {transform_indices = @transform_4, window_bounds = array<i64: 4, 32>}]} {
    %c0 = arith.constant 0 : index
    %c0_0 = arith.constant 0 : index
    %0 = vector.load %arg1[%c0, %c0_0] : memref<32x96xbf16, #tpu.memory_space<vmem>>, vector<32x96xbf16>
    %c0_1 = arith.constant 0 : index
    %c0_2 = arith.constant 0 : index
    %1 = vector.load %arg2[%c0_1, %c0_2] : memref<96x32xbf16, #tpu.memory_space<vmem>>, vector<96x32xbf16>
    %cst = arith.constant dense<0.000000e+00> : vector<32x32xf32>
    %2 = tpu.matmul %0, %1, %cst {dimension_numbers = #tpu.dot_dimension_numbers<[1], [0], [0], [1], [0, 0, 1, 1], [], []>} : vector<32x96xbf16>, vector<96x32xbf16>, vector<32x32xf32> -> vector<32x32xf32>
    %c0_3 = arith.constant 0 : index
    %c0_4 = arith.constant 0 : index
    %3 = vector.load %arg3[%c0_3, %c0_4] : memref<1x32xf32, #tpu.memory_space<vmem>>, vector<1x32xf32>
    %4 = vector.broadcast %3 : vector<1x32xf32> to vector<32x32xf32>
    %5 = arith.mulf %2, %4 : vector<32x32xf32>
    %c0_5 = arith.constant 0 : index
    %c0_6 = arith.constant 0 : index
    %6 = vector.load %arg4[%c0_5, %c0_6] : memref<1x32xf32, #tpu.memory_space<vmem>>, vector<1x32xf32>
    %7 = vector.broadcast %6 : vector<1x32xf32> to vector<32x32xf32>
    %8 = arith.addf %5, %7 : vector<32x32xf32>
    %cst_7 = arith.constant 0.000000e+00 : f32
    %9 = vector.broadcast %cst_7 : f32 to vector<32x32xf32>
    %10 = arith.maximumf %8, %9 : vector<32x32xf32>
    %11 = vector.shape_cast %10 : vector<32x32xf32> to vector<4x8x32xf32>
    %cst_8 = arith.constant dense<0xFF800000> : vector<4x32xf32>
    %12 = vector.multi_reduction <maximumf>, %11, %cst_8 [1] : vector<4x8x32xf32> to vector<4x32xf32>
    %13 = arith.truncf %12 : vector<4x32xf32> to vector<4x32xbf16>
    %c0_9 = arith.constant 0 : index
    %c0_10 = arith.constant 0 : index
    %14 = vector.load %arg5[%c0_9, %c0_10] : memref<4x32xbf16, #tpu.memory_space<vmem>>, vector<4x32xbf16>
    tpu.vector_store %arg5[%c0_9, %c0_10], %13 {strides = array<i32>} : memref<4x32xbf16, #tpu.memory_space<vmem>>, vector<4x32xbf16>,
    return
  }
  func.func @transform_0(%arg0: i32) -> (i32, i32) {
    %c0_i32 = arith.constant 0 : i32
    %c0_i32_0 = arith.constant 0 : i32
    return %arg0, %c0_i32 : i32, i32
  }
  func.func @transform_1(%arg0: i32) -> (i32, i32) {
    %c0_i32 = arith.constant 0 : i32
    %c0_i32_0 = arith.constant 0 : i32
    %c0_i32_1 = arith.constant 0 : i32
    return %c0_i32, %c0_i32_0 : i32, i32
  }
  func.func @transform_2(%arg0: i32) -> (i32, i32) {
    %c0_i32 = arith.constant 0 : i32
    %c0_i32_0 = arith.constant 0 : i32
    %c0_i32_1 = arith.constant 0 : i32
    return %c0_i32, %c0_i32_0 : i32, i32
  }
  func.func @transform_3(%arg0: i32) -> (i32, i32) {
    %c0_i32 = arith.constant 0 : i32
    %c0_i32_0 = arith.constant 0 : i32
    %c0_i32_1 = arith.constant 0 : i32
    return %c0_i32, %c0_i32_0 : i32, i32
  }
  func.func @transform_4(%arg0: i32) -> (i32, i32) {
    %c0_i32 = arith.constant 0 : i32
    %c0_i32_0 = arith.constant 0 : i32
    return %arg0, %c0_i32 : i32, i32
  }
}

module attributes {stable_mosaic.version = 11 : i64} {
  func.func @_fuse_kernel(%arg0: memref<32x96xbf16, #tpu.memory_space<vmem>>, %arg1: memref<4x32xbf16, #tpu.memory_space<vmem>>, %arg2: memref<96x64xbf16, #tpu.memory_space<vmem>>, %arg3: memref<32x64xbf16, #tpu.memory_space<vmem>>, %arg4: memref<1x64xf32, #tpu.memory_space<vmem>>, %arg5: memref<1x64xf32, #tpu.memory_space<vmem>>, %arg6: memref<32x64xbf16, #tpu.memory_space<vmem>>) attributes {dimension_semantics = [], scalar_prefetch = 0 : i64, scratch_operands = 0 : i64, tpu.core_type = #tpu.core_type<tc>} {
    %c0 = arith.constant 0 : index
    %c0_0 = arith.constant 0 : index
    %0 = vector.load %arg0[%c0, %c0_0] : memref<32x96xbf16, #tpu.memory_space<vmem>>, vector<32x96xbf16>
    %c0_1 = arith.constant 0 : index
    %c0_2 = arith.constant 0 : index
    %1 = vector.load %arg2[%c0_1, %c0_2] : memref<96x64xbf16, #tpu.memory_space<vmem>>, vector<96x64xbf16>
    %cst = arith.constant dense<0.000000e+00> : vector<32x64xf32>
    %2 = tpu.matmul %0, %1, %cst {dimension_numbers = #tpu.dot_dimension_numbers<[1], [0], [0], [1], [0, 0, 1, 1], [], []>} : vector<32x96xbf16>, vector<96x64xbf16>, vector<32x64xf32> -> vector<32x64xf32>
    %c0_3 = arith.constant 0 : index
    %c0_4 = arith.constant 0 : index
    %3 = vector.load %arg1[%c0_3, %c0_4] : memref<4x32xbf16, #tpu.memory_space<vmem>>, vector<4x32xbf16>
    %c0_5 = arith.constant 0 : index
    %c0_6 = arith.constant 0 : index
    %4 = vector.load %arg3[%c0_5, %c0_6] : memref<32x64xbf16, #tpu.memory_space<vmem>>, vector<32x64xbf16>
    %cst_7 = arith.constant dense<0.000000e+00> : vector<4x64xf32>
    %5 = tpu.matmul %3, %4, %cst_7 {dimension_numbers = #tpu.dot_dimension_numbers<[1], [0], [0], [1], [0, 0, 1, 1], [], []>} : vector<4x32xbf16>, vector<32x64xbf16>, vector<4x64xf32> -> vector<4x64xf32>
    %6 = vector.shape_cast %2 : vector<32x64xf32> to vector<4x8x64xf32>
    %7 = vector.shape_cast %5 : vector<4x64xf32> to vector<4x1x64xf32>
    %8 = vector.broadcast %7 : vector<4x1x64xf32> to vector<4x8x64xf32>
    %9 = arith.addf %6, %8 : vector<4x8x64xf32>
    %10 = vector.shape_cast %9 : vector<4x8x64xf32> to vector<32x64xf32>
    %c0_8 = arith.constant 0 : index
    %c0_9 = arith.constant 0 : index
    %11 = vector.load %arg4[%c0_8, %c0_9] : memref<1x64xf32, #tpu.memory_space<vmem>>, vector<1x64xf32>
    %c0_10 = arith.constant 0 : index
    %c0_11 = arith.constant 0 : index
    %12 = vector.load %arg5[%c0_10, %c0_11] : memref<1x64xf32, #tpu.memory_space<vmem>>, vector<1x64xf32>
    %cst_12 = arith.constant dense<0.000000e+00> : vector<64xf32>
    %13 = vector.multi_reduction <add>, %10, %cst_12 [0] : vector<32x64xf32> to vector<64xf32>
    %14 = vector.shape_cast %13 : vector<64xf32> to vector<1x64xf32>
    %cst_13 = arith.constant 3.200000e+01 : f32
    %15 = vector.broadcast %cst_13 : f32 to vector<1x64xf32>
    %16 = arith.divf %14, %15 : vector<1x64xf32>
    %17 = arith.mulf %10, %10 : vector<32x64xf32>
    %cst_14 = arith.constant dense<0.000000e+00> : vector<64xf32>
    %18 = vector.multi_reduction <add>, %17, %cst_14 [0] : vector<32x64xf32> to vector<64xf32>
    %19 = vector.shape_cast %18 : vector<64xf32> to vector<1x64xf32>
    %cst_15 = arith.constant 3.200000e+01 : f32
    %20 = vector.broadcast %cst_15 : f32 to vector<1x64xf32>
    %21 = arith.divf %19, %20 : vector<1x64xf32>
    %22 = arith.mulf %16, %16 : vector<1x64xf32>
    %23 = arith.subf %21, %22 : vector<1x64xf32>
    %cst_16 = arith.constant 9.99999974E-6 : f32
    %24 = vector.broadcast %cst_16 : f32 to vector<1x64xf32>
    %25 = arith.addf %23, %24 : vector<1x64xf32>
    %26 = math.rsqrt %25 : vector<1x64xf32>
    %27 = arith.mulf %11, %26 : vector<1x64xf32>
    %28 = vector.broadcast %27 : vector<1x64xf32> to vector<32x64xf32>
    %29 = arith.mulf %10, %28 : vector<32x64xf32>
    %30 = arith.mulf %16, %27 : vector<1x64xf32>
    %31 = arith.subf %12, %30 : vector<1x64xf32>
    %32 = vector.broadcast %31 : vector<1x64xf32> to vector<32x64xf32>
    %33 = arith.addf %29, %32 : vector<32x64xf32>
    %cst_17 = arith.constant 0.000000e+00 : f32
    %34 = vector.broadcast %cst_17 : f32 to vector<32x64xf32>
    %35 = arith.maximumf %33, %34 : vector<32x64xf32>
    %36 = arith.truncf %35 : vector<32x64xf32> to vector<32x64xbf16>
    %c0_18 = arith.constant 0 : index
    %c0_19 = arith.constant 0 : index
    %37 = vector.load %arg6[%c0_18, %c0_19] : memref<32x64xbf16, #tpu.memory_space<vmem>>, vector<32x64xbf16>
    tpu.vector_store %arg6[%c0_18, %c0_19], %36 {strides = array<i32>} : memref<32x64xbf16, #tpu.memory_space<vmem>>, vector<32x64xbf16>,
    return
  }
}

module attributes {stable_mosaic.version = 11 : i64} {
  func.func @_batch_pool_kernel(%arg0: memref<2x16x64xbf16, #tpu.memory_space<vmem>>, %arg1: memref<2x128xbf16, #tpu.memory_space<vmem>>) attributes {dimension_semantics = [], scalar_prefetch = 0 : i64, scratch_operands = 0 : i64, tpu.core_type = #tpu.core_type<tc>} {
    %c0 = arith.constant 0 : index
    %c0_0 = arith.constant 0 : index
    %c0_1 = arith.constant 0 : index
    %0 = vector.load %arg0[%c0, %c0_0, %c0_1] : memref<2x16x64xbf16, #tpu.memory_space<vmem>>, vector<2x16x64xbf16>
    %1 = arith.extf %0 : vector<2x16x64xbf16> to vector<2x16x64xf32>
    %cst = arith.constant dense<0xFF800000> : vector<2x64xf32>
    %2 = vector.multi_reduction <maximumf>, %1, %cst [1] : vector<2x16x64xf32> to vector<2x64xf32>
    %cst_2 = arith.constant dense<0.000000e+00> : vector<2x64xf32>
    %3 = vector.multi_reduction <add>, %1, %cst_2 [1] : vector<2x16x64xf32> to vector<2x64xf32>
    %cst_3 = arith.constant 1.600000e+01 : f32
    %4 = vector.broadcast %cst_3 : f32 to vector<2x64xf32>
    %5 = arith.divf %3, %4 : vector<2x64xf32>
    %6 = tpu.concatenate %2, %5 in 1 : vector<2x64xf32>, vector<2x64xf32> -> vector<2x128xf32>
    %7 = arith.truncf %6 : vector<2x128xf32> to vector<2x128xbf16>
    %c0_4 = arith.constant 0 : index
    %c0_5 = arith.constant 0 : index
    %8 = vector.load %arg1[%c0_4, %c0_5] : memref<2x128xbf16, #tpu.memory_space<vmem>>, vector<2x128xbf16>
    tpu.vector_store %arg1[%c0_4, %c0_5], %7 {strides = array<i32>} : memref<2x128xbf16, #tpu.memory_space<vmem>>, vector<2x128xbf16>,
    return
  }
}

module attributes {stable_mosaic.version = 11 : i64} {
  func.func @_segment_kernel(%arg0: memref<32x64xbf16, #tpu.memory_space<vmem>>, %arg1: memref<64x64xbf16, #tpu.memory_space<vmem>>, %arg2: memref<1x64xf32, #tpu.memory_space<vmem>>, %arg3: memref<1x64xf32, #tpu.memory_space<vmem>>, %arg4: memref<64x8xbf16, #tpu.memory_space<vmem>>, %arg5: memref<1x8xf32, #tpu.memory_space<vmem>>, %arg6: memref<1x8xf32, #tpu.memory_space<vmem>>, %arg7: memref<32x8xf32, #tpu.memory_space<vmem>>) attributes {dimension_semantics = [], scalar_prefetch = 0 : i64, scratch_operands = 0 : i64, tpu.core_type = #tpu.core_type<tc>} {
    %c0 = arith.constant 0 : index
    %c0_0 = arith.constant 0 : index
    %0 = vector.load %arg0[%c0, %c0_0] : memref<32x64xbf16, #tpu.memory_space<vmem>>, vector<32x64xbf16>
    %c0_1 = arith.constant 0 : index
    %c0_2 = arith.constant 0 : index
    %1 = vector.load %arg1[%c0_1, %c0_2] : memref<64x64xbf16, #tpu.memory_space<vmem>>, vector<64x64xbf16>
    %cst = arith.constant dense<0.000000e+00> : vector<32x64xf32>
    %2 = tpu.matmul %0, %1, %cst {dimension_numbers = #tpu.dot_dimension_numbers<[1], [0], [0], [1], [0, 0, 1, 1], [], []>} : vector<32x64xbf16>, vector<64x64xbf16>, vector<32x64xf32> -> vector<32x64xf32>
    %c0_3 = arith.constant 0 : index
    %c0_4 = arith.constant 0 : index
    %3 = vector.load %arg2[%c0_3, %c0_4] : memref<1x64xf32, #tpu.memory_space<vmem>>, vector<1x64xf32>
    %c0_5 = arith.constant 0 : index
    %c0_6 = arith.constant 0 : index
    %4 = vector.load %arg3[%c0_5, %c0_6] : memref<1x64xf32, #tpu.memory_space<vmem>>, vector<1x64xf32>
    %cst_7 = arith.constant dense<0.000000e+00> : vector<64xf32>
    %5 = vector.multi_reduction <add>, %2, %cst_7 [0] : vector<32x64xf32> to vector<64xf32>
    %6 = vector.shape_cast %5 : vector<64xf32> to vector<1x64xf32>
    %cst_8 = arith.constant 3.200000e+01 : f32
    %7 = vector.broadcast %cst_8 : f32 to vector<1x64xf32>
    %8 = arith.divf %6, %7 : vector<1x64xf32>
    %9 = arith.mulf %2, %2 : vector<32x64xf32>
    %cst_9 = arith.constant dense<0.000000e+00> : vector<64xf32>
    %10 = vector.multi_reduction <add>, %9, %cst_9 [0] : vector<32x64xf32> to vector<64xf32>
    %11 = vector.shape_cast %10 : vector<64xf32> to vector<1x64xf32>
    %cst_10 = arith.constant 3.200000e+01 : f32
    %12 = vector.broadcast %cst_10 : f32 to vector<1x64xf32>
    %13 = arith.divf %11, %12 : vector<1x64xf32>
    %14 = arith.mulf %8, %8 : vector<1x64xf32>
    %15 = arith.subf %13, %14 : vector<1x64xf32>
    %cst_11 = arith.constant 9.99999974E-6 : f32
    %16 = vector.broadcast %cst_11 : f32 to vector<1x64xf32>
    %17 = arith.addf %15, %16 : vector<1x64xf32>
    %18 = math.rsqrt %17 : vector<1x64xf32>
    %19 = arith.mulf %3, %18 : vector<1x64xf32>
    %20 = vector.broadcast %19 : vector<1x64xf32> to vector<32x64xf32>
    %21 = arith.mulf %2, %20 : vector<32x64xf32>
    %22 = arith.mulf %8, %19 : vector<1x64xf32>
    %23 = arith.subf %4, %22 : vector<1x64xf32>
    %24 = vector.broadcast %23 : vector<1x64xf32> to vector<32x64xf32>
    %25 = arith.addf %21, %24 : vector<32x64xf32>
    %cst_12 = arith.constant 0.000000e+00 : f32
    %26 = vector.broadcast %cst_12 : f32 to vector<32x64xf32>
    %27 = arith.maximumf %25, %26 : vector<32x64xf32>
    %28 = arith.truncf %27 : vector<32x64xf32> to vector<32x64xbf16>
    %c0_13 = arith.constant 0 : index
    %c0_14 = arith.constant 0 : index
    %29 = vector.load %arg4[%c0_13, %c0_14] : memref<64x8xbf16, #tpu.memory_space<vmem>>, vector<64x8xbf16>
    %cst_15 = arith.constant dense<0.000000e+00> : vector<32x8xf32>
    %30 = tpu.matmul %28, %29, %cst_15 {dimension_numbers = #tpu.dot_dimension_numbers<[1], [0], [0], [1], [0, 0, 1, 1], [], []>} : vector<32x64xbf16>, vector<64x8xbf16>, vector<32x8xf32> -> vector<32x8xf32>
    %c0_16 = arith.constant 0 : index
    %c0_17 = arith.constant 0 : index
    %31 = vector.load %arg5[%c0_16, %c0_17] : memref<1x8xf32, #tpu.memory_space<vmem>>, vector<1x8xf32>
    %c0_18 = arith.constant 0 : index
    %c0_19 = arith.constant 0 : index
    %32 = vector.load %arg6[%c0_18, %c0_19] : memref<1x8xf32, #tpu.memory_space<vmem>>, vector<1x8xf32>
    %cst_20 = arith.constant dense<0.000000e+00> : vector<8xf32>
    %33 = vector.multi_reduction <add>, %30, %cst_20 [0] : vector<32x8xf32> to vector<8xf32>
    %34 = vector.shape_cast %33 : vector<8xf32> to vector<1x8xf32>
    %cst_21 = arith.constant 3.200000e+01 : f32
    %35 = vector.broadcast %cst_21 : f32 to vector<1x8xf32>
    %36 = arith.divf %34, %35 : vector<1x8xf32>
    %37 = arith.mulf %30, %30 : vector<32x8xf32>
    %cst_22 = arith.constant dense<0.000000e+00> : vector<8xf32>
    %38 = vector.multi_reduction <add>, %37, %cst_22 [0] : vector<32x8xf32> to vector<8xf32>
    %39 = vector.shape_cast %38 : vector<8xf32> to vector<1x8xf32>
    %cst_23 = arith.constant 3.200000e+01 : f32
    %40 = vector.broadcast %cst_23 : f32 to vector<1x8xf32>
    %41 = arith.divf %39, %40 : vector<1x8xf32>
    %42 = arith.mulf %36, %36 : vector<1x8xf32>
    %43 = arith.subf %41, %42 : vector<1x8xf32>
    %cst_24 = arith.constant 9.99999974E-6 : f32
    %44 = vector.broadcast %cst_24 : f32 to vector<1x8xf32>
    %45 = arith.addf %43, %44 : vector<1x8xf32>
    %46 = math.rsqrt %45 : vector<1x8xf32>
    %47 = arith.mulf %31, %46 : vector<1x8xf32>
    %48 = vector.broadcast %47 : vector<1x8xf32> to vector<32x8xf32>
    %49 = arith.mulf %30, %48 : vector<32x8xf32>
    %50 = arith.mulf %36, %47 : vector<1x8xf32>
    %51 = arith.subf %32, %50 : vector<1x8xf32>
    %52 = vector.broadcast %51 : vector<1x8xf32> to vector<32x8xf32>
    %53 = arith.addf %49, %52 : vector<32x8xf32>
    %cst_25 = arith.constant dense<0xFF800000> : vector<32xf32>
    %54 = vector.multi_reduction <maximumf>, %53, %cst_25 [1] : vector<32x8xf32> to vector<32xf32>
    %55 = vector.shape_cast %54 : vector<32xf32> to vector<32x1xf32>
    %56 = vector.broadcast %55 : vector<32x1xf32> to vector<32x8xf32>
    %57 = arith.subf %53, %56 : vector<32x8xf32>
    %58 = math.exp %57 : vector<32x8xf32>
    %cst_26 = arith.constant dense<0.000000e+00> : vector<32xf32>
    %59 = vector.multi_reduction <add>, %58, %cst_26 [1] : vector<32x8xf32> to vector<32xf32>
    %60 = vector.shape_cast %59 : vector<32xf32> to vector<32x1xf32>
    %61 = math.log %60 : vector<32x1xf32>
    %62 = vector.broadcast %61 : vector<32x1xf32> to vector<32x8xf32>
    %63 = arith.subf %57, %62 : vector<32x8xf32>
    %c0_27 = arith.constant 0 : index
    %c0_28 = arith.constant 0 : index
    %64 = vector.load %arg7[%c0_27, %c0_28] : memref<32x8xf32, #tpu.memory_space<vmem>>, vector<32x8xf32>
    tpu.vector_store %arg7[%c0_27, %c0_28], %63 {strides = array<i32>} : memref<32x8xf32, #tpu.memory_space<vmem>>, vector<32x8xf32>,
    return
  }
}

module attributes {stable_mosaic.version = 11 : i64} {
  func.func @_creativity_kernel(%arg0: memref<2x128xbf16, #tpu.memory_space<vmem>>, %arg1: memref<128x32xbf16, #tpu.memory_space<vmem>>, %arg2: memref<1x32xf32, #tpu.memory_space<vmem>>, %arg3: memref<1x32xf32, #tpu.memory_space<vmem>>, %arg4: memref<1x32xf32, #tpu.memory_space<vmem>>, %arg5: memref<1x1xf32, #tpu.memory_space<vmem>>, %arg6: memref<2x1xf32, #tpu.memory_space<vmem>>) attributes {dimension_semantics = [], scalar_prefetch = 0 : i64, scratch_operands = 0 : i64, tpu.core_type = #tpu.core_type<tc>} {
    %c0 = arith.constant 0 : index
    %c0_0 = arith.constant 0 : index
    %0 = vector.load %arg0[%c0, %c0_0] : memref<2x128xbf16, #tpu.memory_space<vmem>>, vector<2x128xbf16>
    %c0_1 = arith.constant 0 : index
    %c0_2 = arith.constant 0 : index
    %1 = vector.load %arg1[%c0_1, %c0_2] : memref<128x32xbf16, #tpu.memory_space<vmem>>, vector<128x32xbf16>
    %cst = arith.constant dense<0.000000e+00> : vector<2x32xf32>
    %2 = tpu.matmul %0, %1, %cst {dimension_numbers = #tpu.dot_dimension_numbers<[1], [0], [0], [1], [0, 0, 1, 1], [], []>} : vector<2x128xbf16>, vector<128x32xbf16>, vector<2x32xf32> -> vector<2x32xf32>
    %c0_3 = arith.constant 0 : index
    %c0_4 = arith.constant 0 : index
    %3 = vector.load %arg2[%c0_3, %c0_4] : memref<1x32xf32, #tpu.memory_space<vmem>>, vector<1x32xf32>
    %c0_5 = arith.constant 0 : index
    %c0_6 = arith.constant 0 : index
    %4 = vector.load %arg3[%c0_5, %c0_6] : memref<1x32xf32, #tpu.memory_space<vmem>>, vector<1x32xf32>
    %cst_7 = arith.constant dense<0.000000e+00> : vector<32xf32>
    %5 = vector.multi_reduction <add>, %2, %cst_7 [0] : vector<2x32xf32> to vector<32xf32>
    %6 = vector.shape_cast %5 : vector<32xf32> to vector<1x32xf32>
    %cst_8 = arith.constant 2.000000e+00 : f32
    %7 = vector.broadcast %cst_8 : f32 to vector<1x32xf32>
    %8 = arith.divf %6, %7 : vector<1x32xf32>
    %9 = arith.mulf %2, %2 : vector<2x32xf32>
    %cst_9 = arith.constant dense<0.000000e+00> : vector<32xf32>
    %10 = vector.multi_reduction <add>, %9, %cst_9 [0] : vector<2x32xf32> to vector<32xf32>
    %11 = vector.shape_cast %10 : vector<32xf32> to vector<1x32xf32>
    %cst_10 = arith.constant 2.000000e+00 : f32
    %12 = vector.broadcast %cst_10 : f32 to vector<1x32xf32>
    %13 = arith.divf %11, %12 : vector<1x32xf32>
    %14 = arith.mulf %8, %8 : vector<1x32xf32>
    %15 = arith.subf %13, %14 : vector<1x32xf32>
    %cst_11 = arith.constant 9.99999974E-6 : f32
    %16 = vector.broadcast %cst_11 : f32 to vector<1x32xf32>
    %17 = arith.addf %15, %16 : vector<1x32xf32>
    %18 = math.rsqrt %17 : vector<1x32xf32>
    %19 = arith.mulf %3, %18 : vector<1x32xf32>
    %20 = vector.broadcast %19 : vector<1x32xf32> to vector<2x32xf32>
    %21 = arith.mulf %2, %20 : vector<2x32xf32>
    %22 = arith.mulf %8, %19 : vector<1x32xf32>
    %23 = arith.subf %4, %22 : vector<1x32xf32>
    %24 = vector.broadcast %23 : vector<1x32xf32> to vector<2x32xf32>
    %25 = arith.addf %21, %24 : vector<2x32xf32>
    %cst_12 = arith.constant 0.000000e+00 : f32
    %26 = vector.broadcast %cst_12 : f32 to vector<2x32xf32>
    %27 = arith.maximumf %25, %26 : vector<2x32xf32>
    %c0_13 = arith.constant 0 : index
    %c0_14 = arith.constant 0 : index
    %28 = vector.load %arg4[%c0_13, %c0_14] : memref<1x32xf32, #tpu.memory_space<vmem>>, vector<1x32xf32>
    %29 = vector.broadcast %28 : vector<1x32xf32> to vector<2x32xf32>
    %30 = arith.mulf %27, %29 : vector<2x32xf32>
    %cst_15 = arith.constant dense<0.000000e+00> : vector<2xf32>
    %31 = vector.multi_reduction <add>, %30, %cst_15 [1] : vector<2x32xf32> to vector<2xf32>
    %32 = vector.shape_cast %31 : vector<2xf32> to vector<2x1xf32>
    %c0_16 = arith.constant 0 : index
    %c0_17 = arith.constant 0 : index
    %33 = vector.load %arg5[%c0_16, %c0_17] : memref<1x1xf32, #tpu.memory_space<vmem>>, vector<1x1xf32>
    %34 = vector.broadcast %33 : vector<1x1xf32> to vector<2x1xf32>
    %35 = arith.addf %32, %34 : vector<2x1xf32>
    %c0_18 = arith.constant 0 : index
    %c0_19 = arith.constant 0 : index
    %36 = vector.load %arg6[%c0_18, %c0_19] : memref<2x1xf32, #tpu.memory_space<vmem>>, vector<2x1xf32>
    tpu.vector_store %arg6[%c0_18, %c0_19], %35 {strides = array<i32>} : memref<2x1xf32, #tpu.memory_space<vmem>>, vector<2x1xf32>,
    return
  }
}

</mosaic_0001>

<bundles_post_ra>
// kernel: sub.0
= control target key start
LH: loop header
LB: loop body
LE: loop exit
PB: predicated region body
PF: predicated region fallthrough
CT: control target
= control target key end

     0   :  { %s396_s0 = inlined_call_operand.vmem [shape: bf16[128,4], index: 0, kind: input, shape index: {}]   ;;  %s397_s1 = inlined_call_operand.vmem [shape: bf16[128,4], index: 1, kind: input, shape index: {}]   ;;  %s398_s2 = inlined_call_operand.vmem [shape: bf16[128,4], index: 2, kind: output, shape index: {}]  }
   0x1   :  { %v3_v0 = vld [vmem:[%s396_s0] sm:$0xff]   ;;  %v243_v2 = vld [vmem:[%s396_s0 + $0x8] sm:$0xff]   ;;  %v249_v8 = vld [vmem:[%s396_s0 + $0x10] sm:$0xff]  }
   0x2   :  { %v6_v1 = vld [vmem:[%s397_s1] sm:$0xff]   ;;  %v4_v3 = vunpack.c.l.bf16 %v3_v0  ;;  %v17_v5 = vunpack.c.h.bf16 %v3_v0  ;;  %v244_v7 = vld [vmem:[%s397_s1 + $0x8] sm:$0xff]   ;;  %v250_v9 = vld [vmem:[%s397_s1 + $0x10] sm:$0xff]   ;;  %v32_v10 = vunpack.c.l.bf16 %v243_v2  ;;  %v47_v12 = vunpack.c.h.bf16 %v243_v2 }
   0x3   :  { %v7_v4 = vunpack.c.l.bf16 %v6_v1  ;;  %v21_v6 = vunpack.c.h.bf16 %v6_v1  ;;  %v36_v11 = vunpack.c.l.bf16 %v244_v7  ;;  %v51_v13 = vunpack.c.h.bf16 %v244_v7  ;;  %v255_v14 = vld [vmem:[%s396_s0 + $0x18] sm:$0xff]   ;;  %v261_v24 = vld [vmem:[%s396_s0 + $0x20] sm:$0xff]   ;;  %v267_v34 = vld [vmem:[%s396_s0 + $0x28] sm:$0xff]  }
   0x4   :  { %v62_v17 = vunpack.c.l.bf16 %v249_v8  ;;  %v66_v18 = vunpack.c.l.bf16 %v250_v9  ;;  %v256_v19 = vld [vmem:[%s397_s1 + $0x18] sm:$0xff]   ;;  %v77_v22 = vunpack.c.h.bf16 %v249_v8  ;;  %v81_v23 = vunpack.c.h.bf16 %v250_v9  ;;  %v262_v29 = vld [vmem:[%s397_s1 + $0x20] sm:$0xff]   ;;  %v268_v35 = vld [vmem:[%s397_s1 + $0x28] sm:$0xff]  }
   0x5   :  { %v11_v15 = vsub.f32 %v4_v3, %v7_v4  ;;  %v25_v16 = vsub.f32 %v17_v5, %v21_v6  ;;  %v40_v20 = vsub.f32 %v32_v10, %v36_v11  ;;  %v55_v21 = vsub.f32 %v47_v12, %v51_v13  ;;  %v273_v44 = vld [vmem:[%s396_s0 + $0x30] sm:$0xff]   ;;  %v279_v54 = vld [vmem:[%s396_s0 + $0x38] sm:$0xff]  }
   0x6   :  { %v70_v27 = vsub.f32 %v62_v17, %v66_v18  ;;  %v92_v28 = vunpack.c.l.bf16 %v255_v14  ;;  %v85_v32 = vsub.f32 %v77_v22, %v81_v23  ;;  %v96_v33 = vunpack.c.l.bf16 %v256_v19  ;;  %v274_v49 = vld [vmem:[%s397_s1 + $0x30] sm:$0xff]   ;;  %v280_v59 = vld [vmem:[%s397_s1 + $0x38] sm:$0xff]  }
   0x7   :  { %v13_v25 = vpack.c.bf16 0.0, %v11_v15  ;;  %v28_v26 = vpack.c.bf16 0.0, %v25_v16  ;;  %v43_v30 = vpack.c.bf16 0.0, %v40_v20  ;;  %v58_v31 = vpack.c.bf16 0.0, %v55_v21 }
   0x8   :  { %v73_v36 = vpack.c.bf16 0.0, %v70_v27  ;;  %v107_v37 = vunpack.c.h.bf16 %v255_v14  ;;  %v111_v38 = vunpack.c.h.bf16 %v256_v19  ;;  %v122_v39 = vunpack.c.l.bf16 %v261_v24 }
   0x9   :  { %14 = vst [vmem:[%s398_s2] sm:$0xf] %v13_v25  ;;  %v88_v40 = vpack.c.bf16 0.0, %v85_v32  ;;  %v100_v41 = vsub.f32 %v92_v28, %v96_v33  ;;  %v126_v42 = vunpack.c.l.bf16 %v262_v29  ;;  %v137_v43 = vunpack.c.h.bf16 %v261_v24 }
   0xa   :  { %242 = vst [vmem:[%s398_s2 + $0x4] sm:$0xf] %v28_v26  ;;  %v115_v45 = vsub.f32 %v107_v37, %v111_v38  ;;  %v141_v46 = vunpack.c.h.bf16 %v262_v29  ;;  %v152_v47 = vunpack.c.l.bf16 %v267_v34  ;;  %v156_v48 = vunpack.c.l.bf16 %v268_v35 }
   0xb   :  { %245 = vst [vmem:[%s398_s2 + $0x8] sm:$0xf] %v43_v30  ;;  %v103_v50 = vpack.c.bf16 0.0, %v100_v41  ;;  %v130_v51 = vsub.f32 %v122_v39, %v126_v42  ;;  %v167_v52 = vunpack.c.h.bf16 %v267_v34  ;;  %v171_v53 = vunpack.c.h.bf16 %v268_v35 }
   0xc   :  { %248 = vst [vmem:[%s398_s2 + $0xc] sm:$0xf] %v58_v31  ;;  %v118_v55 = vpack.c.bf16 0.0, %v115_v45  ;;  %v145_v56 = vsub.f32 %v137_v43, %v141_v46  ;;  %v160_v57 = vsub.f32 %v152_v47, %v156_v48  ;;  %v182_v58 = vunpack.c.l.bf16 %v273_v44 }
   0xd   :  { %251 = vst [vmem:[%s398_s2 + $0x10] sm:$0xf] %v73_v36  ;;  %v133_v60 = vpack.c.bf16 0.0, %v130_v51  ;;  %v175_v61 = vsub.f32 %v167_v52, %v171_v53  ;;  %v186_v62 = vunpack.c.l.bf16 %v274_v49  ;;  %v197_v63 = vunpack.c.h.bf16 %v273_v44 }
   0xe   :  { %254 = vst [vmem:[%s398_s2 + $0x14] sm:$0xf] %v88_v40  ;;  %v148_v0 = vpack.c.bf16 0.0, %v145_v56  ;;  %v163_v1 = vpack.c.bf16 0.0, %v160_v57  ;;  %v201_v2 = vunpack.c.h.bf16 %v274_v49  ;;  %v212_v3 = vunpack.c.l.bf16 %v279_v54 }
   0xf   :  { %257 = vst [vmem:[%s398_s2 + $0x18] sm:$0xf] %v103_v50  ;;  %v178_v4 = vpack.c.bf16 0.0, %v175_v61  ;;  %v190_v5 = vsub.f32 %v182_v58, %v186_v62  ;;  %v216_v6 = vunpack.c.l.bf16 %v280_v59  ;;  %v227_v7 = vunpack.c.h.bf16 %v279_v54 }
  0x10   :  { %260 = vst [vmem:[%s398_s2 + $0x1c] sm:$0xf] %v118_v55  ;;  %v205_v8 = vsub.f32 %v197_v63, %v201_v2  ;;  %v231_v9 = vunpack.c.h.bf16 %v280_v59 }
  0x11   :  { %263 = vst [vmem:[%s398_s2 + $0x20] sm:$0xf] %v133_v60  ;;  %v193_v10 = vpack.c.bf16 0.0, %v190_v5  ;;  %v220_v11 = vsub.f32 %v212_v3, %v216_v6 }
  0x12   :  { %266 = vst [vmem:[%s398_s2 + $0x24] sm:$0xf] %v148_v0  ;;  %v208_v12 = vpack.c.bf16 0.0, %v205_v8  ;;  %v235_v13 = vsub.f32 %v227_v7, %v231_v9 }
  0x13   :  { %269 = vst [vmem:[%s398_s2 + $0x28] sm:$0xf] %v163_v1  ;;  %v223_v14 = vpack.c.bf16 0.0, %v220_v11 }
  0x14   :  { %272 = vst [vmem:[%s398_s2 + $0x2c] sm:$0xf] %v178_v4  ;;  %v238_v15 = vpack.c.bf16 0.0, %v235_v13 }
  0x15   :  { %275 = vst [vmem:[%s398_s2 + $0x30] sm:$0xf] %v193_v10 }
  0x16   :  { %278 = vst [vmem:[%s398_s2 + $0x34] sm:$0xf] %v208_v12 }
  0x17   :  { %281 = vst [vmem:[%s398_s2 + $0x38] sm:$0xf] %v223_v14 }
  0x18   :  { %284 = vst [vmem:[%s398_s2 + $0x3c] sm:$0xf] %v238_v15 }

// kernel: sub.3
= control target key start
LH: loop header
LB: loop body
LE: loop exit
PB: predicated region body
PF: predicated region fallthrough
CT: control target
= control target key end

     0   :  { %s396_s0 = inlined_call_operand.vmem [shape: bf16[128,32], index: 0, kind: input, shape index: {}]   ;;  %s397_s1 = inlined_call_operand.vmem [shape: bf16[128,32], index: 1, kind: input, shape index: {}]   ;;  %s398_s2 = inlined_call_operand.vmem [shape: bf16[128,32], index: 2, kind: output, shape index: {}]  }
   0x1   :  { %v3_v0 = vld [vmem:[%s396_s0] sm:$0xff]   ;;  %v243_v2 = vld [vmem:[%s396_s0 + $0x8] sm:$0xff]   ;;  %v249_v8 = vld [vmem:[%s396_s0 + $0x10] sm:$0xff]  }
   0x2   :  { %v6_v1 = vld [vmem:[%s397_s1] sm:$0xff]   ;;  %v4_v3 = vunpack.c.l.bf16 %v3_v0  ;;  %v17_v5 = vunpack.c.h.bf16 %v3_v0  ;;  %v244_v7 = vld [vmem:[%s397_s1 + $0x8] sm:$0xff]   ;;  %v250_v9 = vld [vmem:[%s397_s1 + $0x10] sm:$0xff]   ;;  %v32_v10 = vunpack.c.l.bf16 %v243_v2  ;;  %v47_v12 = vunpack.c.h.bf16 %v243_v2 }
   0x3   :  { %v7_v4 = vunpack.c.l.bf16 %v6_v1  ;;  %v21_v6 = vunpack.c.h.bf16 %v6_v1  ;;  %v36_v11 = vunpack.c.l.bf16 %v244_v7  ;;  %v51_v13 = vunpack.c.h.bf16 %v244_v7  ;;  %v255_v14 = vld [vmem:[%s396_s0 + $0x18] sm:$0xff]   ;;  %v261_v24 = vld [vmem:[%s396_s0 + $0x20] sm:$0xff]   ;;  %v267_v34 = vld [vmem:[%s396_s0 + $0x28] sm:$0xff]  }
   0x4   :  { %v62_v17 = vunpack.c.l.bf16 %v249_v8  ;;  %v66_v18 = vunpack.c.l.bf16 %v250_v9  ;;  %v256_v19 = vld [vmem:[%s397_s1 + $0x18] sm:$0xff]   ;;  %v77_v22 = vunpack.c.h.bf16 %v249_v8  ;;  %v81_v23 = vunpack.c.h.bf16 %v250_v9  ;;  %v262_v29 = vld [vmem:[%s397_s1 + $0x20] sm:$0xff]   ;;  %v268_v35 = vld [vmem:[%s397_s1 + $0x28] sm:$0xff]  }
   0x5   :  { %v11_v15 = vsub.f32 %v4_v3, %v7_v4  ;;  %v25_v16 = vsub.f32 %v17_v5, %v21_v6  ;;  %v40_v20 = vsub.f32 %v32_v10, %v36_v11  ;;  %v55_v21 = vsub.f32 %v47_v12, %v51_v13  ;;  %v273_v44 = vld [vmem:[%s396_s0 + $0x30] sm:$0xff]   ;;  %v279_v54 = vld [vmem:[%s396_s0 + $0x38] sm:$0xff]  }
   0x6   :  { %v70_v27 = vsub.f32 %v62_v17, %v66_v18  ;;  %v92_v28 = vunpack.c.l.bf16 %v255_v14  ;;  %v85_v32 = vsub.f32 %v77_v22, %v81_v23  ;;  %v96_v33 = vunpack.c.l.bf16 %v256_v19  ;;  %v274_v49 = vld [vmem:[%s397_s1 + $0x30] sm:$0xff]   ;;  %v280_v59 = vld [vmem:[%s397_s1 + $0x38] sm:$0xff]  }
   0x7   :  { %v13_v25 = vpack.c.bf16 0.0, %v11_v15  ;;  %v28_v26 = vpack.c.bf16 0.0, %v25_v16  ;;  %v43_v30 = vpack.c.bf16 0.0, %v40_v20  ;;  %v58_v31 = vpack.c.bf16 0.0, %v55_v21 }
   0x8   :  { %v73_v36 = vpack.c.bf16 0.0, %v70_v27  ;;  %v107_v37 = vunpack.c.h.bf16 %v255_v14  ;;  %v111_v38 = vunpack.c.h.bf16 %v256_v19  ;;  %v122_v39 = vunpack.c.l.bf16 %v261_v24 }
   0x9   :  { %14 = vst [vmem:[%s398_s2] sm:$0xf] %v13_v25  ;;  %v88_v40 = vpack.c.bf16 0.0, %v85_v32  ;;  %v100_v41 = vsub.f32 %v92_v28, %v96_v33  ;;  %v126_v42 = vunpack.c.l.bf16 %v262_v29  ;;  %v137_v43 = vunpack.c.h.bf16 %v261_v24 }
   0xa   :  { %242 = vst [vmem:[%s398_s2 + $0x4] sm:$0xf] %v28_v26  ;;  %v115_v45 = vsub.f32 %v107_v37, %v111_v38  ;;  %v141_v46 = vunpack.c.h.bf16 %v262_v29  ;;  %v152_v47 = vunpack.c.l.bf16 %v267_v34  ;;  %v156_v48 = vunpack.c.l.bf16 %v268_v35 }
   0xb   :  { %245 = vst [vmem:[%s398_s2 + $0x8] sm:$0xf] %v43_v30  ;;  %v103_v50 = vpack.c.bf16 0.0, %v100_v41  ;;  %v130_v51 = vsub.f32 %v122_v39, %v126_v42  ;;  %v167_v52 = vunpack.c.h.bf16 %v267_v34  ;;  %v171_v53 = vunpack.c.h.bf16 %v268_v35 }
   0xc   :  { %248 = vst [vmem:[%s398_s2 + $0xc] sm:$0xf] %v58_v31  ;;  %v118_v55 = vpack.c.bf16 0.0, %v115_v45  ;;  %v145_v56 = vsub.f32 %v137_v43, %v141_v46  ;;  %v160_v57 = vsub.f32 %v152_v47, %v156_v48  ;;  %v182_v58 = vunpack.c.l.bf16 %v273_v44 }
   0xd   :  { %251 = vst [vmem:[%s398_s2 + $0x10] sm:$0xf] %v73_v36  ;;  %v133_v60 = vpack.c.bf16 0.0, %v130_v51  ;;  %v175_v61 = vsub.f32 %v167_v52, %v171_v53  ;;  %v186_v62 = vunpack.c.l.bf16 %v274_v49  ;;  %v197_v63 = vunpack.c.h.bf16 %v273_v44 }
   0xe   :  { %254 = vst [vmem:[%s398_s2 + $0x14] sm:$0xf] %v88_v40  ;;  %v148_v0 = vpack.c.bf16 0.0, %v145_v56  ;;  %v163_v1 = vpack.c.bf16 0.0, %v160_v57  ;;  %v201_v2 = vunpack.c.h.bf16 %v274_v49  ;;  %v212_v3 = vunpack.c.l.bf16 %v279_v54 }
   0xf   :  { %257 = vst [vmem:[%s398_s2 + $0x18] sm:$0xf] %v103_v50  ;;  %v178_v4 = vpack.c.bf16 0.0, %v175_v61  ;;  %v190_v5 = vsub.f32 %v182_v58, %v186_v62  ;;  %v216_v6 = vunpack.c.l.bf16 %v280_v59  ;;  %v227_v7 = vunpack.c.h.bf16 %v279_v54 }
  0x10   :  { %260 = vst [vmem:[%s398_s2 + $0x1c] sm:$0xf] %v118_v55  ;;  %v205_v8 = vsub.f32 %v197_v63, %v201_v2  ;;  %v231_v9 = vunpack.c.h.bf16 %v280_v59 }
  0x11   :  { %263 = vst [vmem:[%s398_s2 + $0x20] sm:$0xf] %v133_v60  ;;  %v193_v10 = vpack.c.bf16 0.0, %v190_v5  ;;  %v220_v11 = vsub.f32 %v212_v3, %v216_v6 }
  0x12   :  { %266 = vst [vmem:[%s398_s2 + $0x24] sm:$0xf] %v148_v0  ;;  %v208_v12 = vpack.c.bf16 0.0, %v205_v8  ;;  %v235_v13 = vsub.f32 %v227_v7, %v231_v9 }
  0x13   :  { %269 = vst [vmem:[%s398_s2 + $0x28] sm:$0xf] %v163_v1  ;;  %v223_v14 = vpack.c.bf16 0.0, %v220_v11 }
  0x14   :  { %272 = vst [vmem:[%s398_s2 + $0x2c] sm:$0xf] %v178_v4  ;;  %v238_v15 = vpack.c.bf16 0.0, %v235_v13 }
  0x15   :  { %275 = vst [vmem:[%s398_s2 + $0x30] sm:$0xf] %v193_v10 }
  0x16   :  { %278 = vst [vmem:[%s398_s2 + $0x34] sm:$0xf] %v208_v12 }
  0x17   :  { %281 = vst [vmem:[%s398_s2 + $0x38] sm:$0xf] %v223_v14 }
  0x18   :  { %284 = vst [vmem:[%s398_s2 + $0x3c] sm:$0xf] %v238_v15 }

// kernel: sketchgnn_forward.17
= control target key start
LH: loop header
LB: loop body
LE: loop exit
PB: predicated region body
PF: predicated region fallthrough
CT: control target
= control target key end

     0   :  { %s506_s15 = smov 0   ;;  %s508_s16 = smov 0   ;;  %s564_s0 = inlined_call_operand.vmem [shape: bf16[4,32,8], index: 0, kind: input, shape index: {}]   ;;  %s565_s1 = inlined_call_operand.vmem [shape: bf16[8,64], index: 1, kind: input, shape index: {}]   ;;  %s566_s2 = inlined_call_operand.vmem [shape: f32[1,64], index: 2, kind: input, shape index: {}]   ;;  %s567_s3 = inlined_call_operand.vmem [shape: f32[1,64], index: 3, kind: input, shape index: {}]   ;;  %s568_s4 = inlined_call_operand.vmem [shape: bf16[32,64], index: 4, kind: output, shape index: {}]  }
   0x1   :  { %s510_s17 = smov 0  }
   0x2 LB: > { %s23_s18 = sadd.s32 1, %s475_s16  ;;  %p407_p0 = scmp.ge.s32.totalorder %s479_s17, 1  ;;  %s479_s17 = sphi %s510_s17, %s14_s17   ;;  %s475_s16 = sphi %s508_s16, %s570_s16   ;;  %s471_s15 = sphi %s506_s15, %s569_s15  }
   0x3   : > { %p24_p1 = scmp.ge.s32.totalorder %s23_s18, 4  ;;  %p181_p2 = scmp.lt.s32.totalorder %s479_s17, 5 }
   0x5   : > { %s572_s18 = smov (%p24_p1, %s23_s18), 0  ;;  %p182_p3 = pnand %p407_p0, %p181_p2 }
   0x6   : > { %p212_p4 = scmp.lt.s32.totalorder (!%p182_p3), %s471_s15, 3  ;;  %p420_p5 = scmp.ne.s32.totalorder (!%p182_p3), %s471_s15, 0 }
   0x7   : > { %185 = sbr.rel (%p182_p3) target bundleno = 189 (0xbd), region = 36 }
   0xc   : > { %v232_v0 = vld [vmem:[%s565_s1] sm:$0xf]  ;;  %vm250_vm0 = vcmask 1043456   ;;  %s213_s21 = scalar_select %p212_p4, %s471_s15, 3  ;;  %vm243_vm1 = vcmask 64512  }
   0xd   : > { %v252_v1 = vsel %vm250_vm0, %v232_v0, 0  ;;  %v455_v4 = vld [vmem:[%s566_s2] ss:$0 sm:$0xff] }
   0xe   : > { %261 = vmatpush.bf16.msra.mxu0 %v252_v1  ;;  %430 = vmatpush.bf16.msra.mxu1 %v252_v1  ;;  %s427_s22 = sshll.u32 %s213_s21, 4  ;;  %v456_v5 = vld [vmem:[%s567_s3] ss:$0 sm:$0xff] }
   0xf   : > { %s219_s25 = scalar_lea.vmem %s564_s0, %s427_s22 }
  0x10   : > { %v428_v2 = vld [vmem:[%s219_s25] sm:$0xff]  ;;  %v429_v3 = vld [vmem:[%s219_s25 + $0x8] sm:$0xff] }
  0x11   : > { %418 = vmatmul.msk.bf16.vlgmr.msra.gmra.mxu0 %vm243_vm1, %v428_v2  ;;  %419 = vmatmul.msk.bf16.vlgmr.msra.gmra.mxu1 %vm243_vm1, %v429_v3 }
  0x8e   : > { %v263_v6 = vpop.f32.mrf.mxu0  ;;  %v268_v7 = vpop.f32.mrf.mxu1 }
  0x8f   : > { %v277_v8 = vmul.f32 %v455_v4, %v263_v6  ;;  %v279_v9 = vmul.f32 %v455_v4, %v268_v7 }
  0x91   : > { %v285_v10 = vadd.f32 %v456_v5, %v277_v8  ;;  %v287_v11 = vadd.f32 %v456_v5, %v279_v9 }
  0x93   : > { %v289_v12 = vmax.f32 %v285_v10, 0.0  ;;  %v291_v13 = vmax.f32 %v287_v11, 0.0 }
  0x96   : > { %v265_v14 = vpop.f32.mrf.mxu0  ;;  %v270_v15 = vpop.f32.mrf.mxu1 }
  0x97   : > { %v278_v16 = vmul.f32 %v455_v4, %v265_v14  ;;  %v280_v17 = vmul.f32 %v455_v4, %v270_v15  ;;  %296 = sbr.rel (%p420_p5) target bundleno = 161 (0xa1), region = 40 }
  0x99   : > { %v286_v18 = vadd.f32 %v456_v5, %v278_v16  ;;  %v288_v19 = vadd.f32 %v456_v5, %v280_v17 }
  0x9b   : > { %v290_v20 = vmax.f32 %v286_v18, 0.0  ;;  %v292_v21 = vmax.f32 %v288_v19, 0.0 }
  0x9c   : > { %vm297_vm2 = vcmask 523264  }
  0x9d   : > { %298 = vst.msk [vmem:[#allocation2] sm:$0xff] %vm297_vm2, %v289_v12 }
  0x9e   : > { %299 = vst.msk [vmem:[#allocation2 + $0x8] sm:$0xff] %vm297_vm2, %v290_v20 }
  0x9f   : > { %300 = vst.msk [vmem:[#allocation2 + $0x10] sm:$0xff] %vm297_vm2, %v291_v13 }
  0xa0   : > { %301 = vst.msk [vmem:[#allocation2 + $0x18] sm:$0xff] %vm297_vm2, %v292_v21 }
  0xa1 PF: > { %p421_p6 = scmp.le.s32.totalorder %s471_s15, 0 }
  0xa3   : > { %305 = sbr.rel (%p421_p6) target bundleno = 175 (0xaf), region = 44 }
  0xa8   : > { %v306_v22 = vld [vmem:[#allocation2] sm:$0xff]  ;;  %vm314_vm3 = vcmask 523264   ;;  %v307_v23 = vld [vmem:[#allocation2 + $0x8] sm:$0xff]  ;;  %v308_v24 = vld [vmem:[#allocation2 + $0x10] sm:$0xff] }
  0xa9   : > { %v310_v25 = vmax.f32 %v306_v22, %v289_v12  ;;  %v311_v26 = vmax.f32 %v307_v23, %v290_v20  ;;  %v312_v27 = vmax.f32 %v308_v24, %v291_v13  ;;  %v309_v28 = vld [vmem:[#allocation2 + $0x18] sm:$0xff] }
  0xaa   : > { %v313_v29 = vmax.f32 %v309_v28, %v292_v21 }
  0xab   : > { %315 = vst.msk [vmem:[#allocation2] sm:$0xff] %vm314_vm3, %v310_v25 }
  0xac   : > { %316 = vst.msk [vmem:[#allocation2 + $0x8] sm:$0xff] %vm314_vm3, %v311_v26 }
  0xad   : > { %317 = vst.msk [vmem:[#allocation2 + $0x10] sm:$0xff] %vm314_vm3, %v312_v27 }
  0xae   : > { %318 = vst.msk [vmem:[#allocation2 + $0x18] sm:$0xff] %vm314_vm3, %v313_v29 }
  0xaf PF: > { %p422_p7 = scmp.ne.s32.totalorder %s471_s15, 3 }
  0xb1   : > { %322 = sbr.rel (%p422_p7) target bundleno = 189 (0xbd), region = 48 }
  0xb6   : > { %v323_v30 = vld [vmem:[#allocation2] sm:$0xff]  ;;  %vm331_vm4 = vcmask 519168   ;;  %v324_v31 = vld [vmem:[#allocation2 + $0x8] sm:$0xff]  ;;  %v325_v32 = vld [vmem:[#allocation2 + $0x10] sm:$0xff] }
  0xb7   : > { %v327_v33 = vpack.c.bf16 %v323_v30, %v323_v30  ;;  %v328_v34 = vpack.c.bf16 %v324_v31, %v324_v31  ;;  %v329_v35 = vpack.c.bf16 %v325_v32, %v325_v32  ;;  %v326_v36 = vld [vmem:[#allocation2 + $0x18] sm:$0xff] }
  0xb8   : > { %v330_v37 = vpack.c.bf16 %v326_v36, %v326_v36 }
  0xb9   : > { %332 = vst.msk [vmem:[%s568_s4] sm:$0xf] %vm331_vm4, %v327_v33 }
  0xba   : > { %333 = vst.msk [vmem:[%s568_s4 + $0x4] sm:$0xf] %vm331_vm4, %v328_v34 }
  0xbb   : > { %334 = vst.msk [vmem:[%s568_s4 + $0x8] sm:$0xf] %vm331_vm4, %v329_v35 }
  0xbc   : > { %335 = vst.msk [vmem:[%s568_s4 + $0xc] sm:$0xf] %vm331_vm4, %v330_v37 }
  0xbd PF: > { %s14_s17 = sadd.s32 1, %s479_s17   ;;  %s569_s15 = smov %s475_s16 }
  0xbe   : > { %p11_p8 = scmp.ge.s32.totalorder %s14_s17, 6   ;;  %s570_s16 = smov %s572_s18 }
  0xc0   :  { %13 = sbr.rel (!%p11_p8) target bundleno = 2 (0x2), region = 78 }

// kernel: sketchgnn_forward.16
= control target key start
LH: loop header
LB: loop body
LE: loop exit
PB: predicated region body
PF: predicated region fallthrough
CT: control target
= control target key end

     0   :  { %vm109_vm0 = vcmask 1043456   ;;  %vm84_vm1 = vcmask 64512   ;;  %vm163_vm2 = vcmask 523264   ;;  %vm24_vm3 = vcmask 516096   ;;  %s470_s1 = inlined_call_operand.vmem [shape: bf16[8,64], index: 1, kind: input, shape index: {}]   ;;  %s471_s0 = inlined_call_operand.vmem [shape: bf16[128,8], index: 0, kind: input, shape index: {}]   ;;  %s472_s2 = inlined_call_operand.vmem [shape: f32[1,64], index: 2, kind: input, shape index: {}]   ;;  %s473_s3 = inlined_call_operand.vmem [shape: f32[1,64], index: 3, kind: input, shape index: {}]   ;;  %s474_s4 = inlined_call_operand.vmem [shape: f32[1,64], index: 4, kind: output, shape index: {0}]   ;;  %s475_s5 = inlined_call_operand.vmem [shape: f32[1,64], index: 5, kind: output, shape index: {1}]  }
   0x1   :  { %v43_v0 = vld [vmem:[%s470_s1] sm:$0xf]  ;;  %v337_v3 = vld [vmem:[%s471_s0 + $0x10] sm:$0xff]  ;;  %v336_v6 = vld [vmem:[%s471_s0 + $0x8] sm:$0xff]  ;;  %v349_v23 = vmov 0.0  }
   0x2   :  { %v111_v1 = vsel %vm109_vm0, %v43_v0, 0  ;;  %v335_v2 = vld [vmem:[%s471_s0] sm:$0xff]  ;;  %v341_v5 = vld [vmem:[%s471_s0 + $0x30] sm:$0xff]  ;;  %v338_v7 = vld [vmem:[%s471_s0 + $0x18] sm:$0xff]  ;;  %25 = vst.msk [vmem:[#allocation2] sm:$0x1] %vm24_vm3, %v349_v23 }
   0x3   :  { %120 = vmatpush.bf16.msra.mxu0 %v111_v1  ;;  %343 = vmatpush.bf16.msra.mxu1 %v111_v1  ;;  %v339_v4 = vld [vmem:[%s471_s0 + $0x20] sm:$0xff]  ;;  %v340_v8 = vld [vmem:[%s471_s0 + $0x28] sm:$0xff]  ;;  %v342_v9 = vld [vmem:[%s471_s0 + $0x38] sm:$0xff]  ;;  %26 = vst.msk [vmem:[#allocation3] sm:$0x1] %vm24_vm3, %v349_v23 }
   0x4   :  { %344 = vmatpush.bf16.msra.mxu2 %v111_v1  ;;  %345 = vmatpush.bf16.msra.mxu3 %v111_v1 }
   0x6   :  { %327 = vmatmul.msk.bf16.vlgmr.msra.gmra.mxu0 %vm84_vm1, %v335_v2  ;;  %329 = vmatmul.msk.bf16.vlgmr.msra.gmra.mxu1 %vm84_vm1, %v337_v3 }
   0x7   :  { %331 = vmatmul.msk.bf16.vlgmr.msra.gmra.mxu2 %vm84_vm1, %v339_v4  ;;  %333 = vmatmul.msk.bf16.vlgmr.msra.gmra.mxu3 %vm84_vm1, %v341_v5 }
  0x16   :  { %328 = vmatmul.msk.bf16.gmra.mxu0 %vm84_vm1, %v336_v6  ;;  %330 = vmatmul.msk.bf16.gmra.mxu1 %vm84_vm1, %v338_v7 }
  0x17   :  { %332 = vmatmul.msk.bf16.gmra.mxu2 %vm84_vm1, %v340_v8  ;;  %334 = vmatmul.msk.bf16.gmra.mxu3 %vm84_vm1, %v342_v9 }
  0x83   :  { %v122_v10 = vpop.f32.mrf.mxu0  ;;  %v132_v11 = vpop.f32.mrf.mxu1 }
  0x84   :  { %v205_v20 = vmul.f32 %v122_v10, %v122_v10  ;;  %v164_v24 = vsel %vm163_vm2, %v122_v10, 0.0  ;;  %v209_v34 = vmul.f32 %v132_v11, %v132_v11  ;;  %v171_v40 = vsel %vm163_vm2, %v132_v11, 0.0 }
  0x86   :  { %v221_v28 = vsel %vm163_vm2, %v205_v20, 0.0  ;;  %v228_v46 = vsel %vm163_vm2, %v209_v34, 0.0 }
  0x8a   :  { %v142_v12 = vpop.f32.mrf.mxu2  ;;  %v415_v15 = vpop.f32.mrf.mxu3 }
  0x8b   :  { %v124_v13 = vpop.f32.mrf.mxu0  ;;  %v134_v14 = vpop.f32.mrf.mxu1  ;;  %v213_v56 = vmul.f32 %v142_v12, %v142_v12  ;;  %v179_v62 = vsel %vm163_vm2, %v142_v12, 0.0 }
  0x8c   :  { %v206_v18 = vmul.f32 %v124_v13, %v124_v13  ;;  %v165_v21 = vsel %vm163_vm2, %v124_v13, 0.0  ;;  %v210_v41 = vmul.f32 %v134_v14, %v134_v14  ;;  %v173_v47 = vsel %vm163_vm2, %v134_v14, 0.0 }
  0x8d   :  { %v166_v27 = vadd.f32 %v165_v21, %v164_v24  ;;  %v236_v4 = vsel %vm163_vm2, %v213_v56, 0.0  ;;  %v217_v14 = vmul.f32 %v415_v15, %v415_v15 }
  0x8e   :  { %v222_v25 = vsel %vm163_vm2, %v206_v18, 0.0  ;;  %v230_v51 = vsel %vm163_vm2, %v210_v41, 0.0 }
  0x8f   :  { %v223_v30 = vadd.f32 %v222_v25, %v221_v28 }
  0x92   :  { %v144_v17 = vpop.f32.mrf.mxu2  ;;  %v154_v33 = vpop.f32.mrf.mxu3 }
  0x93   :  { %v127_v16 = vpop.f32.mrf.mxu0  ;;  %v137_v19 = vpop.f32.mrf.mxu1  ;;  %v214_v63 = vmul.f32 %v144_v17, %v144_v17  ;;  %v181_v5 = vsel %vm163_vm2, %v144_v17, 0.0  ;;  %v187_v17 = vsel %vm163_vm2, %v415_v15, 0.0  ;;  %v218_v21 = vmul.f32 %v154_v33, %v154_v33 }
  0x94   :  { %v207_v22 = vmul.f32 %v127_v16, %v127_v16  ;;  %v167_v26 = vsel %vm163_vm2, %v127_v16, 0.0  ;;  %v211_v48 = vmul.f32 %v137_v19, %v137_v19  ;;  %v175_v52 = vsel %vm163_vm2, %v137_v19, 0.0 }
  0x95   :  { %v168_v31 = vadd.f32 %v167_v26, %v166_v27  ;;  %v238_v9 = vsel %vm163_vm2, %v214_v63, 0.0  ;;  %v244_v26 = vsel %vm163_vm2, %v217_v14, 0.0  ;;  %v189_v27 = vsel %vm163_vm2, %v154_v33, 0.0 }
  0x96   :  { %v224_v29 = vsel %vm163_vm2, %v207_v22, 0.0  ;;  %v232_v57 = vsel %vm163_vm2, %v211_v48, 0.0 }
  0x97   :  { %v225_v37 = vadd.f32 %v224_v29, %v223_v30 }
  0x9a   :  { %v147_v39 = vpop.f32.mrf.mxu2  ;;  %v157_v61 = vpop.f32.mrf.mxu3 }
  0x9b   :  { %v129_v32 = vpop.f32.mrf.mxu0  ;;  %v139_v45 = vpop.f32.mrf.mxu1  ;;  %v215_v6 = vmul.f32 %v147_v39, %v147_v39  ;;  %v183_v10 = vsel %vm163_vm2, %v147_v39, 0.0  ;;  %v219_v28 = vmul.f32 %v157_v61, %v157_v61 }
  0x9c   :  { %v169_v35 = vsel %vm163_vm2, %v129_v32, 0.0  ;;  %v208_v36 = vmul.f32 %v129_v32, %v129_v32  ;;  %v212_v53 = vmul.f32 %v139_v45, %v139_v45  ;;  %v177_v58 = vsel %vm163_vm2, %v139_v45, 0.0 }
  0x9d   :  { %v170_v38 = vadd.f32 %v169_v35, %v168_v31  ;;  %v240_v16 = vsel %vm163_vm2, %v215_v6, 0.0  ;;  %v246_v31 = vsel %vm163_vm2, %v218_v21, 0.0  ;;  %v191_v32 = vsel %vm163_vm2, %v157_v61, 0.0 }
  0x9e   :  { %v226_v42 = vsel %vm163_vm2, %v208_v36, 0.0  ;;  %v234_v0 = vsel %vm163_vm2, %v212_v53, 0.0  ;;  %v248_v36 = vsel %vm163_vm2, %v219_v28, 0.0  ;;  %v204_v53 = vld [vmem:[#allocation3] sm:$0x1] }
  0x9f   :  { %v172_v43 = vadd.f32 %v171_v40, %v170_v38  ;;  %v227_v44 = vadd.f32 %v226_v42, %v225_v37 }
  0xa1   :  { %v229_v49 = vadd.f32 %v228_v46, %v227_v44  ;;  %v174_v50 = vadd.f32 %v173_v47, %v172_v43 }
  0xa2   :  { %v149_v3 = vpop.f32.mrf.mxu2  ;;  %v159_v25 = vpop.f32.mrf.mxu3 }
  0xa3   :  { %v176_v54 = vadd.f32 %v175_v52, %v174_v50  ;;  %v231_v55 = vadd.f32 %v230_v51, %v229_v49  ;;  %v216_v11 = vmul.f32 %v149_v3, %v149_v3  ;;  %v185_v18 = vsel %vm163_vm2, %v149_v3, 0.0  ;;  %v162_v50 = vld [vmem:[#allocation2] sm:$0x1] }
  0xa4   :  { %v220_v34 = vmul.f32 %v159_v25, %v159_v25  ;;  %v193_v37 = vsel %vm163_vm2, %v159_v25, 0.0 }
  0xa5   :  { %v178_v59 = vadd.f32 %v177_v58, %v176_v54  ;;  %v233_v60 = vadd.f32 %v232_v57, %v231_v55  ;;  %v242_v22 = vsel %vm163_vm2, %v216_v11, 0.0 }
  0xa6   :  { %v250_v40 = vsel %vm163_vm2, %v220_v34, 0.0 }
  0xa7   :  { %v180_v1 = vadd.f32 %v179_v62, %v178_v59  ;;  %v235_v2 = vadd.f32 %v234_v0, %v233_v60 }
  0xa9   :  { %v237_v7 = vadd.f32 %v236_v4, %v235_v2  ;;  %v182_v8 = vadd.f32 %v181_v5, %v180_v1  ;;  %v269_v5 = vld [vmem:[%s472_s2] sm:$0x1] }
  0xab   :  { %v184_v13 = vadd.f32 %v183_v10, %v182_v8  ;;  %v239_v12 = vadd.f32 %v238_v9, %v237_v7  ;;  %v283_v9 = vld [vmem:[%s473_s3] sm:$0x1] }
  0xad   :  { %v241_v19 = vadd.f32 %v240_v16, %v239_v12  ;;  %v186_v20 = vadd.f32 %v185_v18, %v184_v13 }
  0xaf   :  { %v188_v23 = vadd.f32 %v187_v17, %v186_v20  ;;  %v243_v24 = vadd.f32 %v242_v22, %v241_v19 }
  0xb1   :  { %v245_v29 = vadd.f32 %v244_v26, %v243_v24  ;;  %v190_v30 = vadd.f32 %v189_v27, %v188_v23 }
  0xb3   :  { %v192_v35 = vadd.f32 %v191_v32, %v190_v30  ;;  %v247_v15 = vadd.f32 %v246_v31, %v245_v29 }
  0xb5   :  { %v249_v38 = vadd.f32 %v248_v36, %v247_v15  ;;  %v194_v39 = vadd.f32 %v193_v37, %v192_v35 }
  0xb7   :  { %v195_v41 = vrot.slane %v194_v39, 4  ;;  %v251_v33 = vadd.f32 %v250_v40, %v249_v38 }
  0xb9   :  { %v196_v42 = vadd.f32 %v195_v41, %v194_v39  ;;  %v252_v43 = vrot.slane %v251_v33, 4 }
  0xbb   :  { %v197_v44 = vrot.slane %v196_v42, 2  ;;  %v253_v45 = vadd.f32 %v252_v43, %v251_v33 }
  0xbd   :  { %v198_v46 = vadd.f32 %v197_v44, %v196_v42  ;;  %v254_v47 = vrot.slane %v253_v45, 2 }
  0xbf   :  { %v199_v48 = vrot.slane %v198_v46, 1  ;;  %v255_v49 = vadd.f32 %v254_v47, %v253_v45 }
  0xc1   :  { %v200_v51 = vadd.f32 %v199_v48, %v198_v46  ;;  %v256_v52 = vrot.slane %v255_v49, 1 }
  0xc3   :  { %v201_v54 = vadd.f32 %v200_v51, %v162_v50  ;;  %v257_v55 = vadd.f32 %v256_v52, %v255_v49 }
  0xc5   :  { %203 = vst.msk [vmem:[#allocation2] sm:$0x1] %vm24_vm3, %v201_v54  ;;  %v258_v56 = vadd.f32 %v257_v55, %v204_v53 }
  0xc7   :  { %259 = vst.msk [vmem:[#allocation3] sm:$0x1] %vm24_vm3, %v258_v56 }
  0xcc   :  { %v263_v57 = vld [vmem:[#allocation2] sm:$0x1] }
  0xcd   :  { %v264_v58 = vmul.f32 0.0078125, %v263_v57 }
  0xce   :  { %v265_v59 = vld [vmem:[#allocation3] sm:$0x1] }
  0xcf   :  { %v266_v60 = vmul.f32 0.0078125, %v265_v59  ;;  %v267_v61 = vmul.f32 %v264_v58, %v264_v58 }
  0xd1   :  { %v268_v62 = vsub.f32 %v266_v60, %v267_v61 }
  0xd3   :  { %v270_v63 = vadd.f32 1e-05, %v268_v62 }
  0xd5   :  { %347 = vrsqrt.f32 %v270_v63  ;;  %vm277_vm5 = vweird.f32 %v270_v63 }
  0xdb   :  { %v348_v0 = vpop.eup %347 }
  0xdc   :  { %v272_v1 = vmul.f32 %v348_v0, %v270_v63  ;;  %vm278_vm4 = vweird.f32 %v348_v0 }
  0xdd   :  { %vm279_vm6 = vmor %vm277_vm5, %vm278_vm4 }
  0xde   :  { %v273_v2 = vmul.f32 %v348_v0, %v272_v1 }
  0xe0   :  { %v274_v3 = vmul.f32 0.5, %v273_v2 }
  0xe2   :  { %v275_v4 = vsub.f32 1.5, %v274_v3 }
  0xe4   :  { %v276_v6 = vmul.f32 %v348_v0, %v275_v4 }
  0xe6   :  { %v280_v7 = vsel %vm279_vm6, %v348_v0, %v276_v6 }
  0xe7   :  { %v281_v8 = vmul.f32 %v280_v7, %v269_v5 }
  0xe9   :  { %282 = vst.msk [vmem:[%s474_s4] sm:$0x1] %vm24_vm3, %v281_v8  ;;  %v284_v10 = vmul.f32 %v281_v8, %v264_v58 }
  0xeb   :  { %v285_v11 = vsub.f32 %v283_v9, %v284_v10 }
  0xed   :  { %286 = vst.msk [vmem:[%s475_s5] sm:$0x1] %vm24_vm3, %v285_v11 }

// kernel: sketchgnn_forward.22
= control target key start
LH: loop header
LB: loop body
LE: loop exit
PB: predicated region body
PF: predicated region fallthrough
CT: control target
= control target key end

     0   :  { %vm115_vm0 = vcmask 523264   ;;  %vm190_vm1 = vcmask 261120   ;;  %vm24_vm2 = vcmask 253952   ;;  %v405_v25 = vmov 0.0   ;;  %s535_s1 = inlined_call_operand.vmem [shape: bf16[64,32], index: 1, kind: input, shape index: {}]   ;;  %s536_s0 = inlined_call_operand.vmem [shape: bf16[128,64], index: 0, kind: input, shape index: {}]   ;;  %s537_s2 = inlined_call_operand.vmem [shape: f32[1,32], index: 2, kind: input, shape index: {}]   ;;  %s538_s3 = inlined_call_operand.vmem [shape: f32[1,32], index: 3, kind: input, shape index: {}]   ;;  %s539_s4 = inlined_call_operand.vmem [shape: f32[1,32], index: 4, kind: output, shape index: {0}]   ;;  %s540_s5 = inlined_call_operand.vmem [shape: f32[1,32], index: 5, kind: output, shape index: {1}]  }
   0x1   :  { %v389_v0 = vld [vmem:[%s535_s1 + $0x18] sm:$0xff]  ;;  %v388_v1 = vld [vmem:[%s535_s1 + $0x10] sm:$0xff]  ;;  %v387_v2 = vld [vmem:[%s535_s1 + $0x8] sm:$0xff]  ;;  %25 = vst.msk [vmem:[#allocation2] sm:$0x1] %vm24_vm2, %v405_v25 }
   0x2   :  { %144 = vmatpush.bf16.msra.mxu0 %v389_v0  ;;  %390 = vmatpush.bf16.msra.mxu1 %v389_v0  ;;  %v386_v3 = vld [vmem:[%s535_s1] sm:$0xff]  ;;  %v380_v5 = vld [vmem:[%s536_s0 + $0x10] sm:$0xff]  ;;  %v379_v8 = vld [vmem:[%s536_s0 + $0x8] sm:$0xff]  ;;  %26 = vst.msk [vmem:[#allocation3] sm:$0x1] %vm24_vm2, %v405_v25 }
   0x3   :  { %391 = vmatpush.bf16.msra.mxu2 %v389_v0  ;;  %392 = vmatpush.bf16.msra.mxu3 %v389_v0  ;;  %v378_v4 = vld [vmem:[%s536_s0] sm:$0xff]  ;;  %v384_v7 = vld [vmem:[%s536_s0 + $0x30] sm:$0xff]  ;;  %v381_v9 = vld [vmem:[%s536_s0 + $0x18] sm:$0xff] }
   0x4   :  { %v382_v6 = vld [vmem:[%s536_s0 + $0x20] sm:$0xff]  ;;  %v383_v10 = vld [vmem:[%s536_s0 + $0x28] sm:$0xff]  ;;  %v385_v11 = vld [vmem:[%s536_s0 + $0x38] sm:$0xff] }
   0x6   :  { %145 = vmatpush.bf16.msra.mxu0 %v388_v1  ;;  %393 = vmatpush.bf16.msra.mxu1 %v388_v1 }
   0x7   :  { %394 = vmatpush.bf16.msra.mxu2 %v388_v1  ;;  %395 = vmatpush.bf16.msra.mxu3 %v388_v1 }
   0xa   :  { %146 = vmatpush.bf16.msra.mxu0 %v387_v2  ;;  %396 = vmatpush.bf16.msra.mxu1 %v387_v2 }
   0xb   :  { %397 = vmatpush.bf16.msra.mxu2 %v387_v2  ;;  %398 = vmatpush.bf16.msra.mxu3 %v387_v2 }
   0xe   :  { %147 = vmatpush.bf16.msra.mxu0 %v386_v3  ;;  %399 = vmatpush.bf16.msra.mxu1 %v386_v3 }
   0xf   :  { %400 = vmatpush.bf16.msra.mxu2 %v386_v3  ;;  %401 = vmatpush.bf16.msra.mxu3 %v386_v3 }
  0x11   :  { %370 = vmatmul.msk.bf16.vlgmr.msra.gmra.mxu0 %vm115_vm0, %v378_v4  ;;  %372 = vmatmul.msk.bf16.vlgmr.msra.gmra.mxu1 %vm115_vm0, %v380_v5 }
  0x12   :  { %374 = vmatmul.msk.bf16.vlgmr.msra.gmra.mxu2 %vm115_vm0, %v382_v6  ;;  %376 = vmatmul.msk.bf16.vlgmr.msra.gmra.mxu3 %vm115_vm0, %v384_v7 }
  0x21   :  { %371 = vmatmul.msk.bf16.gmra.mxu0 %vm115_vm0, %v379_v8  ;;  %373 = vmatmul.msk.bf16.gmra.mxu1 %vm115_vm0, %v381_v9 }
  0x22   :  { %375 = vmatmul.msk.bf16.gmra.mxu2 %vm115_vm0, %v383_v10  ;;  %377 = vmatmul.msk.bf16.gmra.mxu3 %vm115_vm0, %v385_v11 }
  0x8e   :  { %v149_v12 = vpop.f32.mrf.mxu0  ;;  %v159_v13 = vpop.f32.mrf.mxu1 }
  0x8f   :  { %v232_v22 = vmul.f32 %v149_v12, %v149_v12  ;;  %v191_v26 = vsel %vm190_vm1, %v149_v12, 0.0  ;;  %v236_v36 = vmul.f32 %v159_v13, %v159_v13  ;;  %v198_v42 = vsel %vm190_vm1, %v159_v13, 0.0 }
  0x91   :  { %v248_v30 = vsel %vm190_vm1, %v232_v22, 0.0  ;;  %v255_v48 = vsel %vm190_vm1, %v236_v36, 0.0 }
  0x95   :  { %v169_v14 = vpop.f32.mrf.mxu2  ;;  %v480_v17 = vpop.f32.mrf.mxu3 }
  0x96   :  { %v151_v15 = vpop.f32.mrf.mxu0  ;;  %v161_v16 = vpop.f32.mrf.mxu1  ;;  %v240_v58 = vmul.f32 %v169_v14, %v169_v14  ;;  %v206_v0 = vsel %vm190_vm1, %v169_v14, 0.0 }
  0x97   :  { %v233_v20 = vmul.f32 %v151_v15, %v151_v15  ;;  %v192_v23 = vsel %vm190_vm1, %v151_v15, 0.0  ;;  %v237_v43 = vmul.f32 %v161_v16, %v161_v16  ;;  %v200_v49 = vsel %vm190_vm1, %v161_v16, 0.0 }
  0x98   :  { %v193_v29 = vadd.f32 %v192_v23, %v191_v26  ;;  %v263_v6 = vsel %vm190_vm1, %v240_v58, 0.0  ;;  %v244_v16 = vmul.f32 %v480_v17, %v480_v17 }
  0x99   :  { %v249_v27 = vsel %vm190_vm1, %v233_v20, 0.0  ;;  %v257_v53 = vsel %vm190_vm1, %v237_v43, 0.0 }
  0x9a   :  { %v250_v32 = vadd.f32 %v249_v27, %v248_v30 }
  0x9d   :  { %v171_v19 = vpop.f32.mrf.mxu2  ;;  %v181_v35 = vpop.f32.mrf.mxu3 }
  0x9e   :  { %v154_v18 = vpop.f32.mrf.mxu0  ;;  %v164_v21 = vpop.f32.mrf.mxu1  ;;  %v241_v1 = vmul.f32 %v171_v19, %v171_v19  ;;  %v208_v7 = vsel %vm190_vm1, %v171_v19, 0.0  ;;  %v214_v19 = vsel %vm190_vm1, %v480_v17, 0.0  ;;  %v245_v23 = vmul.f32 %v181_v35, %v181_v35 }
  0x9f   :  { %v234_v24 = vmul.f32 %v154_v18, %v154_v18  ;;  %v194_v28 = vsel %vm190_vm1, %v154_v18, 0.0  ;;  %v238_v50 = vmul.f32 %v164_v21, %v164_v21  ;;  %v202_v54 = vsel %vm190_vm1, %v164_v21, 0.0 }
  0xa0   :  { %v195_v33 = vadd.f32 %v194_v28, %v193_v29  ;;  %v265_v11 = vsel %vm190_vm1, %v241_v1, 0.0  ;;  %v271_v28 = vsel %vm190_vm1, %v244_v16, 0.0  ;;  %v216_v29 = vsel %vm190_vm1, %v181_v35, 0.0 }
  0xa1   :  { %v251_v31 = vsel %vm190_vm1, %v234_v24, 0.0  ;;  %v259_v59 = vsel %vm190_vm1, %v238_v50, 0.0 }
  0xa2   :  { %v252_v39 = vadd.f32 %v251_v31, %v250_v32 }
  0xa5   :  { %v174_v41 = vpop.f32.mrf.mxu2  ;;  %v184_v63 = vpop.f32.mrf.mxu3 }
  0xa6   :  { %v156_v34 = vpop.f32.mrf.mxu0  ;;  %v166_v47 = vpop.f32.mrf.mxu1  ;;  %v242_v8 = vmul.f32 %v174_v41, %v174_v41  ;;  %v210_v12 = vsel %vm190_vm1, %v174_v41, 0.0  ;;  %v246_v30 = vmul.f32 %v184_v63, %v184_v63 }
  0xa7   :  { %v196_v37 = vsel %vm190_vm1, %v156_v34, 0.0  ;;  %v235_v38 = vmul.f32 %v156_v34, %v156_v34  ;;  %v239_v55 = vmul.f32 %v166_v47, %v166_v47  ;;  %v204_v60 = vsel %vm190_vm1, %v166_v47, 0.0 }
  0xa8   :  { %v197_v40 = vadd.f32 %v196_v37, %v195_v33  ;;  %v267_v18 = vsel %vm190_vm1, %v242_v8, 0.0  ;;  %v273_v33 = vsel %vm190_vm1, %v245_v23, 0.0  ;;  %v218_v34 = vsel %vm190_vm1, %v184_v63, 0.0 }
  0xa9   :  { %v253_v44 = vsel %vm190_vm1, %v235_v38, 0.0  ;;  %v261_v2 = vsel %vm190_vm1, %v239_v55, 0.0  ;;  %v275_v38 = vsel %vm190_vm1, %v246_v30, 0.0  ;;  %v231_v55 = vld [vmem:[#allocation3] sm:$0x1] }
  0xaa   :  { %v199_v45 = vadd.f32 %v198_v42, %v197_v40  ;;  %v254_v46 = vadd.f32 %v253_v44, %v252_v39 }
  0xac   :  { %v256_v51 = vadd.f32 %v255_v48, %v254_v46  ;;  %v201_v52 = vadd.f32 %v200_v49, %v199_v45 }
  0xad   :  { %v176_v5 = vpop.f32.mrf.mxu2  ;;  %v186_v27 = vpop.f32.mrf.mxu3 }
  0xae   :  { %v203_v56 = vadd.f32 %v202_v54, %v201_v52  ;;  %v258_v57 = vadd.f32 %v257_v53, %v256_v51  ;;  %v243_v13 = vmul.f32 %v176_v5, %v176_v5  ;;  %v212_v20 = vsel %vm190_vm1, %v176_v5, 0.0  ;;  %v189_v52 = vld [vmem:[#allocation2] sm:$0x1] }
  0xaf   :  { %v247_v36 = vmul.f32 %v186_v27, %v186_v27  ;;  %v220_v39 = vsel %vm190_vm1, %v186_v27, 0.0 }
  0xb0   :  { %v205_v61 = vadd.f32 %v204_v60, %v203_v56  ;;  %v260_v62 = vadd.f32 %v259_v59, %v258_v57  ;;  %v269_v24 = vsel %vm190_vm1, %v243_v13, 0.0 }
  0xb1   :  { %v277_v42 = vsel %vm190_vm1, %v247_v36, 0.0 }
  0xb2   :  { %v207_v3 = vadd.f32 %v206_v0, %v205_v61  ;;  %v262_v4 = vadd.f32 %v261_v2, %v260_v62 }
  0xb4   :  { %v264_v9 = vadd.f32 %v263_v6, %v262_v4  ;;  %v209_v10 = vadd.f32 %v208_v7, %v207_v3  ;;  %v296_v7 = vld [vmem:[%s537_s2] sm:$0x1] }
  0xb6   :  { %v211_v15 = vadd.f32 %v210_v12, %v209_v10  ;;  %v266_v14 = vadd.f32 %v265_v11, %v264_v9  ;;  %v310_v11 = vld [vmem:[%s538_s3] sm:$0x1] }
  0xb8   :  { %v268_v21 = vadd.f32 %v267_v18, %v266_v14  ;;  %v213_v22 = vadd.f32 %v212_v20, %v211_v15 }
  0xba   :  { %v215_v25 = vadd.f32 %v214_v19, %v213_v22  ;;  %v270_v26 = vadd.f32 %v269_v24, %v268_v21 }
  0xbc   :  { %v272_v31 = vadd.f32 %v271_v28, %v270_v26  ;;  %v217_v32 = vadd.f32 %v216_v29, %v215_v25 }
  0xbe   :  { %v219_v37 = vadd.f32 %v218_v34, %v217_v32  ;;  %v274_v17 = vadd.f32 %v273_v33, %v272_v31 }
  0xc0   :  { %v276_v40 = vadd.f32 %v275_v38, %v274_v17  ;;  %v221_v41 = vadd.f32 %v220_v39, %v219_v37 }
  0xc2   :  { %v222_v43 = vrot.slane %v221_v41, 4  ;;  %v278_v35 = vadd.f32 %v277_v42, %v276_v40 }
  0xc4   :  { %v223_v44 = vadd.f32 %v222_v43, %v221_v41  ;;  %v279_v45 = vrot.slane %v278_v35, 4 }
  0xc6   :  { %v224_v46 = vrot.slane %v223_v44, 2  ;;  %v280_v47 = vadd.f32 %v279_v45, %v278_v35 }
  0xc8   :  { %v225_v48 = vadd.f32 %v224_v46, %v223_v44  ;;  %v281_v49 = vrot.slane %v280_v47, 2 }
  0xca   :  { %v226_v50 = vrot.slane %v225_v48, 1  ;;  %v282_v51 = vadd.f32 %v281_v49, %v280_v47 }
  0xcc   :  { %v227_v53 = vadd.f32 %v226_v50, %v225_v48  ;;  %v283_v54 = vrot.slane %v282_v51, 1 }
  0xce   :  { %v228_v56 = vadd.f32 %v227_v53, %v189_v52  ;;  %v284_v57 = vadd.f32 %v283_v54, %v282_v51 }
  0xd0   :  { %230 = vst.msk [vmem:[#allocation2] sm:$0x1] %vm24_vm2, %v228_v56  ;;  %v285_v58 = vadd.f32 %v284_v57, %v231_v55 }
  0xd2   :  { %286 = vst.msk [vmem:[#allocation3] sm:$0x1] %vm24_vm2, %v285_v58 }
  0xd7   :  { %v290_v59 = vld [vmem:[#allocation2] sm:$0x1] }
  0xd8   :  { %v291_v60 = vmul.f32 0.0078125, %v290_v59 }
  0xd9   :  { %v292_v61 = vld [vmem:[#allocation3] sm:$0x1] }
  0xda   :  { %v293_v62 = vmul.f32 0.0078125, %v292_v61  ;;  %v294_v63 = vmul.f32 %v291_v60, %v291_v60 }
  0xdc   :  { %v295_v0 = vsub.f32 %v293_v62, %v294_v63 }
  0xde   :  { %v297_v1 = vadd.f32 1e-05, %v295_v0 }
  0xe0   :  { %403 = vrsqrt.f32 %v297_v1  ;;  %vm304_vm4 = vweird.f32 %v297_v1 }
  0xe6   :  { %v404_v2 = vpop.eup %403 }
  0xe7   :  { %v299_v3 = vmul.f32 %v404_v2, %v297_v1  ;;  %vm305_vm3 = vweird.f32 %v404_v2 }
  0xe8   :  { %vm306_vm5 = vmor %vm304_vm4, %vm305_vm3 }
  0xe9   :  { %v300_v4 = vmul.f32 %v404_v2, %v299_v3 }
  0xeb   :  { %v301_v5 = vmul.f32 0.5, %v300_v4 }
  0xed   :  { %v302_v6 = vsub.f32 1.5, %v301_v5 }
  0xef   :  { %v303_v8 = vmul.f32 %v404_v2, %v302_v6 }
  0xf1   :  { %v307_v9 = vsel %vm306_vm5, %v404_v2, %v303_v8 }
  0xf2   :  { %v308_v10 = vmul.f32 %v307_v9, %v296_v7 }
  0xf4   :  { %309 = vst.msk [vmem:[%s539_s4] sm:$0x1] %vm24_vm2, %v308_v10  ;;  %v311_v12 = vmul.f32 %v308_v10, %v291_v60 }
  0xf6   :  { %v312_v13 = vsub.f32 %v310_v11, %v311_v12 }
  0xf8   :  { %313 = vst.msk [vmem:[%s540_s5] sm:$0x1] %vm24_vm2, %v312_v13 }

// kernel: sketchgnn_forward.23
= control target key start
LH: loop header
LB: loop body
LE: loop exit
PB: predicated region body
PF: predicated region fallthrough
CT: control target
= control target key end

     0   :  { %s647_s18 = smov 0   ;;  %s649_s19 = smov 0   ;;  %s720_s0 = inlined_call_operand.vmem [shape: bf16[4,32,64], index: 0, kind: input, shape index: {}]   ;;  %s721_s1 = inlined_call_operand.vmem [shape: bf16[64,32], index: 1, kind: input, shape index: {}]   ;;  %s722_s2 = inlined_call_operand.vmem [shape: f32[1,32], index: 2, kind: input, shape index: {}]   ;;  %s723_s3 = inlined_call_operand.vmem [shape: f32[1,32], index: 3, kind: input, shape index: {}]   ;;  %s724_s4 = inlined_call_operand.vmem [shape: bf16[32,32], index: 4, kind: input, shape index: {}]   ;;  %s725_s5 = inlined_call_operand.vmem [shape: bf16[32,32], index: 5, kind: output, shape index: {}]  }
   0x1   :  { %s651_s20 = smov 0  }
   0x2 LB: > { %s24_s21 = sadd.s32 1, %s611_s19  ;;  %p511_p0 = scmp.ge.s32.totalorder %s615_s20, 1  ;;  %s615_s20 = sphi %s651_s20, %s15_s20   ;;  %s611_s19 = sphi %s649_s19, %s727_s19   ;;  %s607_s18 = sphi %s647_s18, %s726_s18  }
   0x3   : > { %p25_p1 = scmp.ge.s32.totalorder %s24_s21, 4  ;;  %p217_p2 = scmp.lt.s32.totalorder %s615_s20, 5 }
   0x5   : > { %s729_s21 = smov (%p25_p1, %s24_s21), 0  ;;  %p218_p3 = pnand %p511_p0, %p217_p2 }
   0x6   : > { %p255_p4 = scmp.lt.s32.totalorder (!%p218_p3), %s607_s18, 3  ;;  %p540_p5 = scmp.ne.s32.totalorder (!%p218_p3), %s607_s18, 0 }
   0x7   : > { %221 = sbr.rel (%p218_p3) target bundleno = 205 (0xcd), region = 40 }
   0xc   : > { %v553_v0 = vld [vmem:[%s721_s1 + $0x18] sm:$0xff]  ;;  %v552_v1 = vld [vmem:[%s721_s1 + $0x10] sm:$0xff]  ;;  %s256_s26 = scalar_select %p255_p4, %s607_s18, 3  ;;  %v551_v2 = vld [vmem:[%s721_s1 + $0x8] sm:$0xff]  ;;  %vm323_vm0 = vcmask 523264  }
   0xd   : > { %334 = vmatpush.bf16.msra.mxu0 %v553_v0  ;;  %563 = vmatpush.bf16.msra.mxu1 %v553_v0  ;;  %v550_v3 = vld [vmem:[%s721_s1] sm:$0xff] }
   0xe   : > { %s547_s29 = sshll.u32 %s256_s26, 4  ;;  %v591_v6 = vld [vmem:[%s722_s2] ss:$0 sm:$0xff] }
   0xf   : > { %s262_s9 = scalar_lea.vmem %s720_s0, %s547_s29  ;;  %v592_v7 = vld [vmem:[%s723_s3] ss:$0 sm:$0xff] }
  0x10   : > { %v548_v4 = vld [vmem:[%s262_s9] sm:$0xff]  ;;  %v549_v5 = vld [vmem:[%s262_s9 + $0x8] sm:$0xff] }
  0x11   : > { %335 = vmatpush.bf16.msra.mxu0 %v552_v1  ;;  %564 = vmatpush.bf16.msra.mxu1 %v552_v1 }
  0x15   : > { %336 = vmatpush.bf16.msra.mxu0 %v551_v2  ;;  %565 = vmatpush.bf16.msra.mxu1 %v551_v2 }
  0x19   : > { %337 = vmatpush.bf16.msra.mxu0 %v550_v3  ;;  %566 = vmatpush.bf16.msra.mxu1 %v550_v3 }
  0x1c   : > { %538 = vmatmul.msk.bf16.vlgmr.msra.gmra.mxu0 %vm323_vm0, %v548_v4  ;;  %539 = vmatmul.msk.bf16.vlgmr.msra.gmra.mxu1 %vm323_vm0, %v549_v5 }
  0x99   : > { %v339_v8 = vpop.f32.mrf.mxu0  ;;  %v344_v9 = vpop.f32.mrf.mxu1 }
  0x9a   : > { %v353_v10 = vmul.f32 %v591_v6, %v339_v8  ;;  %v355_v11 = vmul.f32 %v591_v6, %v344_v9 }
  0x9c   : > { %v361_v12 = vadd.f32 %v592_v7, %v353_v10  ;;  %v363_v13 = vadd.f32 %v592_v7, %v355_v11 }
  0x9e   : > { %v365_v14 = vmax.f32 %v361_v12, 0.0  ;;  %v367_v15 = vmax.f32 %v363_v13, 0.0 }
  0xa1   : > { %v341_v16 = vpop.f32.mrf.mxu0  ;;  %v346_v17 = vpop.f32.mrf.mxu1 }
  0xa2   : > { %v354_v18 = vmul.f32 %v591_v6, %v341_v16  ;;  %v356_v19 = vmul.f32 %v591_v6, %v346_v17  ;;  %372 = sbr.rel (%p540_p5) target bundleno = 172 (0xac), region = 44 }
  0xa4   : > { %v362_v20 = vadd.f32 %v592_v7, %v354_v18  ;;  %v364_v21 = vadd.f32 %v592_v7, %v356_v19 }
  0xa6   : > { %v366_v22 = vmax.f32 %v362_v20, 0.0  ;;  %v368_v23 = vmax.f32 %v364_v21, 0.0 }
  0xa7   : > { %vm373_vm1 = vcmask 261120  }
  0xa8   : > { %374 = vst.msk [vmem:[#allocation2] sm:$0xff] %vm373_vm1, %v365_v14 }
  0xa9   : > { %375 = vst.msk [vmem:[#allocation2 + $0x8] sm:$0xff] %vm373_vm1, %v366_v22 }
  0xaa   : > { %376 = vst.msk [vmem:[#allocation2 + $0x10] sm:$0xff] %vm373_vm1, %v367_v15 }
  0xab   : > { %377 = vst.msk [vmem:[#allocation2 + $0x18] sm:$0xff] %vm373_vm1, %v368_v23 }
  0xac PF: > { %p541_p6 = scmp.le.s32.totalorder %s607_s18, 0 }
  0xae   : > { %381 = sbr.rel (%p541_p6) target bundleno = 186 (0xba), region = 48 }
  0xb3   : > { %v382_v24 = vld [vmem:[#allocation2] sm:$0xff]  ;;  %vm390_vm2 = vcmask 261120   ;;  %v383_v25 = vld [vmem:[#allocation2 + $0x8] sm:$0xff]  ;;  %v384_v26 = vld [vmem:[#allocation2 + $0x10] sm:$0xff] }
  0xb4   : > { %v386_v27 = vmax.f32 %v382_v24, %v365_v14  ;;  %v387_v28 = vmax.f32 %v383_v25, %v366_v22  ;;  %v388_v29 = vmax.f32 %v384_v26, %v367_v15  ;;  %v385_v30 = vld [vmem:[#allocation2 + $0x18] sm:$0xff] }
  0xb5   : > { %v389_v31 = vmax.f32 %v385_v30, %v368_v23 }
  0xb6   : > { %391 = vst.msk [vmem:[#allocation2] sm:$0xff] %vm390_vm2, %v386_v27 }
  0xb7   : > { %392 = vst.msk [vmem:[#allocation2 + $0x8] sm:$0xff] %vm390_vm2, %v387_v28 }
  0xb8   : > { %393 = vst.msk [vmem:[#allocation2 + $0x10] sm:$0xff] %vm390_vm2, %v388_v29 }
  0xb9   : > { %394 = vst.msk [vmem:[#allocation2 + $0x18] sm:$0xff] %vm390_vm2, %v389_v31 }
  0xba PF: > { %p542_p7 = scmp.ne.s32.totalorder %s607_s18, 3 }
  0xbc   : > { %398 = sbr.rel (%p542_p7) target bundleno = 205 (0xcd), region = 52 }
  0xc1   : > { %v399_v32 = vld [vmem:[#allocation2] sm:$0xff]  ;;  %v400_v34 = vld [vmem:[#allocation2 + $0x8] sm:$0xff]  ;;  %v401_v37 = vld [vmem:[#allocation2 + $0x10] sm:$0xff]  ;;  %vm419_vm3 = vcmask 257024  }
  0xc2   : > { %v555_v33 = vld [vmem:[%s724_s4] sm:$0xff]   ;;  %v562_v38 = vld [vmem:[%s724_s4 + $0x8] sm:$0xff]   ;;  %v402_v39 = vld [vmem:[#allocation2 + $0x18] sm:$0xff] }
  0xc3   : > { %v556_v35 = vunpack.c.l.bf16 %v555_v33  ;;  %v557_v36 = vunpack.c.h.bf16 %v555_v33  ;;  %v560_v40 = vunpack.c.l.bf16 %v562_v38  ;;  %v561_v41 = vunpack.c.h.bf16 %v562_v38 }
  0xc5   : > { %v411_v42 = vadd.f32 %v556_v35, %v399_v32  ;;  %v412_v43 = vadd.f32 %v557_v36, %v400_v34  ;;  %v413_v44 = vadd.f32 %v560_v40, %v401_v37  ;;  %v414_v45 = vadd.f32 %v561_v41, %v402_v39 }
  0xc7   : > { %v415_v46 = vpack.c.bf16 %v411_v42, %v411_v42  ;;  %v416_v47 = vpack.c.bf16 %v412_v43, %v412_v43  ;;  %v417_v48 = vpack.c.bf16 %v413_v44, %v413_v44  ;;  %v418_v49 = vpack.c.bf16 %v414_v45, %v414_v45 }
  0xc9   : > { %420 = vst.msk [vmem:[%s725_s5] sm:$0xf] %vm419_vm3, %v415_v46 }
  0xca   : > { %421 = vst.msk [vmem:[%s725_s5 + $0x4] sm:$0xf] %vm419_vm3, %v416_v47 }
  0xcb   : > { %422 = vst.msk [vmem:[%s725_s5 + $0x8] sm:$0xf] %vm419_vm3, %v417_v48 }
  0xcc   : > { %423 = vst.msk [vmem:[%s725_s5 + $0xc] sm:$0xf] %vm419_vm3, %v418_v49 }
  0xcd PF: > { %s15_s20 = sadd.s32 1, %s615_s20   ;;  %s726_s18 = smov %s611_s19 }
  0xce   : > { %p12_p8 = scmp.ge.s32.totalorder %s15_s20, 6   ;;  %s727_s19 = smov %s729_s21 }
  0xd0   :  { %14 = sbr.rel (!%p12_p8) target bundleno = 2 (0x2), region = 85 }

// kernel: sketchgnn_forward.26
= control target key start
LH: loop header
LB: loop body
LE: loop exit
PB: predicated region body
PF: predicated region fallthrough
CT: control target
= control target key end

     0   :  { %vm89_vm0 = vcmask 785408   ;;  %vm24_vm1 = vcmask 253952   ;;  %v239_v8 = vmov 0.0   ;;  %vm116_vm2 = vcmask 261120   ;;  %s320_s1 = inlined_call_operand.vmem [shape: bf16[96,32], index: 1, kind: input, shape index: {}]   ;;  %s321_s0 = inlined_call_operand.vmem [shape: bf16[32,96], index: 0, kind: input, shape index: {}]   ;;  %s322_s2 = inlined_call_operand.vmem [shape: f32[1,32], index: 2, kind: input, shape index: {}]   ;;  %s323_s3 = inlined_call_operand.vmem [shape: f32[1,32], index: 3, kind: input, shape index: {}]   ;;  %s324_s4 = inlined_call_operand.vmem [shape: f32[1,32], index: 4, kind: output, shape index: {0}]   ;;  %s325_s5 = inlined_call_operand.vmem [shape: f32[1,32], index: 5, kind: output, shape index: {1}]  }
   0x1   :  { %v229_v0 = vld [vmem:[%s320_s1 + $0x28] sm:$0xff]  ;;  %v228_v1 = vld [vmem:[%s320_s1 + $0x20] sm:$0xff]  ;;  %v227_v2 = vld [vmem:[%s320_s1 + $0x18] sm:$0xff]  ;;  %25 = vst.msk [vmem:[#allocation2] sm:$0x1] %vm24_vm1, %v239_v8 }
   0x2   :  { %98 = vmatpush.bf16.msra.mxu0 %v229_v0  ;;  %230 = vmatpush.bf16.msra.mxu1 %v229_v0  ;;  %v226_v3 = vld [vmem:[%s320_s1 + $0x10] sm:$0xff]  ;;  %v225_v4 = vld [vmem:[%s320_s1 + $0x8] sm:$0xff]  ;;  %v224_v5 = vld [vmem:[%s320_s1] sm:$0xff]  ;;  %26 = vst.msk [vmem:[#allocation3] sm:$0x1] %vm24_vm1, %v239_v8 }
   0x3   :  { %v222_v6 = vld [vmem:[%s321_s0] sm:$0xff]  ;;  %v223_v7 = vld [vmem:[%s321_s0 + $0x8] sm:$0xff] }
   0x4   :  { %v162_v59 = vld [vmem:[%s322_s2] sm:$0x1] }
   0x5   :  { %v176_v63 = vld [vmem:[%s323_s3] sm:$0x1] }
   0x6   :  { %99 = vmatpush.bf16.msra.mxu0 %v228_v1  ;;  %231 = vmatpush.bf16.msra.mxu1 %v228_v1 }
   0x8   :  { %v115_v40 = vld [vmem:[#allocation2] sm:$0x1] }
   0x9   :  { %v133_v43 = vld [vmem:[#allocation3] sm:$0x1] }
   0xa   :  { %100 = vmatpush.bf16.msra.mxu0 %v227_v2  ;;  %232 = vmatpush.bf16.msra.mxu1 %v227_v2 }
   0xe   :  { %101 = vmatpush.bf16.msra.mxu0 %v226_v3  ;;  %233 = vmatpush.bf16.msra.mxu1 %v226_v3 }
  0x12   :  { %102 = vmatpush.bf16.msra.mxu0 %v225_v4  ;;  %234 = vmatpush.bf16.msra.mxu1 %v225_v4 }
  0x16   :  { %103 = vmatpush.bf16.msra.mxu0 %v224_v5  ;;  %235 = vmatpush.bf16.msra.mxu1 %v224_v5 }
  0x19   :  { %220 = vmatmul.msk.bf16.vlgmr.msra.gmra.mxu0 %vm89_vm0, %v222_v6  ;;  %221 = vmatmul.msk.bf16.vlgmr.msra.gmra.mxu1 %vm89_vm0, %v223_v7 }
  0x96   :  { %v105_v9 = vpop.f32.mrf.mxu0  ;;  %v110_v10 = vpop.f32.mrf.mxu1 }
  0x97   :  { %v134_v11 = vmul.f32 %v105_v9, %v105_v9  ;;  %v117_v14 = vsel %vm116_vm2, %v105_v9, 0.0  ;;  %v136_v15 = vmul.f32 %v110_v10, %v110_v10  ;;  %v120_v20 = vsel %vm116_vm2, %v110_v10, 0.0 }
  0x99   :  { %v138_v19 = vsel %vm116_vm2, %v134_v11, 0.0  ;;  %v141_v25 = vsel %vm116_vm2, %v136_v15, 0.0 }
  0x9e   :  { %v107_v12 = vpop.f32.mrf.mxu0  ;;  %v112_v13 = vpop.f32.mrf.mxu1 }
  0x9f   :  { %v118_v16 = vsel %vm116_vm2, %v107_v12, 0.0  ;;  %v135_v17 = vmul.f32 %v107_v12, %v107_v12  ;;  %v137_v22 = vmul.f32 %v112_v13, %v112_v13  ;;  %v122_v26 = vsel %vm116_vm2, %v112_v13, 0.0 }
  0xa0   :  { %v119_v18 = vadd.f32 %v118_v16, %v117_v14 }
  0xa1   :  { %v139_v21 = vsel %vm116_vm2, %v135_v17, 0.0  ;;  %v143_v29 = vsel %vm116_vm2, %v137_v22, 0.0 }
  0xa2   :  { %v140_v23 = vadd.f32 %v139_v21, %v138_v19  ;;  %v121_v24 = vadd.f32 %v120_v20, %v119_v18 }
  0xa4   :  { %v123_v27 = vadd.f32 %v122_v26, %v121_v24  ;;  %v142_v28 = vadd.f32 %v141_v25, %v140_v23 }
  0xa6   :  { %v124_v30 = vrot.slane %v123_v27, 4  ;;  %v144_v31 = vadd.f32 %v143_v29, %v142_v28 }
  0xa8   :  { %v125_v32 = vadd.f32 %v124_v30, %v123_v27  ;;  %v145_v33 = vrot.slane %v144_v31, 4 }
  0xaa   :  { %v126_v34 = vrot.slane %v125_v32, 2  ;;  %v146_v35 = vadd.f32 %v145_v33, %v144_v31 }
  0xac   :  { %v127_v36 = vadd.f32 %v126_v34, %v125_v32  ;;  %v147_v37 = vrot.slane %v146_v35, 2 }
  0xae   :  { %v128_v38 = vrot.slane %v127_v36, 1  ;;  %v148_v39 = vadd.f32 %v147_v37, %v146_v35 }
  0xb0   :  { %v129_v41 = vadd.f32 %v128_v38, %v127_v36  ;;  %v149_v42 = vrot.slane %v148_v39, 1 }
  0xb2   :  { %v130_v44 = vadd.f32 %v129_v41, %v115_v40  ;;  %v150_v45 = vadd.f32 %v149_v42, %v148_v39 }
  0xb4   :  { %132 = vst.msk [vmem:[#allocation2] sm:$0x1] %vm24_vm1, %v130_v44  ;;  %v151_v46 = vadd.f32 %v150_v45, %v133_v43 }
  0xb6   :  { %152 = vst.msk [vmem:[#allocation3] sm:$0x1] %vm24_vm1, %v151_v46 }
  0xbb   :  { %v156_v47 = vld [vmem:[#allocation2] sm:$0x1] }
  0xbc   :  { %v157_v48 = vmul.f32 0.03125, %v156_v47 }
  0xbd   :  { %v158_v49 = vld [vmem:[#allocation3] sm:$0x1] }
  0xbe   :  { %v159_v50 = vmul.f32 0.03125, %v158_v49  ;;  %v160_v51 = vmul.f32 %v157_v48, %v157_v48 }
  0xc0   :  { %v161_v52 = vsub.f32 %v159_v50, %v160_v51 }
  0xc2   :  { %v163_v53 = vadd.f32 1e-05, %v161_v52 }
  0xc4   :  { %237 = vrsqrt.f32 %v163_v53  ;;  %vm170_vm4 = vweird.f32 %v163_v53 }
  0xca   :  { %v238_v54 = vpop.eup %237 }
  0xcb   :  { %v165_v55 = vmul.f32 %v238_v54, %v163_v53  ;;  %vm171_vm3 = vweird.f32 %v238_v54 }
  0xcc   :  { %vm172_vm5 = vmor %vm170_vm4, %vm171_vm3 }
  0xcd   :  { %v166_v56 = vmul.f32 %v238_v54, %v165_v55 }
  0xcf   :  { %v167_v57 = vmul.f32 0.5, %v166_v56 }
  0xd1   :  { %v168_v58 = vsub.f32 1.5, %v167_v57 }
  0xd3   :  { %v169_v60 = vmul.f32 %v238_v54, %v168_v58 }
  0xd5   :  { %v173_v61 = vsel %vm172_vm5, %v238_v54, %v169_v60 }
  0xd6   :  { %v174_v62 = vmul.f32 %v173_v61, %v162_v59 }
  0xd8   :  { %175 = vst.msk [vmem:[%s324_s4] sm:$0x1] %vm24_vm1, %v174_v62  ;;  %v177_v0 = vmul.f32 %v174_v62, %v157_v48 }
  0xda   :  { %v178_v1 = vsub.f32 %v176_v63, %v177_v0 }
  0xdc   :  { %179 = vst.msk [vmem:[%s325_s5] sm:$0x1] %vm24_vm1, %v178_v1 }

// kernel: sketchgnn_forward.27
= control target key start
LH: loop header
LB: loop body
LE: loop exit
PB: predicated region body
PF: predicated region fallthrough
CT: control target
= control target key end

     0   :  { %vm80_vm0 = vcmask 785408   ;;  %vm126_vm1 = vcmask 261120   ;;  %vm167_vm2 = vcmask 1041408   ;;  %vm200_vm3 = vcmask 1041409   ;;  %s337_s1 = inlined_call_operand.vmem [shape: bf16[96,32], index: 1, kind: input, shape index: {}]   ;;  %s338_s2 = inlined_call_operand.vmem [shape: f32[1,32], index: 2, kind: input, shape index: {}]   ;;  %s339_s3 = inlined_call_operand.vmem [shape: f32[1,32], index: 3, kind: input, shape index: {}]   ;;  %s340_s0 = inlined_call_operand.vmem [shape: bf16[32,96], index: 0, kind: input, shape index: {}]   ;;  %s341_s4 = inlined_call_operand.vmem [shape: bf16[4,32], index: 4, kind: output, shape index: {}]  }
   0x1   :  { %v261_v0 = vld [vmem:[%s337_s1 + $0x28] sm:$0xff]  ;;  %v260_v1 = vld [vmem:[%s337_s1 + $0x20] sm:$0xff]  ;;  %v259_v2 = vld [vmem:[%s337_s1 + $0x18] sm:$0xff]  ;;  %vm203_vm4 = vcmask 1042434   ;;  %vm206_vm5 = vcmask 1043459   ;;  %vm214_vm6 = vcmask 254976  }
   0x2   :  { %89 = vmatpush.bf16.msra.mxu0 %v261_v0  ;;  %262 = vmatpush.bf16.msra.mxu1 %v261_v0  ;;  %v258_v3 = vld [vmem:[%s337_s1 + $0x10] sm:$0xff]  ;;  %v257_v4 = vld [vmem:[%s337_s1 + $0x8] sm:$0xff]  ;;  %v256_v5 = vld [vmem:[%s337_s1] sm:$0xff] }
   0x3   :  { %v254_v6 = vld [vmem:[%s340_s0] sm:$0xff]  ;;  %v255_v7 = vld [vmem:[%s340_s0 + $0x8] sm:$0xff] }
   0x4   :  { %v268_v8 = vld [vmem:[%s338_s2] ss:$0 sm:$0xff] }
   0x5   :  { %v269_v9 = vld [vmem:[%s339_s3] ss:$0 sm:$0xff] }
   0x6   :  { %90 = vmatpush.bf16.msra.mxu0 %v260_v1  ;;  %263 = vmatpush.bf16.msra.mxu1 %v260_v1 }
   0xa   :  { %91 = vmatpush.bf16.msra.mxu0 %v259_v2  ;;  %264 = vmatpush.bf16.msra.mxu1 %v259_v2 }
   0xe   :  { %92 = vmatpush.bf16.msra.mxu0 %v258_v3  ;;  %265 = vmatpush.bf16.msra.mxu1 %v258_v3 }
  0x12   :  { %93 = vmatpush.bf16.msra.mxu0 %v257_v4  ;;  %266 = vmatpush.bf16.msra.mxu1 %v257_v4 }
  0x16   :  { %94 = vmatpush.bf16.msra.mxu0 %v256_v5  ;;  %267 = vmatpush.bf16.msra.mxu1 %v256_v5 }
  0x19   :  { %252 = vmatmul.msk.bf16.vlgmr.msra.gmra.mxu0 %vm80_vm0, %v254_v6  ;;  %253 = vmatmul.msk.bf16.vlgmr.msra.gmra.mxu1 %vm80_vm0, %v255_v7 }
  0x96   :  { %v96_v10 = vpop.f32.mrf.mxu0  ;;  %v101_v11 = vpop.f32.mrf.mxu1 }
  0x97   :  { %v110_v12 = vmul.f32 %v268_v8, %v96_v10  ;;  %v112_v13 = vmul.f32 %v268_v8, %v101_v11 }
  0x99   :  { %v118_v14 = vadd.f32 %v269_v9, %v110_v12  ;;  %v120_v15 = vadd.f32 %v269_v9, %v112_v13 }
  0x9b   :  { %v122_v16 = vmax.f32 %v118_v14, 0.0  ;;  %v124_v17 = vmax.f32 %v120_v15, 0.0 }
  0x9d   :  { %v127_v18 = vsel %vm126_vm1, %v122_v16, -inf  ;;  %v141_v19 = vsel %vm126_vm1, %v124_v17, -inf }
  0x9e   :  { %v128_v20 = vrot.slane %v127_v18, 4  ;;  %v142_v21 = vrot.slane %v141_v19, 4  ;;  %v98_v22 = vpop.f32.mrf.mxu0  ;;  %v103_v23 = vpop.f32.mrf.mxu1 }
  0x9f   :  { %v111_v24 = vmul.f32 %v268_v8, %v98_v22  ;;  %v113_v25 = vmul.f32 %v268_v8, %v103_v23 }
  0xa0   :  { %v129_v26 = vmax.f32 %v127_v18, %v128_v20  ;;  %v143_v27 = vmax.f32 %v141_v19, %v142_v21 }
  0xa1   :  { %v119_v28 = vadd.f32 %v269_v9, %v111_v24  ;;  %v121_v29 = vadd.f32 %v269_v9, %v113_v25 }
  0xa2   :  { %v130_v30 = vrot.slane %v129_v26, 2  ;;  %v144_v31 = vrot.slane %v143_v27, 2 }
  0xa3   :  { %v123_v32 = vmax.f32 %v119_v28, 0.0  ;;  %v125_v33 = vmax.f32 %v121_v29, 0.0 }
  0xa4   :  { %v131_v34 = vmax.f32 %v129_v26, %v130_v30  ;;  %v145_v35 = vmax.f32 %v143_v27, %v144_v31 }
  0xa5   :  { %v134_v36 = vsel %vm126_vm1, %v123_v32, -inf  ;;  %v148_v37 = vsel %vm126_vm1, %v125_v33, -inf }
  0xa6   :  { %v132_v38 = vrot.slane %v131_v34, 1  ;;  %v146_v39 = vrot.slane %v145_v35, 1  ;;  %v135_v40 = vrot.slane %v134_v36, 4  ;;  %v149_v41 = vrot.slane %v148_v37, 4 }
  0xa8   :  { %v133_v42 = vmax.f32 %v131_v34, %v132_v38  ;;  %v147_v43 = vmax.f32 %v145_v35, %v146_v39  ;;  %v136_v44 = vmax.f32 %v134_v36, %v135_v40  ;;  %v150_v45 = vmax.f32 %v148_v37, %v149_v41 }
  0xaa   :  { %v155_v46 = vpack.c.bf16 %v133_v42, %v133_v42  ;;  %v157_v47 = vpack.c.bf16 %v147_v43, %v147_v43  ;;  %v137_v48 = vrot.slane %v136_v44, 2  ;;  %v151_v49 = vrot.slane %v150_v45, 2 }
  0xac   :  { %v163_v50 = vrot.slane %v155_v46, 2  ;;  %v165_v51 = vrot.slane %v157_v47, 2  ;;  %v138_v52 = vmax.f32 %v136_v44, %v137_v48  ;;  %v152_v53 = vmax.f32 %v150_v45, %v151_v49 }
  0xae   :  { %v170_v54 = vsel %vm167_vm2, %v155_v46, %v163_v50  ;;  %v176_v55 = vsel %vm167_vm2, %v157_v47, %v165_v51  ;;  %v139_v56 = vrot.slane %v138_v52, 1  ;;  %v153_v57 = vrot.slane %v152_v53, 1 }
  0xaf   :  { %180 = vst [vmem:[#allocation1] ss:$2 sm:$0xff] %v170_v54 }
  0xb0   :  { %188 = vst [vmem:[#allocation1 + $0x20] ss:$2 sm:$0xff] %v176_v55  ;;  %v140_v58 = vmax.f32 %v138_v52, %v139_v56  ;;  %v154_v59 = vmax.f32 %v152_v53, %v153_v57 }
  0xb2   :  { %v156_v60 = vpack.c.bf16 %v140_v58, %v140_v58  ;;  %v158_v61 = vpack.c.bf16 %v154_v59, %v154_v59 }
  0xb4   :  { %v164_v62 = vrot.slane %v156_v60, 2  ;;  %v166_v63 = vrot.slane %v158_v61, 2 }
  0xb6   :  { %v173_v0 = vsel %vm167_vm2, %v156_v60, %v164_v62  ;;  %v179_v1 = vsel %vm167_vm2, %v158_v61, %v166_v63  ;;  %v181_v3 = vld.sshfl [vmem:[#allocation1] sm:$0xff pattern:$0x75643120] }
  0xb7   :  { %184 = vst [vmem:[#allocation1 + $0x10] ss:$2 sm:$0xff] %v173_v0  ;;  %v189_v2 = vld.sshfl [vmem:[#allocation1 + $0x20] sm:$0xff pattern:$0x75643120]  ;;  %v195_v9 = vunpack.c.l.b16 %v181_v3 }
  0xb8   :  { %192 = vst [vmem:[#allocation1 + $0x30] ss:$2 sm:$0xff] %v179_v1  ;;  %v197_v4 = vunpack.c.l.b16 %v189_v2 }
  0xba   :  { %v202_v11 = vrot.slane %v197_v4, 6 }
  0xbe   :  { %v185_v5 = vld.sshfl [vmem:[#allocation1 + $0x10] sm:$0xff pattern:$0x75643120] }
  0xbf   :  { %v196_v6 = vunpack.c.l.b16 %v185_v5  ;;  %v193_v7 = vld.sshfl [vmem:[#allocation1 + $0x30] sm:$0xff pattern:$0x75643120] }
  0xc0   :  { %v198_v8 = vunpack.c.l.b16 %v193_v7 }
  0xc1   :  { %v199_v10 = vrot.slane %v196_v6, 7 }
  0xc2   :  { %v205_v13 = vrot.slane %v198_v8, 5 }
  0xc3   :  { %v201_v12 = vsel %vm200_vm3, %v199_v10, %v195_v9 }
  0xc4   :  { %v204_v14 = vsel %vm203_vm4, %v202_v11, %v201_v12 }
  0xc5   :  { %v207_v15 = vsel %vm206_vm5, %v205_v13, %v204_v14 }
  0xc6   :  { %v208_v16 = vpack.c.b16 %v207_v15, %v207_v15 }
  0xc8   :  { %v209_v17 = vrot.slane %v208_v16, 2 }
  0xca   :  { %v212_v18 = vsel %vm167_vm2, %v208_v16, %v209_v17 }
  0xcb   :  { %215 = vst.msk [vmem:[%s341_s4] sm:$0x3] %vm214_vm6, %v212_v18 }

// kernel: sketchgnn_forward.28
= control target key start
LH: loop header
LB: loop body
LE: loop exit
PB: predicated region body
PF: predicated region fallthrough
CT: control target
= control target key end

     0   :  { %vm129_vm0 = vcmask 261120   ;;  %vm86_vm1 = vcmask 785408   ;;  %v315_v17 = vmov 32.0   ;;  %vm164_vm2 = vcmask 523264   ;;  %s428_s2 = inlined_call_operand.vmem [shape: bf16[96,64], index: 2, kind: input, shape index: {}]   ;;  %s429_s3 = inlined_call_operand.vmem [shape: bf16[32,64], index: 3, kind: input, shape index: {}]   ;;  %s430_s1 = inlined_call_operand.vmem [shape: bf16[4,32], index: 1, kind: input, shape index: {}]   ;;  %s431_s0 = inlined_call_operand.vmem [shape: bf16[32,96], index: 0, kind: input, shape index: {}]   ;;  %s432_s4 = inlined_call_operand.vmem [shape: f32[1,64], index: 4, kind: input, shape index: {}]   ;;  %s433_s5 = inlined_call_operand.vmem [shape: f32[1,64], index: 5, kind: input, shape index: {}]   ;;  %s434_s6 = inlined_call_operand.vmem [shape: bf16[32,64], index: 6, kind: output, shape index: {}]  }
   0x1   :  { %v301_v0 = vld [vmem:[%s428_s2 + $0x28] sm:$0xff]  ;;  %v300_v2 = vld [vmem:[%s428_s2 + $0x20] sm:$0xff]  ;;  %v299_v4 = vld [vmem:[%s428_s2 + $0x18] sm:$0xff]  ;;  %311 = vrcp.f32 %v315_v17  ;;  %vm242_vm7 = vcmask 519168  }
   0x2   :  { %v303_v1 = vld [vmem:[%s429_s3 + $0x8] sm:$0xff]  ;;  %95 = vmatpush.bf16.msra.mxu0 %v301_v0  ;;  %304 = vmatpush.bf16.msra.mxu2 %v301_v0  ;;  %v302_v3 = vld [vmem:[%s429_s3] sm:$0xff]  ;;  %v298_v6 = vld [vmem:[%s428_s2 + $0x10] sm:$0xff] }
   0x3   :  { %139 = vmatpush.bf16.msra.mxu1 %v303_v1  ;;  %v112_v5 = vld [vmem:[%s430_s1] sm:$0x3]  ;;  %v297_v7 = vld [vmem:[%s428_s2 + $0x8] sm:$0xff] }
   0x4   :  { %v296_v8 = vld [vmem:[%s428_s2] sm:$0xff]  ;;  %v295_v10 = vld [vmem:[%s431_s0 + $0x8] sm:$0xff] }
   0x5   :  { %v294_v9 = vld [vmem:[%s431_s0] sm:$0xff] }
   0x6   :  { %96 = vmatpush.bf16.msra.mxu0 %v300_v2  ;;  %305 = vmatpush.bf16.msra.mxu2 %v300_v2 }
   0x7   :  { %140 = vmatpush.bf16.msra.mxu1 %v302_v3  ;;  %v312_v27 = vpop.eup %311 }
   0x8   :  { %v179_v36 = vmul.f32 32.0, %v312_v27  ;;  %vm183_vm3 = vweird.f32 %v312_v27 }
   0xa   :  { %97 = vmatpush.bf16.msra.mxu0 %v299_v4  ;;  %306 = vmatpush.bf16.msra.mxu2 %v299_v4  ;;  %v180_v44 = vsub.f32 1.0, %v179_v36 }
   0xb   :  { %293 = vmatmul.msk.bf16.vlgmr.msra.gmra.mxu1 %vm129_vm0, %v112_v5 }
   0xc   :  { %v181_v51 = vmul.f32 %v312_v27, %v180_v44 }
   0xe   :  { %98 = vmatpush.bf16.msra.mxu0 %v298_v6  ;;  %307 = vmatpush.bf16.msra.mxu2 %v298_v6  ;;  %v182_v56 = vadd.f32 %v312_v27, %v181_v51 }
  0x10   :  { %v184_v61 = vsel %vm183_vm3, %v312_v27, %v182_v56 }
  0x12   :  { %99 = vmatpush.bf16.msra.mxu0 %v297_v7  ;;  %308 = vmatpush.bf16.msra.mxu2 %v297_v7 }
  0x16   :  { %100 = vmatpush.bf16.msra.mxu0 %v296_v8  ;;  %309 = vmatpush.bf16.msra.mxu2 %v296_v8 }
  0x19   :  { %283 = vmatmul.msk.bf16.vlgmr.msra.gmra.mxu0 %vm86_vm1, %v294_v9  ;;  %284 = vmatmul.msk.bf16.vlgmr.msra.gmra.mxu2 %vm86_vm1, %v295_v10 }
  0x88   :  { %v142_v11 = vpop.f32.mrf.mxu1 }
  0x89   :  { %v150_v14 = vperm.slane %v142_v11, 0  ;;  %v148_v15 = vrot.slane %v142_v11, 2  ;;  %v147_v16 = vrot.slane %v142_v11, 1  ;;  %v149_v23 = vrot.slane %v142_v11, 3  ;;  %v162_v11 = vld [vmem:[%s432_s4] sm:$0x1] }
  0x8b   :  { %v152_v19 = vperm.slane %v148_v15, 0  ;;  %v151_v20 = vperm.slane %v147_v16, 0  ;;  %v153_v32 = vperm.slane %v149_v23, 0  ;;  %v163_v15 = vld [vmem:[%s433_s5] sm:$0x1] }
  0x90   :  { %v144_v12 = vpop.f32.mrf.mxu1 }
  0x96   :  { %v102_v13 = vpop.f32.mrf.mxu0 }
  0x97   :  { %v384_v18 = vadd.f32 %v150_v14, %v102_v13 }
  0x99   :  { %v186_v24 = vmul.f32 %v384_v18, %v384_v18  ;;  %v165_v28 = vsel %vm164_vm2, %v384_v18, 0.0 }
  0x9b   :  { %v190_v33 = vsel %vm164_vm2, %v186_v24, 0.0 }
  0x9c   :  { %v107_v21 = vpop.f32.mrf.mxu2 }
  0x9d   :  { %v388_v25 = vadd.f32 %v152_v19, %v107_v21 }
  0x9e   :  { %v104_v22 = vpop.f32.mrf.mxu0 }
  0x9f   :  { %v390_v26 = vadd.f32 %v151_v20, %v104_v22  ;;  %v188_v34 = vmul.f32 %v388_v25, %v388_v25  ;;  %v168_v39 = vsel %vm164_vm2, %v388_v25, 0.0 }
  0xa1   :  { %v166_v29 = vsel %vm164_vm2, %v390_v26, 0.0  ;;  %v187_v30 = vmul.f32 %v390_v26, %v390_v26  ;;  %v193_v42 = vsel %vm164_vm2, %v188_v34, 0.0 }
  0xa2   :  { %v167_v31 = vadd.f32 %v166_v29, %v165_v28 }
  0xa3   :  { %v191_v35 = vsel %vm164_vm2, %v187_v30, 0.0 }
  0xa4   :  { %v192_v37 = vadd.f32 %v191_v35, %v190_v33  ;;  %v109_v38 = vpop.f32.mrf.mxu2  ;;  %v169_v41 = vadd.f32 %v168_v39, %v167_v31 }
  0xa5   :  { %v161_v40 = vadd.f32 %v153_v32, %v109_v38 }
  0xa6   :  { %v194_v47 = vadd.f32 %v193_v42, %v192_v37 }
  0xa7   :  { %v170_v43 = vsel %vm164_vm2, %v161_v40, 0.0  ;;  %v189_v45 = vmul.f32 %v161_v40, %v161_v40 }
  0xa8   :  { %v171_v46 = vadd.f32 %v170_v43, %v169_v41 }
  0xa9   :  { %v195_v48 = vsel %vm164_vm2, %v189_v45, 0.0 }
  0xaa   :  { %v172_v49 = vrot.slane %v171_v46, 4  ;;  %v196_v50 = vadd.f32 %v195_v48, %v194_v47 }
  0xac   :  { %v173_v52 = vadd.f32 %v172_v49, %v171_v46  ;;  %v197_v53 = vrot.slane %v196_v50, 4 }
  0xae   :  { %v174_v54 = vrot.slane %v173_v52, 2  ;;  %v198_v55 = vadd.f32 %v197_v53, %v196_v50 }
  0xb0   :  { %v175_v57 = vadd.f32 %v174_v54, %v173_v52  ;;  %v199_v58 = vrot.slane %v198_v55, 2 }
  0xb2   :  { %v176_v59 = vrot.slane %v175_v57, 1  ;;  %v200_v60 = vadd.f32 %v199_v58, %v198_v55 }
  0xb4   :  { %v177_v62 = vadd.f32 %v176_v59, %v175_v57  ;;  %v201_v63 = vrot.slane %v200_v60, 1 }
  0xb6   :  { %v185_v0 = vmul.f32 %v184_v61, %v177_v62  ;;  %v202_v1 = vadd.f32 %v201_v63, %v200_v60 }
  0xb8   :  { %v203_v2 = vmul.f32 %v202_v1, %v184_v61  ;;  %v204_v3 = vmul.f32 %v185_v0, %v185_v0 }
  0xba   :  { %v205_v4 = vsub.f32 %v203_v2, %v204_v3 }
  0xbc   :  { %v206_v5 = vadd.f32 1e-05, %v205_v4 }
  0xbe   :  { %313 = vrsqrt.f32 %v206_v5  ;;  %vm213_vm5 = vweird.f32 %v206_v5 }
  0xc4   :  { %v314_v6 = vpop.eup %313 }
  0xc5   :  { %v208_v7 = vmul.f32 %v314_v6, %v206_v5  ;;  %vm214_vm4 = vweird.f32 %v314_v6 }
  0xc6   :  { %vm215_vm6 = vmor %vm213_vm5, %vm214_vm4 }
  0xc7   :  { %v209_v8 = vmul.f32 %v314_v6, %v208_v7 }
  0xc9   :  { %v210_v9 = vmul.f32 0.5, %v209_v8 }
  0xcb   :  { %v211_v10 = vsub.f32 1.5, %v210_v9 }
  0xcd   :  { %v212_v12 = vmul.f32 %v314_v6, %v211_v10 }
  0xcf   :  { %v216_v13 = vsel %vm215_vm6, %v314_v6, %v212_v12 }
  0xd0   :  { %v217_v14 = vmul.f32 %v216_v13, %v162_v11 }
  0xd2   :  { %v219_v16 = vperm.slane %v217_v14, 0  ;;  %v225_v17 = vmul.f32 %v217_v14, %v185_v0 }
  0xd4   :  { %v226_v19 = vsub.f32 %v163_v15, %v225_v17  ;;  %v221_v20 = vmul.f32 %v219_v16, %v384_v18  ;;  %v222_v21 = vmul.f32 %v219_v16, %v390_v26  ;;  %v223_v22 = vmul.f32 %v219_v16, %v388_v25 }
  0xd5   :  { %v224_v23 = vmul.f32 %v219_v16, %v161_v40 }
  0xd6   :  { %v228_v24 = vperm.slane %v226_v19, 0 }
  0xd8   :  { %v230_v27 = vadd.f32 %v228_v24, %v221_v20  ;;  %v231_v28 = vadd.f32 %v228_v24, %v222_v21  ;;  %v232_v29 = vadd.f32 %v228_v24, %v223_v22  ;;  %v233_v30 = vadd.f32 %v228_v24, %v224_v23 }
  0xda   :  { %v234_v31 = vmax.f32 %v230_v27, 0.0  ;;  %v235_v32 = vmax.f32 %v231_v28, 0.0  ;;  %v236_v33 = vmax.f32 %v232_v29, 0.0  ;;  %v237_v34 = vmax.f32 %v233_v30, 0.0 }
  0xdc   :  { %v238_v35 = vpack.c.bf16 %v234_v31, %v234_v31  ;;  %v239_v36 = vpack.c.bf16 %v235_v32, %v235_v32  ;;  %v240_v37 = vpack.c.bf16 %v236_v33, %v236_v33  ;;  %v241_v38 = vpack.c.bf16 %v237_v34, %v237_v34 }
  0xde   :  { %243 = vst.msk [vmem:[%s434_s6] sm:$0xf] %vm242_vm7, %v238_v35 }
  0xdf   :  { %244 = vst.msk [vmem:[%s434_s6 + $0x4] sm:$0xf] %vm242_vm7, %v239_v36 }
  0xe0   :  { %245 = vst.msk [vmem:[%s434_s6 + $0x8] sm:$0xf] %vm242_vm7, %v240_v37 }
  0xe1   :  { %246 = vst.msk [vmem:[%s434_s6 + $0xc] sm:$0xf] %vm242_vm7, %v241_v38 }

// kernel: sketchgnn_forward.29
= control target key start
LH: loop header
LB: loop body
LE: loop exit
PB: predicated region body
PF: predicated region fallthrough
CT: control target
= control target key end

     0   :  { %vm16_vm0 = vcmask 523264   ;;  %v93_v2 = vmov 16.0   ;;  %vm64_vm2 = vcmask 1041409   ;;  %s123_s0 = inlined_call_operand.vmem [shape: bf16[2,16,64], index: 0, kind: input, shape index: {}]   ;;  %s124_s1 = inlined_call_operand.vmem [shape: bf16[2,128], index: 1, kind: output, shape index: {}]  }
   0x1   :  { %v81_v0 = vld [vmem:[%s123_s0] sm:$0xff]   ;;  %v88_v1 = vld [vmem:[%s123_s0 + $0x8] sm:$0xff]   ;;  %91 = vrcp.f32 %v93_v2  ;;  %s94_s0 = smov 64  }
   0x2   :  { %v82_v3 = vunpack.c.l.bf16 %v81_v0  ;;  %v83_v4 = vunpack.c.h.bf16 %v81_v0  ;;  %v86_v5 = vunpack.c.l.bf16 %v88_v1  ;;  %v87_v6 = vunpack.c.h.bf16 %v88_v1 }
   0x4   :  { %v35_v7 = vsel %vm16_vm0, %v82_v3, 0.0  ;;  %v36_v8 = vsel %vm16_vm0, %v83_v4, 0.0  ;;  %v44_v9 = vsel %vm16_vm0, %v86_v5, 0.0  ;;  %v45_v10 = vsel %vm16_vm0, %v87_v6, 0.0 }
   0x5   :  { %v37_v11 = vadd.f32 %v36_v8, %v35_v7  ;;  %v46_v12 = vadd.f32 %v45_v10, %v44_v9  ;;  %v17_v13 = vsel %vm16_vm0, %v82_v3, -inf  ;;  %v18_v14 = vsel %vm16_vm0, %v83_v4, -inf }
   0x6   :  { %v19_v15 = vmax.f32 %v17_v13, %v18_v14  ;;  %v26_v16 = vsel %vm16_vm0, %v86_v5, -inf  ;;  %v27_v17 = vsel %vm16_vm0, %v87_v6, -inf }
   0x7   :  { %v92_v18 = vpop.eup %91  ;;  %v38_v19 = vrot.slane %v37_v11, 4  ;;  %v47_v20 = vrot.slane %v46_v12, 4  ;;  %v28_v21 = vmax.f32 %v26_v16, %v27_v17 }
   0x8   :  { %v54_v22 = vmul.f32 16.0, %v92_v18  ;;  %v20_v23 = vrot.slane %v19_v15, 4  ;;  %vm58_vm1 = vweird.f32 %v92_v18 }
   0x9   :  { %v39_v24 = vadd.f32 %v38_v19, %v37_v11  ;;  %v48_v25 = vadd.f32 %v47_v20, %v46_v12  ;;  %v29_v26 = vrot.slane %v28_v21, 4 }
   0xa   :  { %v55_v27 = vsub.f32 1.0, %v54_v22  ;;  %v21_v28 = vmax.f32 %v19_v15, %v20_v23 }
   0xb   :  { %v40_v29 = vrot.slane %v39_v24, 2  ;;  %v49_v30 = vrot.slane %v48_v25, 2  ;;  %v30_v31 = vmax.f32 %v28_v21, %v29_v26 }
   0xc   :  { %v56_v32 = vmul.f32 %v92_v18, %v55_v27  ;;  %v22_v33 = vrot.slane %v21_v28, 2 }
   0xd   :  { %v41_v34 = vadd.f32 %v40_v29, %v39_v24  ;;  %v50_v35 = vadd.f32 %v49_v30, %v48_v25  ;;  %v31_v36 = vrot.slane %v30_v31, 2 }
   0xe   :  { %v57_v37 = vadd.f32 %v92_v18, %v56_v32  ;;  %v23_v38 = vmax.f32 %v21_v28, %v22_v33 }
   0xf   :  { %v42_v39 = vrot.slane %v41_v34, 1  ;;  %v51_v40 = vrot.slane %v50_v35, 1  ;;  %v32_v41 = vmax.f32 %v30_v31, %v31_v36 }
  0x10   :  { %v59_v42 = vsel %vm58_vm1, %v92_v18, %v57_v37  ;;  %v24_v43 = vrot.slane %v23_v38, 1 }
  0x11   :  { %v43_v44 = vadd.f32 %v42_v39, %v41_v34  ;;  %v52_v45 = vadd.f32 %v51_v40, %v50_v35  ;;  %v33_v46 = vrot.slane %v32_v41, 1 }
  0x12   :  { %v25_v47 = vmax.f32 %v23_v38, %v24_v43 }
  0x13   :  { %v60_v48 = vmul.f32 %v59_v42, %v43_v44  ;;  %v61_v49 = vmul.f32 %v59_v42, %v52_v45  ;;  %v34_v50 = vmax.f32 %v32_v41, %v33_v46 }
  0x15   :  { %v69_v51 = vsel %vm64_vm2, %v61_v49, %v60_v48  ;;  %v65_v52 = vsel %vm64_vm2, %v34_v50, %v25_v47 }
  0x16   :  { %70 = vrot.lane.b32.xlu0 %v69_v51, %s94_s0 }
  0x88   :  { %v71_v53 = vpop.permute.xlu0 %70 }
  0x89   :  { %v73_v54 = vsel %vm16_vm0, %v65_v52, %v71_v53 }
  0x8a   :  { %v74_v55 = vpack.c.bf16 %v73_v54, %v73_v54 }
  0x8c   :  { %75 = vst [vmem:[%s124_s1] sm:$0x1] %v74_v55 }

// kernel: sketchgnn_forward.30
= control target key start
LH: loop header
LB: loop body
LE: loop exit
PB: predicated region body
PF: predicated region fallthrough
CT: control target
= control target key end

     0   :  { %vm73_vm0 = vcmask 523264   ;;  %v439_v7 = vmov 32.0   ;;  %vm235_vm5 = vcmask 64512   ;;  %s602_s1 = inlined_call_operand.vmem [shape: bf16[64,64], index: 1, kind: input, shape index: {}]   ;;  %s603_s0 = inlined_call_operand.vmem [shape: bf16[32,64], index: 0, kind: input, shape index: {}]   ;;  %s604_s4 = inlined_call_operand.vmem [shape: bf16[64,8], index: 4, kind: input, shape index: {}]   ;;  %s605_s2 = inlined_call_operand.vmem [shape: f32[1,64], index: 2, kind: input, shape index: {}]   ;;  %s606_s3 = inlined_call_operand.vmem [shape: f32[1,64], index: 3, kind: input, shape index: {}]   ;;  %s607_s5 = inlined_call_operand.vmem [shape: f32[1,8], index: 5, kind: input, shape index: {}]   ;;  %s608_s6 = inlined_call_operand.vmem [shape: f32[1,8], index: 6, kind: input, shape index: {}]   ;;  %s609_s7 = inlined_call_operand.vmem [shape: f32[32,8], index: 7, kind: output, shape index: {}]  }
   0x1   :  { %v403_v0 = vld [vmem:[%s602_s1 + $0x18] sm:$0xff]  ;;  %v402_v1 = vld [vmem:[%s602_s1 + $0x10] sm:$0xff]  ;;  %v401_v2 = vld [vmem:[%s602_s1 + $0x8] sm:$0xff]  ;;  %417 = vrcp.f32 %v439_v7 }
   0x2   :  { %84 = vmatpush.bf16.msra.mxu0 %v403_v0  ;;  %408 = vmatpush.bf16.msra.mxu2 %v403_v0  ;;  %v400_v3 = vld [vmem:[%s602_s1] sm:$0xff]  ;;  %v399_v5 = vld [vmem:[%s603_s0 + $0x8] sm:$0xff]  ;;  %v407_v36 = vld [vmem:[%s604_s4 + $0x18] sm:$0xff] }
   0x3   :  { %v398_v4 = vld [vmem:[%s603_s0] sm:$0xff]  ;;  %218 = vmatpush.bf16.msra.mxu1 %v407_v36  ;;  %412 = vmatpush.bf16.msra.mxu3 %v407_v36  ;;  %v406_v42 = vld [vmem:[%s604_s4 + $0x10] sm:$0xff]  ;;  %v405_v48 = vld [vmem:[%s604_s4 + $0x8] sm:$0xff] }
   0x4   :  { %v404_v53 = vld [vmem:[%s604_s4] sm:$0xff] }
   0x5   :  { %v99_v61 = vld [vmem:[%s605_s2] sm:$0x1] }
   0x6   :  { %85 = vmatpush.bf16.msra.mxu0 %v402_v1  ;;  %409 = vmatpush.bf16.msra.mxu2 %v402_v1  ;;  %v100_v1 = vld [vmem:[%s606_s3] sm:$0x1] }
   0x7   :  { %v418_v10 = vpop.eup %417  ;;  %219 = vmatpush.bf16.msra.mxu1 %v406_v42  ;;  %413 = vmatpush.bf16.msra.mxu3 %v406_v42 }
   0x8   :  { %v115_v19 = vmul.f32 32.0, %v418_v10  ;;  %vm119_vm1 = vweird.f32 %v418_v10 }
   0xa   :  { %86 = vmatpush.bf16.msra.mxu0 %v401_v2  ;;  %410 = vmatpush.bf16.msra.mxu2 %v401_v2  ;;  %v116_v26 = vsub.f32 1.0, %v115_v19 }
   0xb   :  { %220 = vmatpush.bf16.msra.mxu1 %v405_v48  ;;  %414 = vmatpush.bf16.msra.mxu3 %v405_v48 }
   0xc   :  { %v117_v33 = vmul.f32 %v418_v10, %v116_v26 }
   0xe   :  { %87 = vmatpush.bf16.msra.mxu0 %v400_v3  ;;  %411 = vmatpush.bf16.msra.mxu2 %v400_v3  ;;  %v118_v39 = vadd.f32 %v418_v10, %v117_v33 }
   0xf   :  { %221 = vmatpush.bf16.msra.mxu1 %v404_v53  ;;  %415 = vmatpush.bf16.msra.mxu3 %v404_v53 }
  0x10   :  { %v534_v45 = vsel %vm119_vm1, %v418_v10, %v118_v39 }
  0x11   :  { %378 = vmatmul.msk.bf16.vlgmr.msra.gmra.mxu0 %vm73_vm0, %v398_v4  ;;  %379 = vmatmul.msk.bf16.vlgmr.msra.gmra.mxu2 %vm73_vm0, %v399_v5 }
  0x8e   :  { %v500_v6 = vpop.f32.mrf.mxu0 }
  0x8f   :  { %v122_v9 = vmul.f32 %v500_v6, %v500_v6  ;;  %v101_v12 = vsel %vm73_vm0, %v500_v6, 0.0 }
  0x91   :  { %v126_v16 = vsel %vm73_vm0, %v122_v9, 0.0 }
  0x94   :  { %v502_v8 = vpop.f32.mrf.mxu2 }
  0x95   :  { %v124_v17 = vmul.f32 %v502_v8, %v502_v8  ;;  %v104_v21 = vsel %vm73_vm0, %v502_v8, 0.0 }
  0x96   :  { %v506_v11 = vpop.f32.mrf.mxu0 }
  0x97   :  { %v102_v13 = vsel %vm73_vm0, %v506_v11, 0.0  ;;  %v123_v14 = vmul.f32 %v506_v11, %v506_v11  ;;  %v129_v24 = vsel %vm73_vm0, %v124_v17, 0.0 }
  0x98   :  { %v103_v15 = vadd.f32 %v102_v13, %v101_v12 }
  0x99   :  { %v127_v18 = vsel %vm73_vm0, %v123_v14, 0.0 }
  0x9a   :  { %v128_v20 = vadd.f32 %v127_v18, %v126_v16  ;;  %v105_v23 = vadd.f32 %v104_v21, %v103_v15 }
  0x9c   :  { %v520_v22 = vpop.f32.mrf.mxu2  ;;  %v130_v29 = vadd.f32 %v129_v24, %v128_v20 }
  0x9d   :  { %v106_v25 = vsel %vm73_vm0, %v520_v22, 0.0  ;;  %v125_v27 = vmul.f32 %v520_v22, %v520_v22 }
  0x9e   :  { %v107_v28 = vadd.f32 %v106_v25, %v105_v23 }
  0x9f   :  { %v131_v30 = vsel %vm73_vm0, %v125_v27, 0.0 }
  0xa0   :  { %v108_v31 = vrot.slane %v107_v28, 4  ;;  %v132_v32 = vadd.f32 %v131_v30, %v130_v29 }
  0xa2   :  { %v109_v34 = vadd.f32 %v108_v31, %v107_v28  ;;  %v133_v35 = vrot.slane %v132_v32, 4 }
  0xa4   :  { %v110_v37 = vrot.slane %v109_v34, 2  ;;  %v134_v38 = vadd.f32 %v133_v35, %v132_v32 }
  0xa6   :  { %v111_v40 = vadd.f32 %v110_v37, %v109_v34  ;;  %v135_v41 = vrot.slane %v134_v38, 2 }
  0xa8   :  { %v112_v43 = vrot.slane %v111_v40, 1  ;;  %v136_v44 = vadd.f32 %v135_v41, %v134_v38 }
  0xaa   :  { %v113_v46 = vadd.f32 %v112_v43, %v111_v40  ;;  %v137_v47 = vrot.slane %v136_v44, 1 }
  0xac   :  { %v121_v49 = vmul.f32 %v534_v45, %v113_v46  ;;  %v138_v50 = vadd.f32 %v137_v47, %v136_v44 }
  0xae   :  { %v139_v51 = vmul.f32 %v138_v50, %v534_v45  ;;  %v140_v52 = vmul.f32 %v121_v49, %v121_v49 }
  0xb0   :  { %v141_v54 = vsub.f32 %v139_v51, %v140_v52 }
  0xb2   :  { %v142_v55 = vadd.f32 1e-05, %v141_v54 }
  0xb4   :  { %419 = vrsqrt.f32 %v142_v55  ;;  %vm149_vm3 = vweird.f32 %v142_v55 }
  0xba   :  { %v420_v56 = vpop.eup %419 }
  0xbb   :  { %v144_v57 = vmul.f32 %v420_v56, %v142_v55  ;;  %vm150_vm2 = vweird.f32 %v420_v56 }
  0xbc   :  { %vm151_vm4 = vmor %vm149_vm3, %vm150_vm2 }
  0xbd   :  { %v145_v58 = vmul.f32 %v420_v56, %v144_v57 }
  0xbf   :  { %v146_v59 = vmul.f32 0.5, %v145_v58 }
  0xc1   :  { %v147_v60 = vsub.f32 1.5, %v146_v59 }
  0xc3   :  { %v148_v62 = vmul.f32 %v420_v56, %v147_v60 }
  0xc5   :  { %v152_v63 = vsel %vm151_vm4, %v420_v56, %v148_v62 }
  0xc6   :  { %v153_v0 = vmul.f32 %v152_v63, %v99_v61 }
  0xc8   :  { %v155_v2 = vperm.slane %v153_v0, 0  ;;  %v161_v3 = vmul.f32 %v153_v0, %v121_v49 }
  0xca   :  { %v162_v4 = vsub.f32 %v100_v1, %v161_v3  ;;  %v160_v5 = vmul.f32 %v155_v2, %v520_v22  ;;  %v157_v9 = vmul.f32 %v155_v2, %v500_v6  ;;  %v158_v10 = vmul.f32 %v155_v2, %v506_v11  ;;  %v233_v1 = vld [vmem:[%s607_s5] sm:$0x1] }
  0xcb   :  { %v159_v12 = vmul.f32 %v155_v2, %v502_v8 }
  0xcc   :  { %v164_v7 = vperm.slane %v162_v4, 0 }
  0xce   :  { %v169_v13 = vadd.f32 %v164_v7, %v160_v5  ;;  %v166_v14 = vadd.f32 %v164_v7, %v157_v9  ;;  %v167_v15 = vadd.f32 %v164_v7, %v158_v10  ;;  %v168_v16 = vadd.f32 %v164_v7, %v159_v12 }
  0xd0   :  { %v173_v17 = vmax.f32 %v169_v13, 0.0  ;;  %v170_v18 = vmax.f32 %v166_v14, 0.0  ;;  %v171_v19 = vmax.f32 %v167_v15, 0.0  ;;  %v172_v20 = vmax.f32 %v168_v16, 0.0 }
  0xd2   :  { %v174_v21 = vpack.c.bf16 %v171_v19, %v170_v18  ;;  %v175_v23 = vpack.c.bf16 %v173_v17, %v172_v20 }
  0xd4   :  { %396 = vmatmul.msk.bf16.vlgmr.msra.gmra.mxu1 %vm73_vm0, %v174_v21  ;;  %397 = vmatmul.msk.bf16.vlgmr.msra.gmra.mxu3 %vm73_vm0, %v175_v23 }
 0x151   :  { %v223_v22 = vpop.f32.mrf.mxu1 }
 0x152   :  { %v250_v11 = vmul.f32 %v223_v22, %v223_v22  ;;  %v236_v8 = vsel %vm235_vm5, %v223_v22, 0.0 }
 0x154   :  { %v254_v28 = vsel %vm235_vm5, %v250_v11, 0.0 }
 0x157   :  { %v228_v6 = vpop.f32.mrf.mxu3 }
 0x158   :  { %v252_v29 = vmul.f32 %v228_v6, %v228_v6  ;;  %v239_v32 = vsel %vm235_vm5, %v228_v6, 0.0 }
 0x159   :  { %v556_v24 = vpop.f32.mrf.mxu1 }
 0x15a   :  { %v237_v25 = vsel %vm235_vm5, %v556_v24, 0.0  ;;  %v251_v26 = vmul.f32 %v556_v24, %v556_v24  ;;  %v257_v35 = vsel %vm235_vm5, %v252_v29, 0.0 }
 0x15b   :  { %v238_v27 = vadd.f32 %v237_v25, %v236_v8 }
 0x15c   :  { %v255_v30 = vsel %vm235_vm5, %v251_v26, 0.0 }
 0x15d   :  { %v256_v31 = vadd.f32 %v255_v30, %v254_v28  ;;  %v240_v34 = vadd.f32 %v239_v32, %v238_v27 }
 0x15f   :  { %v230_v33 = vpop.f32.mrf.mxu3  ;;  %v258_v39 = vadd.f32 %v257_v35, %v256_v31 }
 0x160   :  { %v241_v36 = vsel %vm235_vm5, %v230_v33, 0.0  ;;  %v253_v37 = vmul.f32 %v230_v33, %v230_v33 }
 0x161   :  { %v242_v38 = vadd.f32 %v241_v36, %v240_v34 }
 0x162   :  { %v259_v40 = vsel %vm235_vm5, %v253_v37, 0.0 }
 0x163   :  { %v243_v41 = vrot.slane %v242_v38, 4  ;;  %v260_v42 = vadd.f32 %v259_v40, %v258_v39 }
 0x165   :  { %v244_v43 = vadd.f32 %v243_v41, %v242_v38  ;;  %v261_v44 = vrot.slane %v260_v42, 4 }
 0x167   :  { %v245_v46 = vrot.slane %v244_v43, 2  ;;  %v262_v47 = vadd.f32 %v261_v44, %v260_v42 }
 0x169   :  { %v246_v48 = vadd.f32 %v245_v46, %v244_v43  ;;  %v263_v49 = vrot.slane %v262_v47, 2 }
 0x16b   :  { %v247_v50 = vrot.slane %v246_v48, 1  ;;  %v264_v51 = vadd.f32 %v263_v49, %v262_v47 }
 0x16d   :  { %v248_v52 = vadd.f32 %v247_v50, %v246_v48  ;;  %v265_v53 = vrot.slane %v264_v51, 1 }
 0x16f   :  { %v249_v54 = vmul.f32 %v248_v52, %v534_v45  ;;  %v266_v55 = vadd.f32 %v265_v53, %v264_v51 }
 0x171   :  { %v267_v56 = vmul.f32 %v266_v55, %v534_v45  ;;  %v268_v57 = vmul.f32 %v249_v54, %v249_v54  ;;  %v234_v45 = vld [vmem:[%s608_s6] sm:$0x1] }
 0x173   :  { %v269_v58 = vsub.f32 %v267_v56, %v268_v57 }
 0x175   :  { %v270_v59 = vadd.f32 1e-05, %v269_v58 }
 0x177   :  { %421 = vrsqrt.f32 %v270_v59  ;;  %vm277_vm7 = vweird.f32 %v270_v59 }
 0x17d   :  { %v422_v60 = vpop.eup %421 }
 0x17e   :  { %v272_v61 = vmul.f32 %v422_v60, %v270_v59  ;;  %vm278_vm6 = vweird.f32 %v422_v60 }
 0x17f   :  { %vm279_vm8 = vmor %vm277_vm7, %vm278_vm6 }
 0x180   :  { %v273_v62 = vmul.f32 %v422_v60, %v272_v61 }
 0x182   :  { %v274_v63 = vmul.f32 0.5, %v273_v62 }
 0x184   :  { %v275_v0 = vsub.f32 1.5, %v274_v63 }
 0x186   :  { %v276_v2 = vmul.f32 %v422_v60, %v275_v0 }
 0x188   :  { %v280_v3 = vsel %vm279_vm8, %v422_v60, %v276_v2 }
 0x189   :  { %v281_v4 = vmul.f32 %v280_v3, %v233_v1 }
 0x18b   :  { %v283_v5 = vperm.slane %v281_v4, 0  ;;  %v289_v7 = vmul.f32 %v281_v4, %v249_v54 }
 0x18d   :  { %v290_v9 = vsub.f32 %v234_v45, %v289_v7  ;;  %v287_v10 = vmul.f32 %v283_v5, %v228_v6  ;;  %v285_v13 = vmul.f32 %v283_v5, %v223_v22  ;;  %v288_v18 = vmul.f32 %v283_v5, %v230_v33 }
 0x18e   :  { %v286_v19 = vmul.f32 %v283_v5, %v556_v24 }
 0x18f   :  { %v292_v12 = vperm.slane %v290_v9, 0 }
 0x191   :  { %v296_v14 = vadd.f32 %v292_v12, %v287_v10  ;;  %v294_v15 = vadd.f32 %v292_v12, %v285_v13  ;;  %v297_v20 = vadd.f32 %v292_v12, %v288_v18  ;;  %v295_v21 = vadd.f32 %v292_v12, %v286_v19 }
 0x193   :  { %v304_v16 = vsel %vm235_vm5, %v296_v14, -inf  ;;  %v298_v17 = vsel %vm235_vm5, %v294_v15, -inf  ;;  %v307_v23 = vsel %vm235_vm5, %v297_v20, -inf  ;;  %v301_v11 = vsel %vm235_vm5, %v295_v21, -inf }
 0x194   :  { %305 = vmax.xlane.f32.xlu1 %v304_v16  ;;  %299 = vmax.xlane.f32.xlu0 %v298_v17 }
 0x19c   :  { %308 = vmax.xlane.f32.xlu1 %v307_v23  ;;  %302 = vmax.xlane.f32.xlu0 %v301_v11 }
 0x207   :  { %v306_v22 = vpop.xlane.xlu1 %305  ;;  %v300_v6 = vpop.xlane.xlu0 %299 }
 0x208   :  { %v312_v8 = vsub.f32 %v296_v14, %v306_v22  ;;  %v310_v25 = vsub.f32 %v294_v15, %v300_v6 }
 0x20a   :  { %v318_v26 = vmul.f32 1.442695, %v312_v8  ;;  %v314_v27 = vmul.f32 1.442695, %v310_v25 }
 0x20c   :  { %423 = vpow2.f32 %v318_v26 }
 0x20d   :  { %425 = vpow2.f32 %v314_v27 }
 0x20f   :  { %v309_v28 = vpop.xlane.xlu1 %308  ;;  %v303_v29 = vpop.xlane.xlu0 %302 }
 0x210   :  { %v313_v30 = vsub.f32 %v297_v20, %v309_v28  ;;  %v311_v24 = vsub.f32 %v295_v21, %v303_v29 }
 0x212   :  { %v424_v31 = vpop.eup %423  ;;  %v320_v32 = vmul.f32 1.442695, %v313_v30  ;;  %v316_v33 = vmul.f32 1.442695, %v311_v24 }
 0x213   :  { %v426_v34 = vpop.eup %425  ;;  %v328_v35 = vsel %vm235_vm5, %v424_v31, 0.0 }
 0x214   :  { %427 = vpow2.f32 %v320_v32  ;;  %329 = vadd.xlane.f32.xlu0 %v328_v35  ;;  %v322_v36 = vsel %vm235_vm5, %v426_v34, 0.0 }
 0x215   :  { %429 = vpow2.f32 %v316_v33  ;;  %323 = vadd.xlane.f32.xlu2 %v322_v36 }
 0x21a   :  { %v428_v37 = vpop.eup %427 }
 0x21b   :  { %v430_v38 = vpop.eup %429  ;;  %v331_v39 = vsel %vm235_vm5, %v428_v37, 0.0 }
 0x21c   :  { %332 = vadd.xlane.f32.xlu1 %v331_v39  ;;  %v325_v40 = vsel %vm235_vm5, %v430_v38, 0.0 }
 0x21d   :  { %326 = vadd.xlane.f32.xlu2 %v325_v40 }
 0x287   :  { %v330_v41 = vpop.xlane.xlu0 %329 }
 0x288   :  { %v324_v42 = vpop.xlane.xlu2 %323  ;;  %431 = vlog2.f32 %v330_v41 }
 0x289   :  { %433 = vlog2.f32 %v324_v42 }
 0x28e   :  { %v432_v43 = vpop.eup %431 }
 0x28f   :  { %v434_v44 = vpop.eup %433  ;;  %v339_v46 = vmul.f32 0.6931472, %v432_v43  ;;  %v333_v47 = vpop.xlane.xlu1 %332 }
 0x290   :  { %v335_v48 = vmul.f32 0.6931472, %v434_v44  ;;  %435 = vlog2.f32 %v333_v47  ;;  %v327_v49 = vpop.xlane.xlu2 %326 }
 0x291   :  { %v344_v50 = vsub.f32 %v312_v8, %v339_v46  ;;  %437 = vlog2.f32 %v327_v49 }
 0x292   :  { %v342_v51 = vsub.f32 %v310_v25, %v335_v48 }
 0x293   :  { %348 = vst.msk [vmem:[%s609_s7 + $0x10] sm:$0xff] %vm235_vm5, %v344_v50 }
 0x294   :  { %346 = vst.msk [vmem:[%s609_s7] sm:$0xff] %vm235_vm5, %v342_v51 }
 0x296   :  { %v436_v52 = vpop.eup %435 }
 0x297   :  { %v438_v53 = vpop.eup %437  ;;  %v341_v54 = vmul.f32 0.6931472, %v436_v52 }
 0x298   :  { %v337_v55 = vmul.f32 0.6931472, %v438_v53 }
 0x299   :  { %v345_v56 = vsub.f32 %v313_v30, %v341_v54 }
 0x29a   :  { %v343_v57 = vsub.f32 %v311_v24, %v337_v55 }
 0x29b   :  { %349 = vst.msk [vmem:[%s609_s7 + $0x18] sm:$0xff] %vm235_vm5, %v345_v56 }
 0x29c   :  { %347 = vst.msk [vmem:[%s609_s7 + $0x8] sm:$0xff] %vm235_vm5, %v343_v57 }

// kernel: sketchgnn_forward.31
= control target key start
LH: loop header
LB: loop body
LE: loop exit
PB: predicated region body
PF: predicated region fallthrough
CT: control target
= control target key end

     0   :  { %v221_v9 = vmov 2.0   ;;  %vm105_vm0 = vcmask 254976   ;;  %vm168_vm5 = vcmask 1024   ;;  %s302_s1 = inlined_call_operand.vmem [shape: bf16[128,32], index: 1, kind: input, shape index: {}]   ;;  %s303_s0 = inlined_call_operand.vmem [shape: bf16[2,128], index: 0, kind: input, shape index: {}]   ;;  %s304_s4 = inlined_call_operand.vmem [shape: f32[1,32], index: 4, kind: input, shape index: {}]   ;;  %s305_s5 = inlined_call_operand.<no memory space> [shape: f32[1,1], index: 5, kind: input, shape index: {}]   ;;  %s306_s2 = inlined_call_operand.vmem [shape: f32[1,32], index: 2, kind: input, shape index: {}]   ;;  %s307_s3 = inlined_call_operand.vmem [shape: f32[1,32], index: 3, kind: input, shape index: {}]   ;;  %s308_s6 = inlined_call_operand.vmem [shape: f32[2,1], index: 6, kind: output, shape index: {}]  }
   0x1   :  { %v213_v0 = vld [vmem:[%s302_s1 + $0x38] sm:$0xff]  ;;  %v212_v1 = vld [vmem:[%s302_s1 + $0x30] sm:$0xff]  ;;  %v211_v2 = vld [vmem:[%s302_s1 + $0x28] sm:$0xff]  ;;  %217 = vrcp.f32 %v221_v9  ;;  %v11_v38 = vstv %s305_s5 }
   0x2   :  { %90 = vmatpush.bf16.msra.mxu0 %v213_v0  ;;  %v210_v3 = vld [vmem:[%s302_s1 + $0x20] sm:$0xff]  ;;  %v209_v4 = vld [vmem:[%s302_s1 + $0x18] sm:$0xff]  ;;  %v208_v5 = vld [vmem:[%s302_s1 + $0x10] sm:$0xff]  ;;  %12 = vst [vmem:[#allocation2] sm:$0x1] %v11_v38 }
   0x3   :  { %v207_v6 = vld [vmem:[%s302_s1 + $0x8] sm:$0xff]  ;;  %v206_v7 = vld [vmem:[%s302_s1] sm:$0xff] }
   0x4   :  { %v25_v8 = vld [vmem:[%s303_s0] sm:$0x1] }
   0x5   :  { %v103_v44 = vld [vmem:[%s306_s2] sm:$0x1] }
   0x6   :  { %91 = vmatpush.bf16.msra.mxu0 %v212_v1  ;;  %v104_v48 = vld [vmem:[%s307_s3] sm:$0x1] }
   0x7   :  { %v218_v10 = vpop.eup %217  ;;  %v215_v55 = vld [vmem:[%s304_s4] ss:$0 sm:$0xff] }
   0x8   :  { %v114_v11 = vmul.f32 2.0, %v218_v10  ;;  %vm118_vm1 = vweird.f32 %v218_v10 }
   0x9   :  { %v216_v59 = vld [vmem:[#allocation2] ss:$0 sm:$0xff] }
   0xa   :  { %92 = vmatpush.bf16.msra.mxu0 %v211_v2  ;;  %v115_v12 = vsub.f32 1.0, %v114_v11 }
   0xc   :  { %v116_v17 = vmul.f32 %v218_v10, %v115_v12 }
   0xe   :  { %93 = vmatpush.bf16.msra.mxu0 %v210_v3  ;;  %v117_v23 = vadd.f32 %v218_v10, %v116_v17 }
  0x10   :  { %v119_v29 = vsel %vm118_vm1, %v218_v10, %v117_v23 }
  0x12   :  { %94 = vmatpush.bf16.msra.mxu0 %v209_v4 }
  0x16   :  { %95 = vmatpush.bf16.msra.mxu0 %v208_v5 }
  0x1a   :  { %96 = vmatpush.bf16.msra.mxu0 %v207_v6 }
  0x1e   :  { %97 = vmatpush.bf16.msra.mxu0 %v206_v7 }
  0x21   :  { %98 = vmatmul.bf16.vlgmr.msra.gmra.mxu0 %v25_v8 }
  0x9e   :  { %v99_v13 = vpop.f32.mrf.mxu0 }
  0x9f   :  { %v121_v14 = vmul.f32 %v99_v13, %v99_v13  ;;  %v106_v15 = vsel %vm105_vm0, %v99_v13, 0.0 }
  0xa0   :  { %v107_v16 = vrot.slane %v106_v15, 4 }
  0xa1   :  { %v122_v18 = vsel %vm105_vm0, %v121_v14, 0.0 }
  0xa2   :  { %v108_v19 = vadd.f32 %v107_v16, %v106_v15  ;;  %v123_v20 = vrot.slane %v122_v18, 4 }
  0xa4   :  { %v109_v21 = vrot.slane %v108_v19, 2  ;;  %v124_v22 = vadd.f32 %v123_v20, %v122_v18 }
  0xa6   :  { %v101_v24 = vpop.f32.mrf.mxu0  ;;  %v110_v25 = vadd.f32 %v109_v21, %v108_v19  ;;  %v125_v26 = vrot.slane %v124_v22, 2 }
  0xa8   :  { %v111_v27 = vrot.slane %v110_v25, 1  ;;  %v126_v28 = vadd.f32 %v125_v26, %v124_v22 }
  0xaa   :  { %v112_v30 = vadd.f32 %v111_v27, %v110_v25  ;;  %v127_v31 = vrot.slane %v126_v28, 1 }
  0xac   :  { %v120_v32 = vmul.f32 %v119_v29, %v112_v30  ;;  %v128_v33 = vadd.f32 %v127_v31, %v126_v28 }
  0xae   :  { %v129_v34 = vmul.f32 %v128_v33, %v119_v29  ;;  %v130_v35 = vmul.f32 %v120_v32, %v120_v32 }
  0xb0   :  { %v131_v36 = vsub.f32 %v129_v34, %v130_v35 }
  0xb2   :  { %v132_v37 = vadd.f32 1e-05, %v131_v36 }
  0xb4   :  { %219 = vrsqrt.f32 %v132_v37  ;;  %vm139_vm3 = vweird.f32 %v132_v37 }
  0xba   :  { %v220_v39 = vpop.eup %219 }
  0xbb   :  { %v134_v40 = vmul.f32 %v220_v39, %v132_v37  ;;  %vm140_vm2 = vweird.f32 %v220_v39 }
  0xbc   :  { %vm141_vm4 = vmor %vm139_vm3, %vm140_vm2 }
  0xbd   :  { %v135_v41 = vmul.f32 %v220_v39, %v134_v40 }
  0xbf   :  { %v136_v42 = vmul.f32 0.5, %v135_v41 }
  0xc1   :  { %v137_v43 = vsub.f32 1.5, %v136_v42 }
  0xc3   :  { %v138_v45 = vmul.f32 %v220_v39, %v137_v43 }
  0xc5   :  { %v142_v46 = vsel %vm141_vm4, %v220_v39, %v138_v45 }
  0xc6   :  { %v143_v47 = vmul.f32 %v142_v46, %v103_v44 }
  0xc8   :  { %v145_v49 = vperm.slane %v143_v47, 0  ;;  %v148_v50 = vmul.f32 %v143_v47, %v120_v32 }
  0xca   :  { %v149_v51 = vsub.f32 %v104_v48, %v148_v50  ;;  %v147_v52 = vmul.f32 %v145_v49, %v99_v13 }
  0xcc   :  { %v151_v53 = vperm.slane %v149_v51, 0 }
  0xce   :  { %v153_v54 = vadd.f32 %v151_v53, %v147_v52 }
  0xd0   :  { %v154_v56 = vmax.f32 %v153_v54, 0.0 }
  0xd2   :  { %v159_v57 = vmul.f32 %v215_v55, %v154_v56 }
  0xd4   :  { %v160_v58 = vsel %vm105_vm0, %v159_v57, 0.0 }
  0xd5   :  { %161 = vadd.xlane.f32.xlu0 %v160_v58 }
 0x148   :  { %v162_v60 = vpop.xlane.xlu0 %161 }
 0x149   :  { %v167_v61 = vadd.f32 %v216_v59, %v162_v60 }
 0x14b   :  { %169 = vst.msk [vmem:[%s308_s6] sm:$0x3] %vm168_vm5, %v167_v61 }

</bundles_post_ra>
